<compile_context>
chip_gen: v7x
topology: tpu7x:2x2x1
jax: 0.10.0
libtpu: 0.0.40
codegen_flags: <defaults>
</compile_context>

<pallas_src>
import numpy as np
import jax
import jax.numpy as jnp
from jax.experimental import pallas as pl
from jax.experimental.pallas import tpu as pltpu

F32 = jnp.float32
BF16 = jnp.bfloat16

# lane-padded flattened spatial sizes (multiples of 128 so lane rolls are cheap)
P1 = 896    # 28*28 = 784 -> 7*128   (resBlock1 maps)
P2 = 256    # 14*14 = 196 -> 2*128   (resBlock2 maps)
P3 = 128    #  7*7  =  49 -> 1*128   (resBlock3 maps)


# ---------------------------------------------------------------------------
# In-kernel building blocks
# ---------------------------------------------------------------------------

def _res_block(phases, OW, P, w1, b1, w2, b2, wb, bb, m1, m2):
    """One ResBlock on f32 phase maps.

    phases: list of 4 f32 (Cin, P) maps: 2x2 phase split of the block input
            (phase = 2*row_parity + col_parity, inner row-major OWxOW).
    Weights w1/w2/wb are bf16 (BN folded); b*/m* are f32.
    Returns f32 (Cout, P) = conv2(relu6(conv1)) + relu6(bypass), row-major.
    """
    # ---- conv1: 3x3 / stride 2 / pad 1 via the 2x2 phase decomposition -----
    srcs = []
    for kh in range(3):
        for kw in range(3):
            t = kh * 3 + kw
            a = 0 if kh == 1 else 1          # source row parity of this tap
            b = 0 if kw == 1 else 1          # source col parity of this tap
            s = phases[a * 2 + b]
            shift = (OW if kh == 0 else 0) + (1 if kw == 0 else 0)
            if shift:
                # zero the zero-pad border taps (and anything wrapped by roll)
                s = pltpu.roll(s, shift=shift, axis=1) * m1[t]
            srcs.append(s)
    src = jnp.concatenate(srcs, axis=0).astype(BF16)          # (9*Cin, P)
    h1 = jnp.dot(w1, src, preferred_element_type=F32)
    h1 = jnp.clip(h1 + b1, 0.0, 6.0)                          # (Cout, P) f32

    # ---- conv2: 3x3 / stride 1 / pad 1, neighbours via lane rolls ----------
    srcs = []
    for kh in range(3):
        for kw in range(3):
            t = kh * 3 + kw
            d = (kh - 1) * OW + (kw - 1)
            s = pltpu.roll(h1, shift=(-d) % P, axis=1) * m2[t] if d else h1
            srcs.append(s)
    src = jnp.concatenate(srcs, axis=0).astype(BF16)          # (9*Cout, P)
    h2 = jnp.dot(w2, src, preferred_element_type=F32)
    h2 = jnp.clip(h2 + b2, 0.0, 6.0)

    # ---- bypass: 1x1 / stride 2 == even-row/even-col phase ------------------
    byp = jnp.dot(wb, phases[0].astype(BF16), preferred_element_type=F32)
    byp = jnp.clip(byp + bb, 0.0, 6.0)

    # PACT_IntegerAdd in float mode == elementwise add
    return h2 + byp


# ---------------------------------------------------------------------------
# Pallas kernels
# ---------------------------------------------------------------------------

def _first_conv_pool_kernel(p_ref, wq_ref, b_ref, o_ref):
    """5x5/s2 conv (BN folded) + bias + ReLU6 + 2x2 maxpool, one phase group.

    p_ref:  (1, 1, 49, P1) 7x7/stride-4 patches of one res1 phase group (bf16)
    wq_ref: (4*C, 49)      pool-quadrant weights, quadrant-major rows (bf16)
    b_ref:  (C, 1)         folded BN bias (f32)
    o_ref:  (1, 1, C, P1)  pooled output, already in res1's phase-split layout
    """
    p = p_ref[...][0, 0]                                      # (49, P1)
    y = jnp.dot(wq_ref[...], p, preferred_element_type=F32)   # (4C, P1)
    C = b_ref.shape[0]
    # max over quadrants commutes with the (monotone) bias add and ReLU6 clip.
    m = jnp.maximum(jnp.maximum(y[:C], y[C:2 * C]),
                    jnp.maximum(y[2 * C:3 * C], y[3 * C:]))
    out = jnp.clip(m + b_ref[...], 0.0, 6.0).astype(o_ref.dtype)
    o_ref[...] = out[None, None]


def _make_res1_kernel(OW, P):
    def kernel(x_ref, w1_ref, b1_ref, w2_ref, b2_ref, wb_ref, bb_ref,
               m1_ref, m2_ref, o_ref):
        x = x_ref[0].astype(F32)                              # (4, Cin, P)
        phases = [x[i] for i in range(4)]
        y = _res_block(phases, OW, P,
                       w1_ref[...], b1_ref[...], w2_ref[...], b2_ref[...],
                       wb_ref[...], bb_ref[...], m1_ref[...], m2_ref[...])
        o_ref[...] = y.astype(o_ref.dtype)[None]
    return kernel


def _make_tail_kernel(OW2, PP2, OW3, PP3):
    """resBlock2 + resBlock3 + FC head for one image, all in VMEM."""
    def kernel(z_ref,
               w1a, b1a, w2a, b2a, wba, bba, m1a, m2a,
               sel_ref,
               w1b, b1b, w2b, b2b, wbb, bbb, m1b, m2b,
               wfc_ref, o_ref):
        z = z_ref[0].astype(F32)                              # (4, Cin, PP2)
        ph2 = [z[i] for i in range(4)]
        y2 = _res_block(ph2, OW2, PP2,
                        w1a[...], b1a[...], w2a[...], b2a[...],
                        wba[...], bba[...], m1a[...], m2a[...])   # (16, PP2)

        # stride-2 phase split of the 14x14 map for resBlock3, done in-VMEM
        # as four tiny 0/1 selection matmuls (no lane gather, no HBM round trip)
        y2b = y2.astype(BF16)
        ph3 = [jnp.dot(y2b, sel_ref[q], preferred_element_type=F32)
               for q in range(4)]                                  # (16, PP3) x4

        y3 = _res_block(ph3, OW3, PP3,
                        w1b[...], b1b[...], w2b[...], b2b[...],
                        wbb[...], bbb[...], m1b[...], m2b[...])    # (32, PP3)

        # FC head on the in-VMEM res3 result (channels-first flatten order;
        # fc weights are zero on the lane-pad columns).
        steer = jnp.sum(y3 * wfc_ref[0], axis=(0, 1), keepdims=True)   # (1,1)
        coll = jnp.sum(y3 * wfc_ref[1], axis=(0, 1), keepdims=True)
        col = jax.lax.broadcasted_iota(jnp.int32, (1, 2), 1)
        out = jnp.where(col == 0, steer, jax.nn.sigmoid(coll))        # (1,2)
        o_ref[...] = out[None]
    return kernel


# ---------------------------------------------------------------------------
# Pallas wrappers
# ---------------------------------------------------------------------------

def first_conv_pool(patches, wq, b):
    N = patches.shape[0]
    C = b.shape[0]
    return pl.pallas_call(
        _first_conv_pool_kernel,
        out_shape=jax.ShapeDtypeStruct((N, 4, C, P1), BF16),
        grid=(N, 4),
        in_specs=[
            pl.BlockSpec((1, 1, 49, P1), lambda n, s: (n, s, 0, 0)),
            pl.BlockSpec((4 * C, 49), lambda n, s: (0, 0)),
            pl.BlockSpec((C, 1), lambda n, s: (0, 0)),
        ],
        out_specs=pl.BlockSpec((1, 1, C, P1), lambda n, s: (n, s, 0, 0)),
        compiler_params=pltpu.CompilerParams(
            dimension_semantics=("parallel", "parallel")),
    )(patches, wq, b)


def resblock1(x4, p):
    N, _, Cin, P = x4.shape
    Cout = p['w1'].shape[0]
    return pl.pallas_call(
        _make_res1_kernel(28, P),
        out_shape=jax.ShapeDtypeStruct((N, Cout, P), BF16),
        grid=(N,),
        in_specs=[
            pl.BlockSpec((1, 4, Cin, P), lambda n: (n, 0, 0, 0)),
            pl.BlockSpec(p['w1'].shape, lambda n: (0, 0)),
            pl.BlockSpec(p['b1'].shape, lambda n: (0, 0)),
            pl.BlockSpec(p['w2'].shape, lambda n: (0, 0)),
            pl.BlockSpec(p['b2'].shape, lambda n: (0, 0)),
            pl.BlockSpec(p['wb'].shape, lambda n: (0, 0)),
            pl.BlockSpec(p['bb'].shape, lambda n: (0, 0)),
            pl.BlockSpec(p['m1'].shape, lambda n: (0, 0, 0)),
            pl.BlockSpec(p['m2'].shape, lambda n: (0, 0, 0)),
        ],
        out_specs=pl.BlockSpec((1, Cout, P), lambda n: (n, 0, 0)),
        compiler_params=pltpu.CompilerParams(
            dimension_semantics=("parallel",)),
    )(x4, p['w1'], p['b1'], p['w2'], p['b2'], p['wb'], p['bb'],
      p['m1'], p['m2'])


def res23_fc(z, p2, p3, sel, wfc):
    N = z.shape[0]
    Cin2 = z.shape[2]
    args = [z,
            p2['w1'], p2['b1'], p2['w2'], p2['b2'], p2['wb'], p2['bb'],
            p2['m1'], p2['m2'],
            sel,
            p3['w1'], p3['b1'], p3['w2'], p3['b2'], p3['wb'], p3['bb'],
            p3['m1'], p3['m2'],
            wfc]
    in_specs = [pl.BlockSpec((1, 4, Cin2, P2), lambda n: (n, 0, 0, 0))]
    for a in args[1:]:
        in_specs.append(
            pl.BlockSpec(a.shape, (lambda nd: (lambda n: (0,) * nd))(a.ndim)))
    return pl.pallas_call(
        _make_tail_kernel(14, P2, 7, P3),
        out_shape=jax.ShapeDtypeStruct((N, 1, 2), F32),
        grid=(N,),
        in_specs=in_specs,
        out_specs=pl.BlockSpec((1, 1, 2), lambda n: (n, 0, 0)),
        compiler_params=pltpu.CompilerParams(
            dimension_semantics=("parallel",)),
    )(*args)


# ---------------------------------------------------------------------------
# Wrapper-side layout glue (pure data plumbing, fused by XLA)
# ---------------------------------------------------------------------------

def _first_patches(x):
    """(N,1,224,224) f32 -> (N, 4, 49, P1) bf16 7x7/stride-4 patches.

    Pooled pixel (i, j) of the 56x56 map depends on the 7x7 window of the
    (pad-2) input starting at (4i, 4j).  Columns are grouped by res1 phase
    (i%2, j%2) with row-major 28x28 inner order, so the first-conv kernel's
    output is already in resBlock1's phase-split layout.
    """
    N = x.shape[0]
    xb = x[:, 0].astype(BF16)
    xp = jnp.pad(xb, ((0, 0), (2, 2), (2, 2)))                # conv pad = 2
    taps = jnp.stack([xp[:, r:r + 221:4, c:c + 221:4]
                      for r in range(7) for c in range(7)], axis=1)
    groups = [taps[:, :, a::2, b::2].reshape(N, 1, 49, 784)
              for a in range(2) for b in range(2)]
    g = jnp.concatenate(groups, axis=1)                       # (N, 4, 49, 784)
    return jnp.pad(g, ((0, 0), (0, 0), (0, 0), (0, P1 - 784)))


def _phase_split_pad(y, OW, P_next):
    """(N, C, P) row-major OWxOW map -> (N, 4, C, P_next) 2x2 phase split."""
    N, C, _ = y.shape
    ym = y[:, :, :OW * OW].reshape(N, C, OW, OW)
    groups = [ym[:, :, a::2, b::2].reshape(N, C, (OW // 2) ** 2)
              for a in range(2) for b in range(2)]
    g = jnp.stack(groups, axis=1)
    return jnp.pad(g, ((0, 0), (0, 0), (0, 0),
                       (0, P_next - (OW // 2) ** 2)))


# ---------------------------------------------------------------------------
# Parameter preparation (fold eval-mode BN, convert torch layouts)
# ---------------------------------------------------------------------------

def _fold_bn(gamma, beta, mean, var, eps=1e-5):
    gamma, beta, mean, var = map(np.asarray, (gamma, beta, mean, var))
    scale = gamma / np.sqrt(var + eps)
    bias = beta - mean * scale
    return scale, bias


def _build_masks(OW, P):
    """Per-tap zero-pad border masks for conv1 (stride 2) and conv2 (stride 1)."""
    oh = np.arange(OW)[:, None]
    ow = np.arange(OW)[None, :]
    m1 = np.zeros((9, 1, P), np.float32)
    m2 = np.zeros((9, 1, P), np.float32)
    for kh in range(3):
        for kw in range(3):
            t = kh * 3 + kw
            v1 = np.ones((OW, OW), bool)
            if kh == 0:
                v1 &= (oh >= 1)
            if kw == 0:
                v1 &= (ow >= 1)
            ih, iw = oh + kh - 1, ow + kw - 1
            v2 = (ih >= 0) & (ih < OW) & (iw >= 0) & (iw < OW)
            m1[t, 0, :OW * OW] = v1.reshape(-1)
            m2[t, 0, :OW * OW] = v2.reshape(-1)
    return jnp.asarray(m1), jnp.asarray(m2)


def _prep_conv3x3(w, scale):
    """torch (Cout,Cin,3,3) -> tap-stacked (Cout, 9*Cin), BN folded, bf16."""
    w = np.asarray(w) * scale[:, None, None, None]
    co, ci = w.shape[:2]
    return jnp.asarray(np.transpose(w, (0, 2, 3, 1)).reshape(co, 9 * ci),
                       dtype=BF16)


def _prep_res(r, OW, P):
    s1, b1 = _fold_bn(*r['bn1'])
    s2, b2 = _fold_bn(*r['bn2'])
    sb, bb = _fold_bn(*r['bnb'])
    co = np.asarray(r['w1']).shape[0]
    m1, m2 = _build_masks(OW, P)
    return dict(
        w1=_prep_conv3x3(r['w1'], s1),
        b1=jnp.asarray(b1.reshape(co, 1), F32),
        w2=_prep_conv3x3(r['w2'], s2),
        b2=jnp.asarray(b2.reshape(co, 1), F32),
        wb=jnp.asarray(np.asarray(r['wb'])[:, :, 0, 0] * sb[:, None], BF16),
        bb=jnp.asarray(bb.reshape(co, 1), F32),
        m1=m1, m2=m2)


def _build_sel():
    """0/1 matrices mapping the 14x14 row-major map to its 4 phase groups."""
    sel = np.zeros((4, P2, P3), np.float32)
    for r in range(14):
        for s in range(14):
            q = (r % 2) * 2 + (s % 2)
            sel[q, r * 14 + s, (r // 2) * 7 + (s // 2)] = 1.0
    return jnp.asarray(sel, dtype=BF16)


def prepare_params(raw):
    sc, bi = _fold_bn(*raw['first_bn'])
    w5 = np.asarray(raw['first_w'])[:, 0] * sc[:, None, None]   # (C, 5, 5)
    C = w5.shape[0]
    # conv output (2i+dh, 2j+dw) uses the 5x5 window at offset (2dh, 2dw)
    # inside the 7x7/stride-4 patch around pooled pixel (i, j).
    wq = np.zeros((4, C, 49), np.float32)
    for dh in range(2):
        for dw in range(2):
            for kh in range(5):
                for kw in range(5):
                    wq[dh * 2 + dw, :, (kh + 2 * dh) * 7 + (kw + 2 * dw)] = \
                        w5[:, kh, kw]
    fcw = np.asarray(raw['fc_w'])                                # (2, 4C*49)
    wfc = np.zeros((2, 4 * C, P3), np.float32)
    wfc[:, :, :49] = fcw.reshape(2, 4 * C, 49)
    return dict(
        first_wq=jnp.asarray(wq.reshape(4 * C, 49), BF16),
        first_b=jnp.asarray(bi.reshape(C, 1), F32),
        res1=_prep_res(raw['res1'], 28, P1),
        res2=_prep_res(raw['res2'], 14, P2),
        res3=_prep_res(raw['res3'], 7, P3),
        sel=_build_sel(),
        wfc=jnp.asarray(wfc, F32),
    )


def init_raw(key, depth_mult=0.25):
    """Synthetic parameters in the original torch layouts."""
    C = int(32 * depth_mult)
    ks = jax.random.split(key, 6)

    def conv(k, co, ci, kh, kw):
        fan = ci * kh * kw
        return jax.random.normal(k, (co, ci, kh, kw), F32) / np.sqrt(fan)

    def bn(k, c):
        k1, k2, k3, k4 = jax.random.split(k, 4)
        gamma = 1.0 + 0.1 * jax.random.normal(k1, (c,), F32)
        beta = 0.1 * jax.random.normal(k2, (c,), F32)
        mean = 0.1 * jax.random.normal(k3, (c,), F32)
        var = jnp.abs(jax.random.normal(k4, (c,), F32)) + 0.5
        return gamma, beta, mean, var

    def res(k, ci, co):
        kk = jax.random.split(k, 6)
        return dict(w1=conv(kk[0], co, ci, 3, 3), bn1=bn(kk[1], co),
                    w2=conv(kk[2], co, co, 3, 3), bn2=bn(kk[3], co),
                    wb=conv(kk[4], co, ci, 1, 1), bnb=bn(kk[5], co))

    fc_size = 4 * C * 7 * 7
    return dict(
        first_w=conv(ks[0], C, 1, 5, 5), first_bn=bn(ks[1], C),
        res1=res(ks[2], C, C), res2=res(ks[3], C, 2 * C),
        res3=res(ks[4], 2 * C, 4 * C),
        fc_w=jax.random.normal(ks[5], (2, fc_size), F32) / np.sqrt(fc_size),
    )


# ---------------------------------------------------------------------------
# Forward pass
# ---------------------------------------------------------------------------

@jax.jit
def dronet_forward(x_nchw, params):
    patches = _first_patches(x_nchw)                           # (N, 4, 49, 896)
    x1 = first_conv_pool(patches, params['first_wq'], params['first_b'])
    y1 = resblock1(x1, params['res1'])                         # (N, C, 896)
    z = _phase_split_pad(y1, 28, P2)                           # (N, 4, C, 256)
    # TODO(synk): nn.Dropout(p=0.5) is eval-mode identity here (no train mask).
    out = res23_fc(z, params['res2'], params['res3'],
                   params['sel'], params['wfc'])               # (N, 1, 2)
    out = out.reshape(-1, 2)
    return out[:, 0], out[:, 1]


# ---------------------------------------------------------------------------

if __name__ == "__main__":
    key = jax.random.PRNGKey(0)
    k_param, k_in = jax.random.split(key)

    depth_mult = 0.25                      # first_conv_channels = 8 (small)
    raw = init_raw(k_param, depth_mult=depth_mult)
    params = prepare_params(raw)

    # 224x224 grayscale input is what the module's fc_size (4C*7*7) implies.
    x = jax.random.normal(k_in, (2, 1, 224, 224), jnp.float32)

    steer, coll = dronet_forward(x, params)
    jax.block_until_ready((steer, coll))

    assert steer.shape == (2,) and coll.shape == (2,)
    assert bool(jnp.all((coll >= 0.0) & (coll <= 1.0)))
    assert bool(jnp.all(jnp.isfinite(steer)))
    print("KERNEL_OK")
</pallas_src>

<mosaic_0001>
module attributes {stable_mosaic.version = 11 : i64} {
  func.func @_first_conv_pool_kernel(%arg0: i32, %arg1: i32, %arg2: memref<1x1x49x896xbf16, #tpu.memory_space<vmem>>, %arg3: memref<32x49xbf16, #tpu.memory_space<vmem>>, %arg4: memref<8x1xf32, #tpu.memory_space<vmem>>, %arg5: memref<1x1x8x896xbf16, #tpu.memory_space<vmem>>) attributes {dimension_semantics = [#tpu.dimension_semantics<parallel>, #tpu.dimension_semantics<parallel>], iteration_bounds = array<i64: 2, 4>, scalar_prefetch = 0 : i64, scratch_operands = 0 : i64, tpu.core_type = #tpu.core_type<tc>, window_params = [{transform_indices = @transform_0, window_bounds = array<i64: 1, 1, 49, 896>}, {pipeline_mode = #tpu.pipeline_mode<synchronous>, transform_indices = @transform_1, window_bounds = array<i64: 32, 49>}, {pipeline_mode = #tpu.pipeline_mode<synchronous>, transform_indices = @transform_2, window_bounds = array<i64: 8, 1>}, {transform_indices = @transform_3, window_bounds = array<i64: 1, 1, 8, 896>}]} {
    %c0 = arith.constant 0 : index
    %c0_0 = arith.constant 0 : index
    %c0_1 = arith.constant 0 : index
    %c0_2 = arith.constant 0 : index
    %0 = vector.load %arg2[%c0, %c0_0, %c0_1, %c0_2] : memref<1x1x49x896xbf16, #tpu.memory_space<vmem>>, vector<1x1x49x896xbf16>
    %1 = vector.shape_cast %0 : vector<1x1x49x896xbf16> to vector<49x896xbf16>
    %c0_3 = arith.constant 0 : index
    %c0_4 = arith.constant 0 : index
    %2 = vector.load %arg3[%c0_3, %c0_4] : memref<32x49xbf16, #tpu.memory_space<vmem>>, vector<32x49xbf16>
    %cst = arith.constant dense<0.000000e+00> : vector<32x896xf32>
    %3 = tpu.matmul %2, %1, %cst {dimension_numbers = #tpu.dot_dimension_numbers<[1], [0], [0], [1], [0, 0, 1, 1], [], []>} : vector<32x49xbf16>, vector<49x896xbf16>, vector<32x896xf32> -> vector<32x896xf32>
    %4 = vector.extract_strided_slice %3 {offsets = [0, 0], sizes = [8, 896], strides = [1, 1]} : vector<32x896xf32> to vector<8x896xf32>
    %5 = vector.extract_strided_slice %3 {offsets = [8, 0], sizes = [8, 896], strides = [1, 1]} : vector<32x896xf32> to vector<8x896xf32>
    %6 = arith.maximumf %4, %5 : vector<8x896xf32>
    %7 = vector.extract_strided_slice %3 {offsets = [16, 0], sizes = [8, 896], strides = [1, 1]} : vector<32x896xf32> to vector<8x896xf32>
    %8 = vector.extract_strided_slice %3 {offsets = [24, 0], sizes = [8, 896], strides = [1, 1]} : vector<32x896xf32> to vector<8x896xf32>
    %9 = arith.maximumf %7, %8 : vector<8x896xf32>
    %10 = arith.maximumf %6, %9 : vector<8x896xf32>
    %c0_5 = arith.constant 0 : index
    %c0_6 = arith.constant 0 : index
    %11 = vector.load %arg4[%c0_5, %c0_6] : memref<8x1xf32, #tpu.memory_space<vmem>>, vector<8x1xf32>
    %12 = vector.broadcast %11 : vector<8x1xf32> to vector<8x896xf32>
    %13 = arith.addf %10, %12 : vector<8x896xf32>
    %cst_7 = arith.constant 0.000000e+00 : f32
    %cst_8 = arith.constant 6.000000e+00 : f32
    %14 = vector.broadcast %cst_7 : f32 to vector<8x896xf32>
    %15 = arith.maximumf %14, %13 : vector<8x896xf32>
    %16 = vector.broadcast %cst_8 : f32 to vector<8x896xf32>
    %17 = arith.minimumf %16, %15 : vector<8x896xf32>
    %18 = arith.truncf %17 : vector<8x896xf32> to vector<8x896xbf16>
    %19 = vector.shape_cast %18 : vector<8x896xbf16> to vector<1x1x8x896xbf16>
    %c0_9 = arith.constant 0 : index
    %c0_10 = arith.constant 0 : index
    %c0_11 = arith.constant 0 : index
    %c0_12 = arith.constant 0 : index
    %20 = vector.load %arg5[%c0_9, %c0_10, %c0_11, %c0_12] : memref<1x1x8x896xbf16, #tpu.memory_space<vmem>>, vector<1x1x8x896xbf16>
    tpu.vector_store %arg5[%c0_9, %c0_10, %c0_11, %c0_12], %19 {strides = array<i32>} : memref<1x1x8x896xbf16, #tpu.memory_space<vmem>>, vector<1x1x8x896xbf16>,
    return
  }
  func.func @transform_0(%arg0: i32, %arg1: i32) -> (i32, i32, i32, i32) {
    %c0_i32 = arith.constant 0 : i32
    %c0_i32_0 = arith.constant 0 : i32
    %c0_i32_1 = arith.constant 0 : i32
    return %arg0, %arg1, %c0_i32, %c0_i32_0 : i32, i32, i32, i32
  }
  func.func @transform_1(%arg0: i32, %arg1: i32) -> (i32, i32) {
    %c0_i32 = arith.constant 0 : i32
    %c0_i32_0 = arith.constant 0 : i32
    %c0_i32_1 = arith.constant 0 : i32
    return %c0_i32, %c0_i32_0 : i32, i32
  }
  func.func @transform_2(%arg0: i32, %arg1: i32) -> (i32, i32) {
    %c0_i32 = arith.constant 0 : i32
    %c0_i32_0 = arith.constant 0 : i32
    %c0_i32_1 = arith.constant 0 : i32
    return %c0_i32, %c0_i32_0 : i32, i32
  }
  func.func @transform_3(%arg0: i32, %arg1: i32) -> (i32, i32, i32, i32) {
    %c0_i32 = arith.constant 0 : i32
    %c0_i32_0 = arith.constant 0 : i32
    %c0_i32_1 = arith.constant 0 : i32
    return %arg0, %arg1, %c0_i32, %c0_i32_0 : i32, i32, i32, i32
  }
}

module attributes {stable_mosaic.version = 11 : i64} {
  func.func @kernel(%arg0: i32, %arg1: memref<1x4x8x896xbf16, #tpu.memory_space<vmem>>, %arg2: memref<8x72xbf16, #tpu.memory_space<vmem>>, %arg3: memref<8x1xf32, #tpu.memory_space<vmem>>, %arg4: memref<8x72xbf16, #tpu.memory_space<vmem>>, %arg5: memref<8x1xf32, #tpu.memory_space<vmem>>, %arg6: memref<8x8xbf16, #tpu.memory_space<vmem>>, %arg7: memref<8x1xf32, #tpu.memory_space<vmem>>, %arg8: memref<9x1x896xf32, #tpu.memory_space<vmem>>, %arg9: memref<9x1x896xf32, #tpu.memory_space<vmem>>, %arg10: memref<1x8x896xbf16, #tpu.memory_space<vmem>>) attributes {dimension_semantics = [#tpu.dimension_semantics<parallel>], iteration_bounds = array<i64: 2>, scalar_prefetch = 0 : i64, scratch_operands = 0 : i64, tpu.core_type = #tpu.core_type<tc>, window_params = [{transform_indices = @transform_0, window_bounds = array<i64: 1, 4, 8, 896>}, {pipeline_mode = #tpu.pipeline_mode<synchronous>, transform_indices = @transform_1, window_bounds = array<i64: 8, 72>}, {pipeline_mode = #tpu.pipeline_mode<synchronous>, transform_indices = @transform_2, window_bounds = array<i64: 8, 1>}, {pipeline_mode = #tpu.pipeline_mode<synchronous>, transform_indices = @transform_3, window_bounds = array<i64: 8, 72>}, {pipeline_mode = #tpu.pipeline_mode<synchronous>, transform_indices = @transform_4, window_bounds = array<i64: 8, 1>}, {pipeline_mode = #tpu.pipeline_mode<synchronous>, transform_indices = @transform_5, window_bounds = array<i64: 8, 8>}, {pipeline_mode = #tpu.pipeline_mode<synchronous>, transform_indices = @transform_6, window_bounds = array<i64: 8, 1>}, {pipeline_mode = #tpu.pipeline_mode<synchronous>, transform_indices = @transform_7, window_bounds = array<i64: 9, 1, 896>}, {pipeline_mode = #tpu.pipeline_mode<synchronous>, transform_indices = @transform_8, window_bounds = array<i64: 9, 1, 896>}, {transform_indices = @transform_9, window_bounds = array<i64: 1, 8, 896>}]} {
    %c0 = arith.constant 0 : index
    %c0_0 = arith.constant 0 : index
    %c0_1 = arith.constant 0 : index
    %c0_2 = arith.constant 0 : index
    %0 = vector.load %arg1[%c0, %c0_0, %c0_1, %c0_2] : memref<1x4x8x896xbf16, #tpu.memory_space<vmem>>, vector<1x4x8x896xbf16>
    %1 = vector.shape_cast %0 : vector<1x4x8x896xbf16> to vector<4x8x896xbf16>
    %2 = arith.extf %1 : vector<4x8x896xbf16> to vector<4x8x896xf32>
    %3 = vector.extract_strided_slice %2 {offsets = [0, 0, 0], sizes = [1, 8, 896], strides = [1, 1, 1]} : vector<4x8x896xf32> to vector<1x8x896xf32>
    %4 = vector.shape_cast %3 : vector<1x8x896xf32> to vector<8x896xf32>
    %5 = vector.extract_strided_slice %2 {offsets = [1, 0, 0], sizes = [1, 8, 896], strides = [1, 1, 1]} : vector<4x8x896xf32> to vector<1x8x896xf32>
    %6 = vector.shape_cast %5 : vector<1x8x896xf32> to vector<8x896xf32>
    %7 = vector.extract_strided_slice %2 {offsets = [2, 0, 0], sizes = [1, 8, 896], strides = [1, 1, 1]} : vector<4x8x896xf32> to vector<1x8x896xf32>
    %8 = vector.shape_cast %7 : vector<1x8x896xf32> to vector<8x896xf32>
    %9 = vector.extract_strided_slice %2 {offsets = [3, 0, 0], sizes = [1, 8, 896], strides = [1, 1, 1]} : vector<4x8x896xf32> to vector<1x8x896xf32>
    %10 = vector.shape_cast %9 : vector<1x8x896xf32> to vector<8x896xf32>
    %c0_3 = arith.constant 0 : index
    %c0_4 = arith.constant 0 : index
    %11 = vector.load %arg2[%c0_3, %c0_4] : memref<8x72xbf16, #tpu.memory_space<vmem>>, vector<8x72xbf16>
    %c0_5 = arith.constant 0 : index
    %c0_6 = arith.constant 0 : index
    %12 = vector.load %arg3[%c0_5, %c0_6] : memref<8x1xf32, #tpu.memory_space<vmem>>, vector<8x1xf32>
    %c0_7 = arith.constant 0 : index
    %c0_8 = arith.constant 0 : index
    %13 = vector.load %arg4[%c0_7, %c0_8] : memref<8x72xbf16, #tpu.memory_space<vmem>>, vector<8x72xbf16>
    %c0_9 = arith.constant 0 : index
    %c0_10 = arith.constant 0 : index
    %14 = vector.load %arg5[%c0_9, %c0_10] : memref<8x1xf32, #tpu.memory_space<vmem>>, vector<8x1xf32>
    %c0_11 = arith.constant 0 : index
    %c0_12 = arith.constant 0 : index
    %15 = vector.load %arg6[%c0_11, %c0_12] : memref<8x8xbf16, #tpu.memory_space<vmem>>, vector<8x8xbf16>
    %c0_13 = arith.constant 0 : index
    %c0_14 = arith.constant 0 : index
    %16 = vector.load %arg7[%c0_13, %c0_14] : memref<8x1xf32, #tpu.memory_space<vmem>>, vector<8x1xf32>
    %c0_15 = arith.constant 0 : index
    %c0_16 = arith.constant 0 : index
    %c0_17 = arith.constant 0 : index
    %17 = vector.load %arg8[%c0_15, %c0_16, %c0_17] : memref<9x1x896xf32, #tpu.memory_space<vmem>>, vector<9x1x896xf32>
    %c0_18 = arith.constant 0 : index
    %c0_19 = arith.constant 0 : index
    %c0_20 = arith.constant 0 : index
    %18 = vector.load %arg9[%c0_18, %c0_19, %c0_20] : memref<9x1x896xf32, #tpu.memory_space<vmem>>, vector<9x1x896xf32>
    %c29_i32 = arith.constant 29 : i32
    %19 = tpu.dynamic_rotate %10 by %c29_i32 dim 1 : vector<8x896xf32>, i32 -> vector<8x896xf32>
    %20 = vector.extract_strided_slice %17 {offsets = [0, 0, 0], sizes = [1, 1, 896], strides = [1, 1, 1]} : vector<9x1x896xf32> to vector<1x1x896xf32>
    %21 = vector.shape_cast %20 : vector<1x1x896xf32> to vector<1x896xf32>
    %22 = vector.broadcast %21 : vector<1x896xf32> to vector<8x896xf32>
    %23 = arith.mulf %19, %22 : vector<8x896xf32>
    %c28_i32 = arith.constant 28 : i32
    %24 = tpu.dynamic_rotate %8 by %c28_i32 dim 1 : vector<8x896xf32>, i32 -> vector<8x896xf32>
    %25 = vector.extract_strided_slice %17 {offsets = [1, 0, 0], sizes = [1, 1, 896], strides = [1, 1, 1]} : vector<9x1x896xf32> to vector<1x1x896xf32>
    %26 = vector.shape_cast %25 : vector<1x1x896xf32> to vector<1x896xf32>
    %27 = vector.broadcast %26 : vector<1x896xf32> to vector<8x896xf32>
    %28 = arith.mulf %24, %27 : vector<8x896xf32>
    %c28_i32_21 = arith.constant 28 : i32
    %29 = tpu.dynamic_rotate %10 by %c28_i32_21 dim 1 : vector<8x896xf32>, i32 -> vector<8x896xf32>
    %30 = vector.extract_strided_slice %17 {offsets = [2, 0, 0], sizes = [1, 1, 896], strides = [1, 1, 1]} : vector<9x1x896xf32> to vector<1x1x896xf32>
    %31 = vector.shape_cast %30 : vector<1x1x896xf32> to vector<1x896xf32>
    %32 = vector.broadcast %31 : vector<1x896xf32> to vector<8x896xf32>
    %33 = arith.mulf %29, %32 : vector<8x896xf32>
    %c1_i32 = arith.constant 1 : i32
    %34 = tpu.dynamic_rotate %6 by %c1_i32 dim 1 : vector<8x896xf32>, i32 -> vector<8x896xf32>
    %35 = vector.extract_strided_slice %17 {offsets = [3, 0, 0], sizes = [1, 1, 896], strides = [1, 1, 1]} : vector<9x1x896xf32> to vector<1x1x896xf32>
    %36 = vector.shape_cast %35 : vector<1x1x896xf32> to vector<1x896xf32>
    %37 = vector.broadcast %36 : vector<1x896xf32> to vector<8x896xf32>
    %38 = arith.mulf %34, %37 : vector<8x896xf32>
    %c1_i32_22 = arith.constant 1 : i32
    %39 = tpu.dynamic_rotate %10 by %c1_i32_22 dim 1 : vector<8x896xf32>, i32 -> vector<8x896xf32>
    %40 = vector.extract_strided_slice %17 {offsets = [6, 0, 0], sizes = [1, 1, 896], strides = [1, 1, 1]} : vector<9x1x896xf32> to vector<1x1x896xf32>
    %41 = vector.shape_cast %40 : vector<1x1x896xf32> to vector<1x896xf32>
    %42 = vector.broadcast %41 : vector<1x896xf32> to vector<8x896xf32>
    %43 = arith.mulf %39, %42 : vector<8x896xf32>
    %44 = tpu.concatenate %23, %28, %33, %38, %4, %6, %43, %8, %10 in 0 : vector<8x896xf32>, vector<8x896xf32>, vector<8x896xf32>, vector<8x896xf32>, vector<8x896xf32>, vector<8x896xf32>, vector<8x896xf32>, vector<8x896xf32>, vector<8x896xf32> -> vector<72x896xf32>
    %45 = arith.truncf %44 : vector<72x896xf32> to vector<72x896xbf16>
    %cst = arith.constant dense<0.000000e+00> : vector<8x896xf32>
    %46 = tpu.matmul %11, %45, %cst {dimension_numbers = #tpu.dot_dimension_numbers<[1], [0], [0], [1], [0, 0, 1, 1], [], []>} : vector<8x72xbf16>, vector<72x896xbf16>, vector<8x896xf32> -> vector<8x896xf32>
    %47 = vector.broadcast %12 : vector<8x1xf32> to vector<8x896xf32>
    %48 = arith.addf %46, %47 : vector<8x896xf32>
    %cst_23 = arith.constant 0.000000e+00 : f32
    %cst_24 = arith.constant 6.000000e+00 : f32
    %49 = vector.broadcast %cst_23 : f32 to vector<8x896xf32>
    %50 = arith.maximumf %49, %48 : vector<8x896xf32>
    %51 = vector.broadcast %cst_24 : f32 to vector<8x896xf32>
    %52 = arith.minimumf %51, %50 : vector<8x896xf32>
    %c29_i32_25 = arith.constant 29 : i32
    %53 = tpu.dynamic_rotate %52 by %c29_i32_25 dim 1 : vector<8x896xf32>, i32 -> vector<8x896xf32>
    %54 = vector.extract_strided_slice %18 {offsets = [0, 0, 0], sizes = [1, 1, 896], strides = [1, 1, 1]} : vector<9x1x896xf32> to vector<1x1x896xf32>
    %55 = vector.shape_cast %54 : vector<1x1x896xf32> to vector<1x896xf32>
    %56 = vector.broadcast %55 : vector<1x896xf32> to vector<8x896xf32>
    %57 = arith.mulf %53, %56 : vector<8x896xf32>
    %c28_i32_26 = arith.constant 28 : i32
    %58 = tpu.dynamic_rotate %52 by %c28_i32_26 dim 1 : vector<8x896xf32>, i32 -> vector<8x896xf32>
    %59 = vector.extract_strided_slice %18 {offsets = [1, 0, 0], sizes = [1, 1, 896], strides = [1, 1, 1]} : vector<9x1x896xf32> to vector<1x1x896xf32>
    %60 = vector.shape_cast %59 : vector<1x1x896xf32> to vector<1x896xf32>
    %61 = vector.broadcast %60 : vector<1x896xf32> to vector<8x896xf32>
    %62 = arith.mulf %58, %61 : vector<8x896xf32>
    %c27_i32 = arith.constant 27 : i32
    %63 = tpu.dynamic_rotate %52 by %c27_i32 dim 1 : vector<8x896xf32>, i32 -> vector<8x896xf32>
    %64 = vector.extract_strided_slice %18 {offsets = [2, 0, 0], sizes = [1, 1, 896], strides = [1, 1, 1]} : vector<9x1x896xf32> to vector<1x1x896xf32>
    %65 = vector.shape_cast %64 : vector<1x1x896xf32> to vector<1x896xf32>
    %66 = vector.broadcast %65 : vector<1x896xf32> to vector<8x896xf32>
    %67 = arith.mulf %63, %66 : vector<8x896xf32>
    %c1_i32_27 = arith.constant 1 : i32
    %68 = tpu.dynamic_rotate %52 by %c1_i32_27 dim 1 : vector<8x896xf32>, i32 -> vector<8x896xf32>
    %69 = vector.extract_strided_slice %18 {offsets = [3, 0, 0], sizes = [1, 1, 896], strides = [1, 1, 1]} : vector<9x1x896xf32> to vector<1x1x896xf32>
    %70 = vector.shape_cast %69 : vector<1x1x896xf32> to vector<1x896xf32>
    %71 = vector.broadcast %70 : vector<1x896xf32> to vector<8x896xf32>
    %72 = arith.mulf %68, %71 : vector<8x896xf32>
    %c895_i32 = arith.constant 895 : i32
    %73 = tpu.dynamic_rotate %52 by %c895_i32 dim 1 : vector<8x896xf32>, i32 -> vector<8x896xf32>
    %74 = vector.extract_strided_slice %18 {offsets = [5, 0, 0], sizes = [1, 1, 896], strides = [1, 1, 1]} : vector<9x1x896xf32> to vector<1x1x896xf32>
    %75 = vector.shape_cast %74 : vector<1x1x896xf32> to vector<1x896xf32>
    %76 = vector.broadcast %75 : vector<1x896xf32> to vector<8x896xf32>
    %77 = arith.mulf %73, %76 : vector<8x896xf32>
    %c869_i32 = arith.constant 869 : i32
    %78 = tpu.dynamic_rotate %52 by %c869_i32 dim 1 : vector<8x896xf32>, i32 -> vector<8x896xf32>
    %79 = vector.extract_strided_slice %18 {offsets = [6, 0, 0], sizes = [1, 1, 896], strides = [1, 1, 1]} : vector<9x1x896xf32> to vector<1x1x896xf32>
    %80 = vector.shape_cast %79 : vector<1x1x896xf32> to vector<1x896xf32>
    %81 = vector.broadcast %80 : vector<1x896xf32> to vector<8x896xf32>
    %82 = arith.mulf %78, %81 : vector<8x896xf32>
    %c868_i32 = arith.constant 868 : i32
    %83 = tpu.dynamic_rotate %52 by %c868_i32 dim 1 : vector<8x896xf32>, i32 -> vector<8x896xf32>
    %84 = vector.extract_strided_slice %18 {offsets = [7, 0, 0], sizes = [1, 1, 896], strides = [1, 1, 1]} : vector<9x1x896xf32> to vector<1x1x896xf32>
    %85 = vector.shape_cast %84 : vector<1x1x896xf32> to vector<1x896xf32>
    %86 = vector.broadcast %85 : vector<1x896xf32> to vector<8x896xf32>
    %87 = arith.mulf %83, %86 : vector<8x896xf32>
    %c867_i32 = arith.constant 867 : i32
    %88 = tpu.dynamic_rotate %52 by %c867_i32 dim 1 : vector<8x896xf32>, i32 -> vector<8x896xf32>
    %89 = vector.extract_strided_slice %18 {offsets = [8, 0, 0], sizes = [1, 1, 896], strides = [1, 1, 1]} : vector<9x1x896xf32> to vector<1x1x896xf32>
    %90 = vector.shape_cast %89 : vector<1x1x896xf32> to vector<1x896xf32>
    %91 = vector.broadcast %90 : vector<1x896xf32> to vector<8x896xf32>
    %92 = arith.mulf %88, %91 : vector<8x896xf32>
    %93 = tpu.concatenate %57, %62, %67, %72, %52, %77, %82, %87, %92 in 0 : vector<8x896xf32>, vector<8x896xf32>, vector<8x896xf32>, vector<8x896xf32>, vector<8x896xf32>, vector<8x896xf32>, vector<8x896xf32>, vector<8x896xf32>, vector<8x896xf32> -> vector<72x896xf32>
    %94 = arith.truncf %93 : vector<72x896xf32> to vector<72x896xbf16>
    %cst_28 = arith.constant dense<0.000000e+00> : vector<8x896xf32>
    %95 = tpu.matmul %13, %94, %cst_28 {dimension_numbers = #tpu.dot_dimension_numbers<[1], [0], [0], [1], [0, 0, 1, 1], [], []>} : vector<8x72xbf16>, vector<72x896xbf16>, vector<8x896xf32> -> vector<8x896xf32>
    %96 = vector.broadcast %14 : vector<8x1xf32> to vector<8x896xf32>
    %97 = arith.addf %95, %96 : vector<8x896xf32>
    %cst_29 = arith.constant 0.000000e+00 : f32
    %cst_30 = arith.constant 6.000000e+00 : f32
    %98 = vector.broadcast %cst_29 : f32 to vector<8x896xf32>
    %99 = arith.maximumf %98, %97 : vector<8x896xf32>
    %100 = vector.broadcast %cst_30 : f32 to vector<8x896xf32>
    %101 = arith.minimumf %100, %99 : vector<8x896xf32>
    %102 = arith.truncf %4 : vector<8x896xf32> to vector<8x896xbf16>
    %cst_31 = arith.constant dense<0.000000e+00> : vector<8x896xf32>
    %103 = tpu.matmul %15, %102, %cst_31 {dimension_numbers = #tpu.dot_dimension_numbers<[1], [0], [0], [1], [0, 0, 1, 1], [], []>} : vector<8x8xbf16>, vector<8x896xbf16>, vector<8x896xf32> -> vector<8x896xf32>
    %104 = vector.broadcast %16 : vector<8x1xf32> to vector<8x896xf32>
    %105 = arith.addf %103, %104 : vector<8x896xf32>
    %cst_32 = arith.constant 0.000000e+00 : f32
    %cst_33 = arith.constant 6.000000e+00 : f32
    %106 = vector.broadcast %cst_32 : f32 to vector<8x896xf32>
    %107 = arith.maximumf %106, %105 : vector<8x896xf32>
    %108 = vector.broadcast %cst_33 : f32 to vector<8x896xf32>
    %109 = arith.minimumf %108, %107 : vector<8x896xf32>
    %110 = arith.addf %101, %109 : vector<8x896xf32>
    %111 = arith.truncf %110 : vector<8x896xf32> to vector<8x896xbf16>
    %112 = vector.shape_cast %111 : vector<8x896xbf16> to vector<1x8x896xbf16>
    %c0_34 = arith.constant 0 : index
    %c0_35 = arith.constant 0 : index
    %c0_36 = arith.constant 0 : index
    %113 = vector.load %arg10[%c0_34, %c0_35, %c0_36] : memref<1x8x896xbf16, #tpu.memory_space<vmem>>, vector<1x8x896xbf16>
    tpu.vector_store %arg10[%c0_34, %c0_35, %c0_36], %112 {strides = array<i32>} : memref<1x8x896xbf16, #tpu.memory_space<vmem>>, vector<1x8x896xbf16>,
    return
  }
  func.func @transform_0(%arg0: i32) -> (i32, i32, i32, i32) {
    %c0_i32 = arith.constant 0 : i32
    %c0_i32_0 = arith.constant 0 : i32
    %c0_i32_1 = arith.constant 0 : i32
    %c0_i32_2 = arith.constant 0 : i32
    return %arg0, %c0_i32, %c0_i32_0, %c0_i32_1 : i32, i32, i32, i32
  }
  func.func @transform_1(%arg0: i32) -> (i32, i32) {
    %c0_i32 = arith.constant 0 : i32
    %c0_i32_0 = arith.constant 0 : i32
    %c0_i32_1 = arith.constant 0 : i32
    return %c0_i32, %c0_i32_0 : i32, i32
  }
  func.func @transform_2(%arg0: i32) -> (i32, i32) {
    %c0_i32 = arith.constant 0 : i32
    %c0_i32_0 = arith.constant 0 : i32
    %c0_i32_1 = arith.constant 0 : i32
    return %c0_i32, %c0_i32_0 : i32, i32
  }
  func.func @transform_3(%arg0: i32) -> (i32, i32) {
    %c0_i32 = arith.constant 0 : i32
    %c0_i32_0 = arith.constant 0 : i32
    %c0_i32_1 = arith.constant 0 : i32
    return %c0_i32, %c0_i32_0 : i32, i32
  }
  func.func @transform_4(%arg0: i32) -> (i32, i32) {
    %c0_i32 = arith.constant 0 : i32
    %c0_i32_0 = arith.constant 0 : i32
    %c0_i32_1 = arith.constant 0 : i32
    return %c0_i32, %c0_i32_0 : i32, i32
  }
  func.func @transform_5(%arg0: i32) -> (i32, i32) {
    %c0_i32 = arith.constant 0 : i32
    %c0_i32_0 = arith.constant 0 : i32
    %c0_i32_1 = arith.constant 0 : i32
    return %c0_i32, %c0_i32_0 : i32, i32
  }
  func.func @transform_6(%arg0: i32) -> (i32, i32) {
    %c0_i32 = arith.constant 0 : i32
    %c0_i32_0 = arith.constant 0 : i32
    %c0_i32_1 = arith.constant 0 : i32
    return %c0_i32, %c0_i32_0 : i32, i32
  }
  func.func @transform_7(%arg0: i32) -> (i32, i32, i32) {
    %c0_i32 = arith.constant 0 : i32
    %c0_i32_0 = arith.constant 0 : i32
    %c0_i32_1 = arith.constant 0 : i32
    %c0_i32_2 = arith.constant 0 : i32
    return %c0_i32, %c0_i32_0, %c0_i32_1 : i32, i32, i32
  }
  func.func @transform_8(%arg0: i32) -> (i32, i32, i32) {
    %c0_i32 = arith.constant 0 : i32
    %c0_i32_0 = arith.constant 0 : i32
    %c0_i32_1 = arith.constant 0 : i32
    %c0_i32_2 = arith.constant 0 : i32
    return %c0_i32, %c0_i32_0, %c0_i32_1 : i32, i32, i32
  }
  func.func @transform_9(%arg0: i32) -> (i32, i32, i32) {
    %c0_i32 = arith.constant 0 : i32
    %c0_i32_0 = arith.constant 0 : i32
    %c0_i32_1 = arith.constant 0 : i32
    return %arg0, %c0_i32, %c0_i32_0 : i32, i32, i32
  }
}

module attributes {stable_mosaic.version = 11 : i64} {
  func.func @kernel(%arg0: i32, %arg1: memref<1x4x8x256xbf16, #tpu.memory_space<vmem>>, %arg2: memref<16x72xbf16, #tpu.memory_space<vmem>>, %arg3: memref<16x1xf32, #tpu.memory_space<vmem>>, %arg4: memref<16x144xbf16, #tpu.memory_space<vmem>>, %arg5: memref<16x1xf32, #tpu.memory_space<vmem>>, %arg6: memref<16x8xbf16, #tpu.memory_space<vmem>>, %arg7: memref<16x1xf32, #tpu.memory_space<vmem>>, %arg8: memref<9x1x256xf32, #tpu.memory_space<vmem>>, %arg9: memref<9x1x256xf32, #tpu.memory_space<vmem>>, %arg10: memref<4x256x128xbf16, #tpu.memory_space<vmem>>, %arg11: memref<32x144xbf16, #tpu.memory_space<vmem>>, %arg12: memref<32x1xf32, #tpu.memory_space<vmem>>, %arg13: memref<32x288xbf16, #tpu.memory_space<vmem>>, %arg14: memref<32x1xf32, #tpu.memory_space<vmem>>, %arg15: memref<32x16xbf16, #tpu.memory_space<vmem>>, %arg16: memref<32x1xf32, #tpu.memory_space<vmem>>, %arg17: memref<9x1x128xf32, #tpu.memory_space<vmem>>, %arg18: memref<9x1x128xf32, #tpu.memory_space<vmem>>, %arg19: memref<2x32x128xf32, #tpu.memory_space<vmem>>, %arg20: memref<1x1x2xf32, #tpu.memory_space<vmem>>) attributes {dimension_semantics = [#tpu.dimension_semantics<parallel>], iteration_bounds = array<i64: 2>, scalar_prefetch = 0 : i64, scratch_operands = 0 : i64, tpu.core_type = #tpu.core_type<tc>, window_params = [{transform_indices = @transform_0, window_bounds = array<i64: 1, 4, 8, 256>}, {pipeline_mode = #tpu.pipeline_mode<synchronous>, transform_indices = @transform_1, window_bounds = array<i64: 16, 72>}, {pipeline_mode = #tpu.pipeline_mode<synchronous>, transform_indices = @transform_2, window_bounds = array<i64: 16, 1>}, {pipeline_mode = #tpu.pipeline_mode<synchronous>, transform_indices = @transform_3, window_bounds = array<i64: 16, 144>}, {pipeline_mode = #tpu.pipeline_mode<synchronous>, transform_indices = @transform_4, window_bounds = array<i64: 16, 1>}, {pipeline_mode = #tpu.pipeline_mode<synchronous>, transform_indices = @transform_5, window_bounds = array<i64: 16, 8>}, {pipeline_mode = #tpu.pipeline_mode<synchronous>, transform_indices = @transform_6, window_bounds = array<i64: 16, 1>}, {pipeline_mode = #tpu.pipeline_mode<synchronous>, transform_indices = @transform_7, window_bounds = array<i64: 9, 1, 256>}, {pipeline_mode = #tpu.pipeline_mode<synchronous>, transform_indices = @transform_8, window_bounds = array<i64: 9, 1, 256>}, {pipeline_mode = #tpu.pipeline_mode<synchronous>, transform_indices = @transform_9, window_bounds = array<i64: 4, 256, 128>}, {pipeline_mode = #tpu.pipeline_mode<synchronous>, transform_indices = @transform_10, window_bounds = array<i64: 32, 144>}, {pipeline_mode = #tpu.pipeline_mode<synchronous>, transform_indices = @transform_11, window_bounds = array<i64: 32, 1>}, {pipeline_mode = #tpu.pipeline_mode<synchronous>, transform_indices = @transform_12, window_bounds = array<i64: 32, 288>}, {pipeline_mode = #tpu.pipeline_mode<synchronous>, transform_indices = @transform_13, window_bounds = array<i64: 32, 1>}, {pipeline_mode = #tpu.pipeline_mode<synchronous>, transform_indices = @transform_14, window_bounds = array<i64: 32, 16>}, {pipeline_mode = #tpu.pipeline_mode<synchronous>, transform_indices = @transform_15, window_bounds = array<i64: 32, 1>}, {pipeline_mode = #tpu.pipeline_mode<synchronous>, transform_indices = @transform_16, window_bounds = array<i64: 9, 1, 128>}, {pipeline_mode = #tpu.pipeline_mode<synchronous>, transform_indices = @transform_17, window_bounds = array<i64: 9, 1, 128>}, {pipeline_mode = #tpu.pipeline_mode<synchronous>, transform_indices = @transform_18, window_bounds = array<i64: 2, 32, 128>}, {transform_indices = @transform_19, window_bounds = array<i64: 1, 1, 2>}]} {
    %c0 = arith.constant 0 : index
    %c0_0 = arith.constant 0 : index
    %c0_1 = arith.constant 0 : index
    %c0_2 = arith.constant 0 : index
    %0 = vector.load %arg1[%c0, %c0_0, %c0_1, %c0_2] : memref<1x4x8x256xbf16, #tpu.memory_space<vmem>>, vector<1x4x8x256xbf16>
    %1 = vector.shape_cast %0 : vector<1x4x8x256xbf16> to vector<4x8x256xbf16>
    %2 = arith.extf %1 : vector<4x8x256xbf16> to vector<4x8x256xf32>
    %3 = vector.extract_strided_slice %2 {offsets = [0, 0, 0], sizes = [1, 8, 256], strides = [1, 1, 1]} : vector<4x8x256xf32> to vector<1x8x256xf32>
    %4 = vector.shape_cast %3 : vector<1x8x256xf32> to vector<8x256xf32>
    %5 = vector.extract_strided_slice %2 {offsets = [1, 0, 0], sizes = [1, 8, 256], strides = [1, 1, 1]} : vector<4x8x256xf32> to vector<1x8x256xf32>
    %6 = vector.shape_cast %5 : vector<1x8x256xf32> to vector<8x256xf32>
    %7 = vector.extract_strided_slice %2 {offsets = [2, 0, 0], sizes = [1, 8, 256], strides = [1, 1, 1]} : vector<4x8x256xf32> to vector<1x8x256xf32>
    %8 = vector.shape_cast %7 : vector<1x8x256xf32> to vector<8x256xf32>
    %9 = vector.extract_strided_slice %2 {offsets = [3, 0, 0], sizes = [1, 8, 256], strides = [1, 1, 1]} : vector<4x8x256xf32> to vector<1x8x256xf32>
    %10 = vector.shape_cast %9 : vector<1x8x256xf32> to vector<8x256xf32>
    %c0_3 = arith.constant 0 : index
    %c0_4 = arith.constant 0 : index
    %11 = vector.load %arg2[%c0_3, %c0_4] : memref<16x72xbf16, #tpu.memory_space<vmem>>, vector<16x72xbf16>
    %c0_5 = arith.constant 0 : index
    %c0_6 = arith.constant 0 : index
    %12 = vector.load %arg3[%c0_5, %c0_6] : memref<16x1xf32, #tpu.memory_space<vmem>>, vector<16x1xf32>
    %c0_7 = arith.constant 0 : index
    %c0_8 = arith.constant 0 : index
    %13 = vector.load %arg4[%c0_7, %c0_8] : memref<16x144xbf16, #tpu.memory_space<vmem>>, vector<16x144xbf16>
    %c0_9 = arith.constant 0 : index
    %c0_10 = arith.constant 0 : index
    %14 = vector.load %arg5[%c0_9, %c0_10] : memref<16x1xf32, #tpu.memory_space<vmem>>, vector<16x1xf32>
    %c0_11 = arith.constant 0 : index
    %c0_12 = arith.constant 0 : index
    %15 = vector.load %arg6[%c0_11, %c0_12] : memref<16x8xbf16, #tpu.memory_space<vmem>>, vector<16x8xbf16>
    %c0_13 = arith.constant 0 : index
    %c0_14 = arith.constant 0 : index
    %16 = vector.load %arg7[%c0_13, %c0_14] : memref<16x1xf32, #tpu.memory_space<vmem>>, vector<16x1xf32>
    %c0_15 = arith.constant 0 : index
    %c0_16 = arith.constant 0 : index
    %c0_17 = arith.constant 0 : index
    %17 = vector.load %arg8[%c0_15, %c0_16, %c0_17] : memref<9x1x256xf32, #tpu.memory_space<vmem>>, vector<9x1x256xf32>
    %c0_18 = arith.constant 0 : index
    %c0_19 = arith.constant 0 : index
    %c0_20 = arith.constant 0 : index
    %18 = vector.load %arg9[%c0_18, %c0_19, %c0_20] : memref<9x1x256xf32, #tpu.memory_space<vmem>>, vector<9x1x256xf32>
    %c15_i32 = arith.constant 15 : i32
    %19 = tpu.dynamic_rotate %10 by %c15_i32 dim 1 : vector<8x256xf32>, i32 -> vector<8x256xf32>
    %20 = vector.extract_strided_slice %17 {offsets = [0, 0, 0], sizes = [1, 1, 256], strides = [1, 1, 1]} : vector<9x1x256xf32> to vector<1x1x256xf32>
    %21 = vector.shape_cast %20 : vector<1x1x256xf32> to vector<1x256xf32>
    %22 = vector.broadcast %21 : vector<1x256xf32> to vector<8x256xf32>
    %23 = arith.mulf %19, %22 : vector<8x256xf32>
    %c14_i32 = arith.constant 14 : i32
    %24 = tpu.dynamic_rotate %8 by %c14_i32 dim 1 : vector<8x256xf32>, i32 -> vector<8x256xf32>
    %25 = vector.extract_strided_slice %17 {offsets = [1, 0, 0], sizes = [1, 1, 256], strides = [1, 1, 1]} : vector<9x1x256xf32> to vector<1x1x256xf32>
    %26 = vector.shape_cast %25 : vector<1x1x256xf32> to vector<1x256xf32>
    %27 = vector.broadcast %26 : vector<1x256xf32> to vector<8x256xf32>
    %28 = arith.mulf %24, %27 : vector<8x256xf32>
    %c14_i32_21 = arith.constant 14 : i32
    %29 = tpu.dynamic_rotate %10 by %c14_i32_21 dim 1 : vector<8x256xf32>, i32 -> vector<8x256xf32>
    %30 = vector.extract_strided_slice %17 {offsets = [2, 0, 0], sizes = [1, 1, 256], strides = [1, 1, 1]} : vector<9x1x256xf32> to vector<1x1x256xf32>
    %31 = vector.shape_cast %30 : vector<1x1x256xf32> to vector<1x256xf32>
    %32 = vector.broadcast %31 : vector<1x256xf32> to vector<8x256xf32>
    %33 = arith.mulf %29, %32 : vector<8x256xf32>
    %c1_i32 = arith.constant 1 : i32
    %34 = tpu.dynamic_rotate %6 by %c1_i32 dim 1 : vector<8x256xf32>, i32 -> vector<8x256xf32>
    %35 = vector.extract_strided_slice %17 {offsets = [3, 0, 0], sizes = [1, 1, 256], strides = [1, 1, 1]} : vector<9x1x256xf32> to vector<1x1x256xf32>
    %36 = vector.shape_cast %35 : vector<1x1x256xf32> to vector<1x256xf32>
    %37 = vector.broadcast %36 : vector<1x256xf32> to vector<8x256xf32>
    %38 = arith.mulf %34, %37 : vector<8x256xf32>
    %c1_i32_22 = arith.constant 1 : i32
    %39 = tpu.dynamic_rotate %10 by %c1_i32_22 dim 1 : vector<8x256xf32>, i32 -> vector<8x256xf32>
    %40 = vector.extract_strided_slice %17 {offsets = [6, 0, 0], sizes = [1, 1, 256], strides = [1, 1, 1]} : vector<9x1x256xf32> to vector<1x1x256xf32>
    %41 = vector.shape_cast %40 : vector<1x1x256xf32> to vector<1x256xf32>
    %42 = vector.broadcast %41 : vector<1x256xf32> to vector<8x256xf32>
    %43 = arith.mulf %39, %42 : vector<8x256xf32>
    %44 = tpu.concatenate %23, %28, %33, %38, %4, %6, %43, %8, %10 in 0 : vector<8x256xf32>, vector<8x256xf32>, vector<8x256xf32>, vector<8x256xf32>, vector<8x256xf32>, vector<8x256xf32>, vector<8x256xf32>, vector<8x256xf32>, vector<8x256xf32> -> vector<72x256xf32>
    %45 = arith.truncf %44 : vector<72x256xf32> to vector<72x256xbf16>
    %cst = arith.constant dense<0.000000e+00> : vector<16x256xf32>
    %46 = tpu.matmul %11, %45, %cst {dimension_numbers = #tpu.dot_dimension_numbers<[1], [0], [0], [1], [0, 0, 1, 1], [], []>} : vector<16x72xbf16>, vector<72x256xbf16>, vector<16x256xf32> -> vector<16x256xf32>
    %47 = vector.broadcast %12 : vector<16x1xf32> to vector<16x256xf32>
    %48 = arith.addf %46, %47 : vector<16x256xf32>
    %cst_23 = arith.constant 0.000000e+00 : f32
    %cst_24 = arith.constant 6.000000e+00 : f32
    %49 = vector.broadcast %cst_23 : f32 to vector<16x256xf32>
    %50 = arith.maximumf %49, %48 : vector<16x256xf32>
    %51 = vector.broadcast %cst_24 : f32 to vector<16x256xf32>
    %52 = arith.minimumf %51, %50 : vector<16x256xf32>
    %c15_i32_25 = arith.constant 15 : i32
    %53 = tpu.dynamic_rotate %52 by %c15_i32_25 dim 1 : vector<16x256xf32>, i32 -> vector<16x256xf32>
    %54 = vector.extract_strided_slice %18 {offsets = [0, 0, 0], sizes = [1, 1, 256], strides = [1, 1, 1]} : vector<9x1x256xf32> to vector<1x1x256xf32>
    %55 = vector.shape_cast %54 : vector<1x1x256xf32> to vector<1x256xf32>
    %56 = vector.broadcast %55 : vector<1x256xf32> to vector<16x256xf32>
    %57 = arith.mulf %53, %56 : vector<16x256xf32>
    %c14_i32_26 = arith.constant 14 : i32
    %58 = tpu.dynamic_rotate %52 by %c14_i32_26 dim 1 : vector<16x256xf32>, i32 -> vector<16x256xf32>
    %59 = vector.extract_strided_slice %18 {offsets = [1, 0, 0], sizes = [1, 1, 256], strides = [1, 1, 1]} : vector<9x1x256xf32> to vector<1x1x256xf32>
    %60 = vector.shape_cast %59 : vector<1x1x256xf32> to vector<1x256xf32>
    %61 = vector.broadcast %60 : vector<1x256xf32> to vector<16x256xf32>
    %62 = arith.mulf %58, %61 : vector<16x256xf32>
    %c13_i32 = arith.constant 13 : i32
    %63 = tpu.dynamic_rotate %52 by %c13_i32 dim 1 : vector<16x256xf32>, i32 -> vector<16x256xf32>
    %64 = vector.extract_strided_slice %18 {offsets = [2, 0, 0], sizes = [1, 1, 256], strides = [1, 1, 1]} : vector<9x1x256xf32> to vector<1x1x256xf32>
    %65 = vector.shape_cast %64 : vector<1x1x256xf32> to vector<1x256xf32>
    %66 = vector.broadcast %65 : vector<1x256xf32> to vector<16x256xf32>
    %67 = arith.mulf %63, %66 : vector<16x256xf32>
    %c1_i32_27 = arith.constant 1 : i32
    %68 = tpu.dynamic_rotate %52 by %c1_i32_27 dim 1 : vector<16x256xf32>, i32 -> vector<16x256xf32>
    %69 = vector.extract_strided_slice %18 {offsets = [3, 0, 0], sizes = [1, 1, 256], strides = [1, 1, 1]} : vector<9x1x256xf32> to vector<1x1x256xf32>
    %70 = vector.shape_cast %69 : vector<1x1x256xf32> to vector<1x256xf32>
    %71 = vector.broadcast %70 : vector<1x256xf32> to vector<16x256xf32>
    %72 = arith.mulf %68, %71 : vector<16x256xf32>
    %c255_i32 = arith.constant 255 : i32
    %73 = tpu.dynamic_rotate %52 by %c255_i32 dim 1 : vector<16x256xf32>, i32 -> vector<16x256xf32>
    %74 = vector.extract_strided_slice %18 {offsets = [5, 0, 0], sizes = [1, 1, 256], strides = [1, 1, 1]} : vector<9x1x256xf32> to vector<1x1x256xf32>
    %75 = vector.shape_cast %74 : vector<1x1x256xf32> to vector<1x256xf32>
    %76 = vector.broadcast %75 : vector<1x256xf32> to vector<16x256xf32>
    %77 = arith.mulf %73, %76 : vector<16x256xf32>
    %c243_i32 = arith.constant 243 : i32
    %78 = tpu.dynamic_rotate %52 by %c243_i32 dim 1 : vector<16x256xf32>, i32 -> vector<16x256xf32>
    %79 = vector.extract_strided_slice %18 {offsets = [6, 0, 0], sizes = [1, 1, 256], strides = [1, 1, 1]} : vector<9x1x256xf32> to vector<1x1x256xf32>
    %80 = vector.shape_cast %79 : vector<1x1x256xf32> to vector<1x256xf32>
    %81 = vector.broadcast %80 : vector<1x256xf32> to vector<16x256xf32>
    %82 = arith.mulf %78, %81 : vector<16x256xf32>
    %c242_i32 = arith.constant 242 : i32
    %83 = tpu.dynamic_rotate %52 by %c242_i32 dim 1 : vector<16x256xf32>, i32 -> vector<16x256xf32>
    %84 = vector.extract_strided_slice %18 {offsets = [7, 0, 0], sizes = [1, 1, 256], strides = [1, 1, 1]} : vector<9x1x256xf32> to vector<1x1x256xf32>
    %85 = vector.shape_cast %84 : vector<1x1x256xf32> to vector<1x256xf32>
    %86 = vector.broadcast %85 : vector<1x256xf32> to vector<16x256xf32>
    %87 = arith.mulf %83, %86 : vector<16x256xf32>
    %c241_i32 = arith.constant 241 : i32
    %88 = tpu.dynamic_rotate %52 by %c241_i32 dim 1 : vector<16x256xf32>, i32 -> vector<16x256xf32>
    %89 = vector.extract_strided_slice %18 {offsets = [8, 0, 0], sizes = [1, 1, 256], strides = [1, 1, 1]} : vector<9x1x256xf32> to vector<1x1x256xf32>
    %90 = vector.shape_cast %89 : vector<1x1x256xf32> to vector<1x256xf32>
    %91 = vector.broadcast %90 : vector<1x256xf32> to vector<16x256xf32>
    %92 = arith.mulf %88, %91 : vector<16x256xf32>
    %93 = tpu.concatenate %57, %62, %67, %72, %52, %77, %82, %87, %92 in 0 : vector<16x256xf32>, vector<16x256xf32>, vector<16x256xf32>, vector<16x256xf32>, vector<16x256xf32>, vector<16x256xf32>, vector<16x256xf32>, vector<16x256xf32>, vector<16x256xf32> -> vector<144x256xf32>
    %94 = arith.truncf %93 : vector<144x256xf32> to vector<144x256xbf16>
    %cst_28 = arith.constant dense<0.000000e+00> : vector<16x256xf32>
    %95 = tpu.matmul %13, %94, %cst_28 {dimension_numbers = #tpu.dot_dimension_numbers<[1], [0], [0], [1], [0, 0, 1, 1], [], []>} : vector<16x144xbf16>, vector<144x256xbf16>, vector<16x256xf32> -> vector<16x256xf32>
    %96 = vector.broadcast %14 : vector<16x1xf32> to vector<16x256xf32>
    %97 = arith.addf %95, %96 : vector<16x256xf32>
    %cst_29 = arith.constant 0.000000e+00 : f32
    %cst_30 = arith.constant 6.000000e+00 : f32
    %98 = vector.broadcast %cst_29 : f32 to vector<16x256xf32>
    %99 = arith.maximumf %98, %97 : vector<16x256xf32>
    %100 = vector.broadcast %cst_30 : f32 to vector<16x256xf32>
    %101 = arith.minimumf %100, %99 : vector<16x256xf32>
    %102 = arith.truncf %4 : vector<8x256xf32> to vector<8x256xbf16>
    %cst_31 = arith.constant dense<0.000000e+00> : vector<16x256xf32>
    %103 = tpu.matmul %15, %102, %cst_31 {dimension_numbers = #tpu.dot_dimension_numbers<[1], [0], [0], [1], [0, 0, 1, 1], [], []>} : vector<16x8xbf16>, vector<8x256xbf16>, vector<16x256xf32> -> vector<16x256xf32>
    %104 = vector.broadcast %16 : vector<16x1xf32> to vector<16x256xf32>
    %105 = arith.addf %103, %104 : vector<16x256xf32>
    %cst_32 = arith.constant 0.000000e+00 : f32
    %cst_33 = arith.constant 6.000000e+00 : f32
    %106 = vector.broadcast %cst_32 : f32 to vector<16x256xf32>
    %107 = arith.maximumf %106, %105 : vector<16x256xf32>
    %108 = vector.broadcast %cst_33 : f32 to vector<16x256xf32>
    %109 = arith.minimumf %108, %107 : vector<16x256xf32>
    %110 = arith.addf %101, %109 : vector<16x256xf32>
    %111 = arith.truncf %110 : vector<16x256xf32> to vector<16x256xbf16>
    %c0_34 = arith.constant 0 : index
    %c0_35 = arith.constant 0 : index
    %c0_36 = arith.constant 0 : index
    %112 = vector.load %arg10[%c0_34, %c0_35, %c0_36] : memref<4x256x128xbf16, #tpu.memory_space<vmem>>, vector<1x256x128xbf16>
    %113 = vector.shape_cast %112 : vector<1x256x128xbf16> to vector<256x128xbf16>
    %cst_37 = arith.constant dense<0.000000e+00> : vector<16x128xf32>
    %114 = tpu.matmul %111, %113, %cst_37 {dimension_numbers = #tpu.dot_dimension_numbers<[1], [0], [0], [1], [0, 0, 1, 1], [], []>} : vector<16x256xbf16>, vector<256x128xbf16>, vector<16x128xf32> -> vector<16x128xf32>
    %c1 = arith.constant 1 : index
    %c0_38 = arith.constant 0 : index
    %c0_39 = arith.constant 0 : index
    %115 = vector.load %arg10[%c1, %c0_38, %c0_39] : memref<4x256x128xbf16, #tpu.memory_space<vmem>>, vector<1x256x128xbf16>
    %116 = vector.shape_cast %115 : vector<1x256x128xbf16> to vector<256x128xbf16>
    %cst_40 = arith.constant dense<0.000000e+00> : vector<16x128xf32>
    %117 = tpu.matmul %111, %116, %cst_40 {dimension_numbers = #tpu.dot_dimension_numbers<[1], [0], [0], [1], [0, 0, 1, 1], [], []>} : vector<16x256xbf16>, vector<256x128xbf16>, vector<16x128xf32> -> vector<16x128xf32>
    %c2 = arith.constant 2 : index
    %c0_41 = arith.constant 0 : index
    %c0_42 = arith.constant 0 : index
    %118 = vector.load %arg10[%c2, %c0_41, %c0_42] : memref<4x256x128xbf16, #tpu.memory_space<vmem>>, vector<1x256x128xbf16>
    %119 = vector.shape_cast %118 : vector<1x256x128xbf16> to vector<256x128xbf16>
    %cst_43 = arith.constant dense<0.000000e+00> : vector<16x128xf32>
    %120 = tpu.matmul %111, %119, %cst_43 {dimension_numbers = #tpu.dot_dimension_numbers<[1], [0], [0], [1], [0, 0, 1, 1], [], []>} : vector<16x256xbf16>, vector<256x128xbf16>, vector<16x128xf32> -> vector<16x128xf32>
    %c3 = arith.constant 3 : index
    %c0_44 = arith.constant 0 : index
    %c0_45 = arith.constant 0 : index
    %121 = vector.load %arg10[%c3, %c0_44, %c0_45] : memref<4x256x128xbf16, #tpu.memory_space<vmem>>, vector<1x256x128xbf16>
    %122 = vector.shape_cast %121 : vector<1x256x128xbf16> to vector<256x128xbf16>
    %cst_46 = arith.constant dense<0.000000e+00> : vector<16x128xf32>
    %123 = tpu.matmul %111, %122, %cst_46 {dimension_numbers = #tpu.dot_dimension_numbers<[1], [0], [0], [1], [0, 0, 1, 1], [], []>} : vector<16x256xbf16>, vector<256x128xbf16>, vector<16x128xf32> -> vector<16x128xf32>
    %c0_47 = arith.constant 0 : index
    %c0_48 = arith.constant 0 : index
    %124 = vector.load %arg11[%c0_47, %c0_48] : memref<32x144xbf16, #tpu.memory_space<vmem>>, vector<32x144xbf16>
    %c0_49 = arith.constant 0 : index
    %c0_50 = arith.constant 0 : index
    %125 = vector.load %arg12[%c0_49, %c0_50] : memref<32x1xf32, #tpu.memory_space<vmem>>, vector<32x1xf32>
    %c0_51 = arith.constant 0 : index
    %c0_52 = arith.constant 0 : index
    %126 = vector.load %arg13[%c0_51, %c0_52] : memref<32x288xbf16, #tpu.memory_space<vmem>>, vector<32x288xbf16>
    %c0_53 = arith.constant 0 : index
    %c0_54 = arith.constant 0 : index
    %127 = vector.load %arg14[%c0_53, %c0_54] : memref<32x1xf32, #tpu.memory_space<vmem>>, vector<32x1xf32>
    %c0_55 = arith.constant 0 : index
    %c0_56 = arith.constant 0 : index
    %128 = vector.load %arg15[%c0_55, %c0_56] : memref<32x16xbf16, #tpu.memory_space<vmem>>, vector<32x16xbf16>
    %c0_57 = arith.constant 0 : index
    %c0_58 = arith.constant 0 : index
    %129 = vector.load %arg16[%c0_57, %c0_58] : memref<32x1xf32, #tpu.memory_space<vmem>>, vector<32x1xf32>
    %c0_59 = arith.constant 0 : index
    %c0_60 = arith.constant 0 : index
    %c0_61 = arith.constant 0 : index
    %130 = vector.load %arg17[%c0_59, %c0_60, %c0_61] : memref<9x1x128xf32, #tpu.memory_space<vmem>>, vector<9x1x128xf32>
    %c0_62 = arith.constant 0 : index
    %c0_63 = arith.constant 0 : index
    %c0_64 = arith.constant 0 : index
    %131 = vector.load %arg18[%c0_62, %c0_63, %c0_64] : memref<9x1x128xf32, #tpu.memory_space<vmem>>, vector<9x1x128xf32>
    %c8_i32 = arith.constant 8 : i32
    %132 = tpu.dynamic_rotate %123 by %c8_i32 dim 1 : vector<16x128xf32>, i32 -> vector<16x128xf32>
    %133 = vector.extract_strided_slice %130 {offsets = [0, 0, 0], sizes = [1, 1, 128], strides = [1, 1, 1]} : vector<9x1x128xf32> to vector<1x1x128xf32>
    %134 = vector.shape_cast %133 : vector<1x1x128xf32> to vector<1x128xf32>
    %135 = vector.broadcast %134 : vector<1x128xf32> to vector<16x128xf32>
    %136 = arith.mulf %132, %135 : vector<16x128xf32>
    %c7_i32 = arith.constant 7 : i32
    %137 = tpu.dynamic_rotate %120 by %c7_i32 dim 1 : vector<16x128xf32>, i32 -> vector<16x128xf32>
    %138 = vector.extract_strided_slice %130 {offsets = [1, 0, 0], sizes = [1, 1, 128], strides = [1, 1, 1]} : vector<9x1x128xf32> to vector<1x1x128xf32>
    %139 = vector.shape_cast %138 : vector<1x1x128xf32> to vector<1x128xf32>
    %140 = vector.broadcast %139 : vector<1x128xf32> to vector<16x128xf32>
    %141 = arith.mulf %137, %140 : vector<16x128xf32>
    %c7_i32_65 = arith.constant 7 : i32
    %142 = tpu.dynamic_rotate %123 by %c7_i32_65 dim 1 : vector<16x128xf32>, i32 -> vector<16x128xf32>
    %143 = vector.extract_strided_slice %130 {offsets = [2, 0, 0], sizes = [1, 1, 128], strides = [1, 1, 1]} : vector<9x1x128xf32> to vector<1x1x128xf32>
    %144 = vector.shape_cast %143 : vector<1x1x128xf32> to vector<1x128xf32>
    %145 = vector.broadcast %144 : vector<1x128xf32> to vector<16x128xf32>
    %146 = arith.mulf %142, %145 : vector<16x128xf32>
    %c1_i32_66 = arith.constant 1 : i32
    %147 = tpu.dynamic_rotate %117 by %c1_i32_66 dim 1 : vector<16x128xf32>, i32 -> vector<16x128xf32>
    %148 = vector.extract_strided_slice %130 {offsets = [3, 0, 0], sizes = [1, 1, 128], strides = [1, 1, 1]} : vector<9x1x128xf32> to vector<1x1x128xf32>
    %149 = vector.shape_cast %148 : vector<1x1x128xf32> to vector<1x128xf32>
    %150 = vector.broadcast %149 : vector<1x128xf32> to vector<16x128xf32>
    %151 = arith.mulf %147, %150 : vector<16x128xf32>
    %c1_i32_67 = arith.constant 1 : i32
    %152 = tpu.dynamic_rotate %123 by %c1_i32_67 dim 1 : vector<16x128xf32>, i32 -> vector<16x128xf32>
    %153 = vector.extract_strided_slice %130 {offsets = [6, 0, 0], sizes = [1, 1, 128], strides = [1, 1, 1]} : vector<9x1x128xf32> to vector<1x1x128xf32>
    %154 = vector.shape_cast %153 : vector<1x1x128xf32> to vector<1x128xf32>
    %155 = vector.broadcast %154 : vector<1x128xf32> to vector<16x128xf32>
    %156 = arith.mulf %152, %155 : vector<16x128xf32>
    %157 = tpu.concatenate %136, %141, %146, %151, %114, %117, %156, %120, %123 in 0 : vector<16x128xf32>, vector<16x128xf32>, vector<16x128xf32>, vector<16x128xf32>, vector<16x128xf32>, vector<16x128xf32>, vector<16x128xf32>, vector<16x128xf32>, vector<16x128xf32> -> vector<144x128xf32>
    %158 = arith.truncf %157 : vector<144x128xf32> to vector<144x128xbf16>
    %cst_68 = arith.constant dense<0.000000e+00> : vector<32x128xf32>
    %159 = tpu.matmul %124, %158, %cst_68 {dimension_numbers = #tpu.dot_dimension_numbers<[1], [0], [0], [1], [0, 0, 1, 1], [], []>} : vector<32x144xbf16>, vector<144x128xbf16>, vector<32x128xf32> -> vector<32x128xf32>
    %160 = vector.broadcast %125 : vector<32x1xf32> to vector<32x128xf32>
    %161 = arith.addf %159, %160 : vector<32x128xf32>
    %cst_69 = arith.constant 0.000000e+00 : f32
    %cst_70 = arith.constant 6.000000e+00 : f32
    %162 = vector.broadcast %cst_69 : f32 to vector<32x128xf32>
    %163 = arith.maximumf %162, %161 : vector<32x128xf32>
    %164 = vector.broadcast %cst_70 : f32 to vector<32x128xf32>
    %165 = arith.minimumf %164, %163 : vector<32x128xf32>
    %c8_i32_71 = arith.constant 8 : i32
    %166 = tpu.dynamic_rotate %165 by %c8_i32_71 dim 1 : vector<32x128xf32>, i32 -> vector<32x128xf32>
    %167 = vector.extract_strided_slice %131 {offsets = [0, 0, 0], sizes = [1, 1, 128], strides = [1, 1, 1]} : vector<9x1x128xf32> to vector<1x1x128xf32>
    %168 = vector.shape_cast %167 : vector<1x1x128xf32> to vector<1x128xf32>
    %169 = vector.broadcast %168 : vector<1x128xf32> to vector<32x128xf32>
    %170 = arith.mulf %166, %169 : vector<32x128xf32>
    %c7_i32_72 = arith.constant 7 : i32
    %171 = tpu.dynamic_rotate %165 by %c7_i32_72 dim 1 : vector<32x128xf32>, i32 -> vector<32x128xf32>
    %172 = vector.extract_strided_slice %131 {offsets = [1, 0, 0], sizes = [1, 1, 128], strides = [1, 1, 1]} : vector<9x1x128xf32> to vector<1x1x128xf32>
    %173 = vector.shape_cast %172 : vector<1x1x128xf32> to vector<1x128xf32>
    %174 = vector.broadcast %173 : vector<1x128xf32> to vector<32x128xf32>
    %175 = arith.mulf %171, %174 : vector<32x128xf32>
    %c6_i32 = arith.constant 6 : i32
    %176 = tpu.dynamic_rotate %165 by %c6_i32 dim 1 : vector<32x128xf32>, i32 -> vector<32x128xf32>
    %177 = vector.extract_strided_slice %131 {offsets = [2, 0, 0], sizes = [1, 1, 128], strides = [1, 1, 1]} : vector<9x1x128xf32> to vector<1x1x128xf32>
    %178 = vector.shape_cast %177 : vector<1x1x128xf32> to vector<1x128xf32>
    %179 = vector.broadcast %178 : vector<1x128xf32> to vector<32x128xf32>
    %180 = arith.mulf %176, %179 : vector<32x128xf32>
    %c1_i32_73 = arith.constant 1 : i32
    %181 = tpu.dynamic_rotate %165 by %c1_i32_73 dim 1 : vector<32x128xf32>, i32 -> vector<32x128xf32>
    %182 = vector.extract_strided_slice %131 {offsets = [3, 0, 0], sizes = [1, 1, 128], strides = [1, 1, 1]} : vector<9x1x128xf32> to vector<1x1x128xf32>
    %183 = vector.shape_cast %182 : vector<1x1x128xf32> to vector<1x128xf32>
    %184 = vector.broadcast %183 : vector<1x128xf32> to vector<32x128xf32>
    %185 = arith.mulf %181, %184 : vector<32x128xf32>
    %c127_i32 = arith.constant 127 : i32
    %186 = tpu.dynamic_rotate %165 by %c127_i32 dim 1 : vector<32x128xf32>, i32 -> vector<32x128xf32>
    %187 = vector.extract_strided_slice %131 {offsets = [5, 0, 0], sizes = [1, 1, 128], strides = [1, 1, 1]} : vector<9x1x128xf32> to vector<1x1x128xf32>
    %188 = vector.shape_cast %187 : vector<1x1x128xf32> to vector<1x128xf32>
    %189 = vector.broadcast %188 : vector<1x128xf32> to vector<32x128xf32>
    %190 = arith.mulf %186, %189 : vector<32x128xf32>
    %c122_i32 = arith.constant 122 : i32
    %191 = tpu.dynamic_rotate %165 by %c122_i32 dim 1 : vector<32x128xf32>, i32 -> vector<32x128xf32>
    %192 = vector.extract_strided_slice %131 {offsets = [6, 0, 0], sizes = [1, 1, 128], strides = [1, 1, 1]} : vector<9x1x128xf32> to vector<1x1x128xf32>
    %193 = vector.shape_cast %192 : vector<1x1x128xf32> to vector<1x128xf32>
    %194 = vector.broadcast %193 : vector<1x128xf32> to vector<32x128xf32>
    %195 = arith.mulf %191, %194 : vector<32x128xf32>
    %c121_i32 = arith.constant 121 : i32
    %196 = tpu.dynamic_rotate %165 by %c121_i32 dim 1 : vector<32x128xf32>, i32 -> vector<32x128xf32>
    %197 = vector.extract_strided_slice %131 {offsets = [7, 0, 0], sizes = [1, 1, 128], strides = [1, 1, 1]} : vector<9x1x128xf32> to vector<1x1x128xf32>
    %198 = vector.shape_cast %197 : vector<1x1x128xf32> to vector<1x128xf32>
    %199 = vector.broadcast %198 : vector<1x128xf32> to vector<32x128xf32>
    %200 = arith.mulf %196, %199 : vector<32x128xf32>
    %c120_i32 = arith.constant 120 : i32
    %201 = tpu.dynamic_rotate %165 by %c120_i32 dim 1 : vector<32x128xf32>, i32 -> vector<32x128xf32>
    %202 = vector.extract_strided_slice %131 {offsets = [8, 0, 0], sizes = [1, 1, 128], strides = [1, 1, 1]} : vector<9x1x128xf32> to vector<1x1x128xf32>
    %203 = vector.shape_cast %202 : vector<1x1x128xf32> to vector<1x128xf32>
    %204 = vector.broadcast %203 : vector<1x128xf32> to vector<32x128xf32>
    %205 = arith.mulf %201, %204 : vector<32x128xf32>
    %206 = tpu.concatenate %170, %175, %180, %185, %165, %190, %195, %200, %205 in 0 : vector<32x128xf32>, vector<32x128xf32>, vector<32x128xf32>, vector<32x128xf32>, vector<32x128xf32>, vector<32x128xf32>, vector<32x128xf32>, vector<32x128xf32>, vector<32x128xf32> -> vector<288x128xf32>
    %207 = arith.truncf %206 : vector<288x128xf32> to vector<288x128xbf16>
    %cst_74 = arith.constant dense<0.000000e+00> : vector<32x128xf32>
    %208 = tpu.matmul %126, %207, %cst_74 {dimension_numbers = #tpu.dot_dimension_numbers<[1], [0], [0], [1], [0, 0, 1, 1], [], []>} : vector<32x288xbf16>, vector<288x128xbf16>, vector<32x128xf32> -> vector<32x128xf32>
    %209 = vector.broadcast %127 : vector<32x1xf32> to vector<32x128xf32>
    %210 = arith.addf %208, %209 : vector<32x128xf32>
    %cst_75 = arith.constant 0.000000e+00 : f32
    %cst_76 = arith.constant 6.000000e+00 : f32
    %211 = vector.broadcast %cst_75 : f32 to vector<32x128xf32>
    %212 = arith.maximumf %211, %210 : vector<32x128xf32>
    %213 = vector.broadcast %cst_76 : f32 to vector<32x128xf32>
    %214 = arith.minimumf %213, %212 : vector<32x128xf32>
    %215 = arith.truncf %114 : vector<16x128xf32> to vector<16x128xbf16>
    %cst_77 = arith.constant dense<0.000000e+00> : vector<32x128xf32>
    %216 = tpu.matmul %128, %215, %cst_77 {dimension_numbers = #tpu.dot_dimension_numbers<[1], [0], [0], [1], [0, 0, 1, 1], [], []>} : vector<32x16xbf16>, vector<16x128xbf16>, vector<32x128xf32> -> vector<32x128xf32>
    %217 = vector.broadcast %129 : vector<32x1xf32> to vector<32x128xf32>
    %218 = arith.addf %216, %217 : vector<32x128xf32>
    %cst_78 = arith.constant 0.000000e+00 : f32
    %cst_79 = arith.constant 6.000000e+00 : f32
    %219 = vector.broadcast %cst_78 : f32 to vector<32x128xf32>
    %220 = arith.maximumf %219, %218 : vector<32x128xf32>
    %221 = vector.broadcast %cst_79 : f32 to vector<32x128xf32>
    %222 = arith.minimumf %221, %220 : vector<32x128xf32>
    %223 = arith.addf %214, %222 : vector<32x128xf32>
    %c0_80 = arith.constant 0 : index
    %c0_81 = arith.constant 0 : index
    %c0_82 = arith.constant 0 : index
    %224 = vector.load %arg19[%c0_80, %c0_81, %c0_82] : memref<2x32x128xf32, #tpu.memory_space<vmem>>, vector<1x32x128xf32>
    %225 = vector.shape_cast %224 : vector<1x32x128xf32> to vector<32x128xf32>
    %226 = arith.mulf %223, %225 : vector<32x128xf32>
    %227 = vector.shape_cast %226 : vector<32x128xf32> to vector<1x32x128xf32>
    %cst_83 = arith.constant dense<0.000000e+00> : vector<1xf32>
    %228 = vector.multi_reduction <add>, %227, %cst_83 [1, 2] : vector<1x32x128xf32> to vector<1xf32>
    %229 = vector.shape_cast %228 : vector<1xf32> to vector<1x1x1xf32>
    %230 = vector.extract %229[0, 0, 0] : f32 from vector<1x1x1xf32>
    %231 = vector.broadcast %230 : f32 to vector<1x1xf32>
    %c1_84 = arith.constant 1 : index
    %c0_85 = arith.constant 0 : index
    %c0_86 = arith.constant 0 : index
    %232 = vector.load %arg19[%c1_84, %c0_85, %c0_86] : memref<2x32x128xf32, #tpu.memory_space<vmem>>, vector<1x32x128xf32>
    %233 = vector.shape_cast %232 : vector<1x32x128xf32> to vector<32x128xf32>
    %234 = arith.mulf %223, %233 : vector<32x128xf32>
    %235 = vector.shape_cast %234 : vector<32x128xf32> to vector<1x32x128xf32>
    %cst_87 = arith.constant dense<0.000000e+00> : vector<1xf32>
    %236 = vector.multi_reduction <add>, %235, %cst_87 [1, 2] : vector<1x32x128xf32> to vector<1xf32>
    %237 = vector.shape_cast %236 : vector<1xf32> to vector<1x1x1xf32>
    %238 = vector.extract %237[0, 0, 0] : f32 from vector<1x1x1xf32>
    %239 = vector.broadcast %238 : f32 to vector<1x1xf32>
    %240 = tpu.iota {dimensions = array<i32: 1>} : vector<1x2xi32>
    %c0_i32 = arith.constant 0 : i32
    %241 = vector.broadcast %c0_i32 : i32 to vector<1x2xi32>
    %242 = arith.cmpi eq, %240, %241 : vector<1x2xi32>
    %243 = arith.negf %239 : vector<1x1xf32>
    %244 = math.exp %243 : vector<1x1xf32>
    %cst_88 = arith.constant 1.000000e+00 : f32
    %245 = vector.broadcast %cst_88 : f32 to vector<1x1xf32>
    %246 = arith.addf %245, %244 : vector<1x1xf32>
    %247 = arith.divf %245, %246 : vector<1x1xf32>
    %248 = vector.shape_cast %231 : vector<1x1xf32> to vector<1x1xf32>
    %249 = vector.broadcast %248 : vector<1x1xf32> to vector<1x2xf32>
    %250 = vector.shape_cast %247 : vector<1x1xf32> to vector<1x1xf32>
    %251 = vector.broadcast %250 : vector<1x1xf32> to vector<1x2xf32>
    %252 = arith.select %242, %249, %251 : vector<1x2xi1>, vector<1x2xf32>
    %253 = vector.shape_cast %252 : vector<1x2xf32> to vector<1x1x2xf32>
    %c0_89 = arith.constant 0 : index
    %c0_90 = arith.constant 0 : index
    %c0_91 = arith.constant 0 : index
    %254 = vector.load %arg20[%c0_89, %c0_90, %c0_91] : memref<1x1x2xf32, #tpu.memory_space<vmem>>, vector<1x1x2xf32>
    tpu.vector_store %arg20[%c0_89, %c0_90, %c0_91], %253 {strides = array<i32>} : memref<1x1x2xf32, #tpu.memory_space<vmem>>, vector<1x1x2xf32>,
    return
  }
  func.func @transform_0(%arg0: i32) -> (i32, i32, i32, i32) {
    %c0_i32 = arith.constant 0 : i32
    %c0_i32_0 = arith.constant 0 : i32
    %c0_i32_1 = arith.constant 0 : i32
    %c0_i32_2 = arith.constant 0 : i32
    return %arg0, %c0_i32, %c0_i32_0, %c0_i32_1 : i32, i32, i32, i32
  }
  func.func @transform_1(%arg0: i32) -> (i32, i32) {
    %c0_i32 = arith.constant 0 : i32
    %c0_i32_0 = arith.constant 0 : i32
    %c0_i32_1 = arith.constant 0 : i32
    return %c0_i32, %c0_i32_0 : i32, i32
  }
  func.func @transform_2(%arg0: i32) -> (i32, i32) {
    %c0_i32 = arith.constant 0 : i32
    %c0_i32_0 = arith.constant 0 : i32
    %c0_i32_1 = arith.constant 0 : i32
    return %c0_i32, %c0_i32_0 : i32, i32
  }
  func.func @transform_3(%arg0: i32) -> (i32, i32) {
    %c0_i32 = arith.constant 0 : i32
    %c0_i32_0 = arith.constant 0 : i32
    %c0_i32_1 = arith.constant 0 : i32
    return %c0_i32, %c0_i32_0 : i32, i32
  }
  func.func @transform_4(%arg0: i32) -> (i32, i32) {
    %c0_i32 = arith.constant 0 : i32
    %c0_i32_0 = arith.constant 0 : i32
    %c0_i32_1 = arith.constant 0 : i32
    return %c0_i32, %c0_i32_0 : i32, i32
  }
  func.func @transform_5(%arg0: i32) -> (i32, i32) {
    %c0_i32 = arith.constant 0 : i32
    %c0_i32_0 = arith.constant 0 : i32
    %c0_i32_1 = arith.constant 0 : i32
    return %c0_i32, %c0_i32_0 : i32, i32
  }
  func.func @transform_6(%arg0: i32) -> (i32, i32) {
    %c0_i32 = arith.constant 0 : i32
    %c0_i32_0 = arith.constant 0 : i32
    %c0_i32_1 = arith.constant 0 : i32
    return %c0_i32, %c0_i32_0 : i32, i32
  }
  func.func @transform_7(%arg0: i32) -> (i32, i32, i32) {
    %c0_i32 = arith.constant 0 : i32
    %c0_i32_0 = arith.constant 0 : i32
    %c0_i32_1 = arith.constant 0 : i32
    %c0_i32_2 = arith.constant 0 : i32
    return %c0_i32, %c0_i32_0, %c0_i32_1 : i32, i32, i32
  }
  func.func @transform_8(%arg0: i32) -> (i32, i32, i32) {
    %c0_i32 = arith.constant 0 : i32
    %c0_i32_0 = arith.constant 0 : i32
    %c0_i32_1 = arith.constant 0 : i32
    %c0_i32_2 = arith.constant 0 : i32
    return %c0_i32, %c0_i32_0, %c0_i32_1 : i32, i32, i32
  }
  func.func @transform_9(%arg0: i32) -> (i32, i32, i32) {
    %c0_i32 = arith.constant 0 : i32
    %c0_i32_0 = arith.constant 0 : i32
    %c0_i32_1 = arith.constant 0 : i32
    %c0_i32_2 = arith.constant 0 : i32
    return %c0_i32, %c0_i32_0, %c0_i32_1 : i32, i32, i32
  }
  func.func @transform_10(%arg0: i32) -> (i32, i32) {
    %c0_i32 = arith.constant 0 : i32
    %c0_i32_0 = arith.constant 0 : i32
    %c0_i32_1 = arith.constant 0 : i32
    return %c0_i32, %c0_i32_0 : i32, i32
  }
  func.func @transform_11(%arg0: i32) -> (i32, i32) {
    %c0_i32 = arith.constant 0 : i32
    %c0_i32_0 = arith.constant 0 : i32
    %c0_i32_1 = arith.constant 0 : i32
    return %c0_i32, %c0_i32_0 : i32, i32
  }
  func.func @transform_12(%arg0: i32) -> (i32, i32) {
    %c0_i32 = arith.constant 0 : i32
    %c0_i32_0 = arith.constant 0 : i32
    %c0_i32_1 = arith.constant 0 : i32
    return %c0_i32, %c0_i32_0 : i32, i32
  }
  func.func @transform_13(%arg0: i32) -> (i32, i32) {
    %c0_i32 = arith.constant 0 : i32
    %c0_i32_0 = arith.constant 0 : i32
    %c0_i32_1 = arith.constant 0 : i32
    return %c0_i32, %c0_i32_0 : i32, i32
  }
  func.func @transform_14(%arg0: i32) -> (i32, i32) {
    %c0_i32 = arith.constant 0 : i32
    %c0_i32_0 = arith.constant 0 : i32
    %c0_i32_1 = arith.constant 0 : i32
    return %c0_i32, %c0_i32_0 : i32, i32
  }
  func.func @transform_15(%arg0: i32) -> (i32, i32) {
    %c0_i32 = arith.constant 0 : i32
    %c0_i32_0 = arith.constant 0 : i32
    %c0_i32_1 = arith.constant 0 : i32
    return %c0_i32, %c0_i32_0 : i32, i32
  }
  func.func @transform_16(%arg0: i32) -> (i32, i32, i32) {
    %c0_i32 = arith.constant 0 : i32
    %c0_i32_0 = arith.constant 0 : i32
    %c0_i32_1 = arith.constant 0 : i32
    %c0_i32_2 = arith.constant 0 : i32
    return %c0_i32, %c0_i32_0, %c0_i32_1 : i32, i32, i32
  }
  func.func @transform_17(%arg0: i32) -> (i32, i32, i32) {
    %c0_i32 = arith.constant 0 : i32
    %c0_i32_0 = arith.constant 0 : i32
    %c0_i32_1 = arith.constant 0 : i32
    %c0_i32_2 = arith.constant 0 : i32
    return %c0_i32, %c0_i32_0, %c0_i32_1 : i32, i32, i32
  }
  func.func @transform_18(%arg0: i32) -> (i32, i32, i32) {
    %c0_i32 = arith.constant 0 : i32
    %c0_i32_0 = arith.constant 0 : i32
    %c0_i32_1 = arith.constant 0 : i32
    %c0_i32_2 = arith.constant 0 : i32
    return %c0_i32, %c0_i32_0, %c0_i32_1 : i32, i32, i32
  }
  func.func @transform_19(%arg0: i32) -> (i32, i32, i32) {
    %c0_i32 = arith.constant 0 : i32
    %c0_i32_0 = arith.constant 0 : i32
    %c0_i32_1 = arith.constant 0 : i32
    return %arg0, %c0_i32, %c0_i32_0 : i32, i32, i32
  }
}

</mosaic_0001>

<bundles_post_ra>
// kernel: dronet_forward.3
= control target key start
LH: loop header
LB: loop body
LE: loop exit
PB: predicated region body
PF: predicated region fallthrough
CT: control target
= control target key end

     0   :  { %s1010_s12 = smov 0   ;;  %s1012_s13 = smov 0   ;;  %s1121_s0 = inlined_call_operand.vmem [shape: bf16[2,4,49,896], index: 0, kind: input, shape index: {}]   ;;  %s1122_s1 = inlined_call_operand.vmem [shape: bf16[32,49], index: 1, kind: input, shape index: {}]   ;;  %s1123_s2 = inlined_call_operand.vmem [shape: f32[8,1], index: 2, kind: input, shape index: {}]   ;;  %s1124_s3 = inlined_call_operand.vmem [shape: bf16[2,4,8,896], index: 3, kind: output, shape index: {}]  }
   0x1   :  { %s1014_s14 = smov 0   ;;  %s1016_s15 = smov 0  }
   0x2   :  { %s1018_s16 = smov 0  }
   0x3 LB: > { %s22_s17 = sadd.s32 1, %s979_s14  ;;  %s25_s18 = sadd.s32 1, %s983_s15  ;;  %s987_s16 = sphi %s1018_s16, %s13_s16   ;;  %s983_s15 = sphi %s1016_s15, %s1128_s15   ;;  %s979_s14 = sphi %s1014_s14, %s1127_s14   ;;  %s975_s13 = sphi %s1012_s13, %s1126_s13   ;;  %s971_s12 = sphi %s1010_s12, %s1125_s12  }
   0x4   : > { %p23_p0 = scmp.ge.s32.totalorder %s22_s17, 4  ;;  %p795_p1 = scmp.ge.s32.totalorder %s987_s16, 1 }
   0x5   : > { %p157_p2 = scmp.lt.s32.totalorder %s987_s16, 9 }
   0x6   : > { %s1130_s17 = smov (%p23_p0, %s22_s17), 0  ;;  %s1132_s18 = smov (!%p23_p0, %s25_s18), %s983_s15 }
   0x7   : > { %p158_p3 = pnand %p795_p1, %p157_p2  ;;  %p27_p4 = scmp.ge.s32.totalorder %s1132_s18, 2 }
   0x8   : > { %p189_p5 = scmp.lt.s32.totalorder (!%p158_p3), %s975_s13, 1  ;;  %p191_p6 = scmp.lt.s32.totalorder (!%p158_p3), %s971_s12, 3  ;;  %v989_v0 = vmov (!%p158_p3), 0   ;;  %v636_v1 = vld [vmem:[%s1123_s2] sm:$0xff] (!%p158_p3)  ;;  %vm383_vm0 = vcmask (!%p158_p3), 1040384   ;;  %vm376_vm1 = vcmask (!%p158_p3), 400384  }
   0x9   : > { %s1134_s18 = smov (%p27_p4, %s1132_s18), 0  ;;  %161 = sbr.rel (%p158_p3) target bundleno = 292 (0x124), region = 32 }
   0xa   : > { %439 = vmatprep.mubr.bf16.mxu0 (!%p158_p3), %v989_v0  ;;  %492 = vmatprep.mubr.bf16.mxu1 (!%p158_p3), %v989_v0  ;;  %v385_v15 = vsel (!%p158_p3), %vm383_vm0, 65535, %v989_v0  ;;  %v932_v27 = vld [vmem:[%s1122_s1] sm:$0xff] (!%p158_p3)   ;;  %v940_v35 = vld [vmem:[%s1122_s1 + $0x8] sm:$0xff] (!%p158_p3)  }
   0xb   : > { %909 = vset.pattern.permute.xlu0 (!%p158_p3), %v989_v0 }
   0xc   : > { %639 = vperm.xlu0 (!%p158_p3), %909, %v636_v1  }
  0x10   : > { %s1136_s13 = smov (!%p189_p5, %s975_s13), 1  ;;  %s1138_s12 = smov (!%p191_p6, %s971_s12), 3 }
  0x11   : > { %s865_s21 = smul.u32 196, %s1136_s13 }
  0x12   : > { %s864_s22 = smul.u32 49, %s1138_s12 }
  0x13   : > { %s866_s5 = smul.u32 7, %s1138_s12 }
  0x14   : > { %s195_s23 = sadd.s32 %s865_s21, %s864_s22  ;;  %s867_s6 = smul.u32 28, %s1136_s13 }
  0x15   : > { %s796_s24 = sshll.u32 %s195_s23, 2 }
  0x16   : > { %s1055_s27 = scalar_lea.vmem %s1121_s0, %s796_s24  ;;  %s204_s7 = sadd.s32 %s867_s6, %s866_s5 }
  0x17   : > { %v910_v2 = vld [vmem:[%s1055_s27 + $0x4] ss:$28 sps:$4 sm:$0xff]   ;;  %v912_v3 = vld [vmem:[%s1055_s27 + $0xc] ss:$28 sps:$4 sm:$0xff]   ;;  %v916_v6 = vld [vmem:[%s1055_s27 + $0x3c] ss:$28 sps:$4 sm:$0xff]  }
  0x18   : > { %407 = vmatprep.subr.bf16.mxu0 %v910_v2  ;;  %v914_v4 = vld [vmem:[%s1055_s27] ss:$28 sps:$4 sm:$0xff]   ;;  %v915_v5 = vld [vmem:[%s1055_s27 + $0x8] ss:$28 sps:$4 sm:$0xff]   ;;  %460 = vmatprep.subr.bf16.mxu1 %v912_v3  ;;  %v920_v8 = vld [vmem:[%s1055_s27 + $0x38] ss:$28 sps:$4 sm:$0xff]  }
  0x19   : > { %408 = vmatpush1.bf16.msra.mxu0 %v914_v4  ;;  %461 = vmatpush1.bf16.msra.mxu1 %v915_v5  ;;  %v918_v7 = vld [vmem:[%s1055_s27 + $0x44] ss:$28 sps:$4 sm:$0xff]   ;;  %v922_v10 = vld [vmem:[%s1055_s27 + $0x74] ss:$28 sps:$4 sm:$0xff]   ;;  %v924_v11 = vld [vmem:[%s1055_s27 + $0x7c] ss:$28 sps:$4 sm:$0xff]  }
  0x1a   : > { %409 = vmatprep.subr.bf16.mxu0 %v916_v6  ;;  %v921_v9 = vld [vmem:[%s1055_s27 + $0x40] ss:$28 sps:$4 sm:$0xff]   ;;  %462 = vmatprep.subr.bf16.mxu1 %v918_v7  ;;  %v926_v12 = vld [vmem:[%s1055_s27 + $0x70] ss:$28 sps:$4 sm:$0xff]   ;;  %v927_v13 = vld [vmem:[%s1055_s27 + $0x78] ss:$28 sps:$4 sm:$0xff]  }
  0x1b   : > { %v232_v14 = vld [vmem:[%s1055_s27 + $0xa8] sm:$0x11]  ;;  %v233_v16 = vld [vmem:[%s1055_s27 + $0xb0] sm:$0x11]  ;;  %v234_v30 = vld [vmem:[%s1055_s27 + $0xb8] sm:$0x11] }
  0x1c   : > { %v822_v17 = vcombine.high %v232_v14, %v232_v14  ;;  %v824_v18 = vcombine.high %v233_v16, %v233_v16  ;;  %v821_v19 = vcombine.low %v232_v14, %v232_v14  ;;  %v823_v20 = vcombine.low %v233_v16, %v233_v16  ;;  %v935_v25 = vld [vmem:[%s1055_s27 + $0x14] ss:$28 sps:$4 sm:$0xff]   ;;  %v938_v29 = vld [vmem:[%s1055_s27 + $0x4c] ss:$28 sps:$4 sm:$0xff]   ;;  %v943_v33 = vld [vmem:[%s1055_s27 + $0x84] ss:$28 sps:$4 sm:$0xff]  }
  0x1d   : > { %410 = vmatpush1.bf16.msra.mxu0 %v920_v8  ;;  %463 = vmatpush1.bf16.msra.mxu1 %v921_v9  ;;  %v939_v26 = vld [vmem:[%s1055_s27 + $0x18] ss:$28 sps:$4 sm:$0xff]   ;;  %v933_v28 = vld [vmem:[%s1055_s27 + $0x10] ss:$28 sps:$4 sm:$0xff]   ;;  %v936_v32 = vld [vmem:[%s1055_s27 + $0x48] ss:$28 sps:$4 sm:$0xff]   ;;  %v826_v34 = vcombine.high %v234_v30, %v234_v30  ;;  %v825_v38 = vcombine.low %v234_v30, %v234_v30 }
  0x1e   : > { %411 = vmatprep.subr.bf16.mxu0 %v922_v10  ;;  %464 = vmatprep.subr.bf16.mxu1 %v924_v11  ;;  %v390_v21 = vand.u32 %v822_v17, %v385_v15  ;;  %v396_v22 = vand.u32 %v824_v18, %v385_v15  ;;  %v387_v23 = vand.u32 %v821_v19, %v385_v15  ;;  %v944_v31 = vld [vmem:[%s1055_s27 + $0x50] ss:$28 sps:$4 sm:$0xff]   ;;  %v948_v36 = vld [vmem:[%s1055_s27 + $0xc0] ss:$0 sps:$4 sm:$0x11]   ;;  %s797_s8 = sshll.u32 %s204_s7, 2 }
  0x1f   : > { %v393_v24 = vand.u32 %v823_v20, %v385_v15  ;;  %v941_v37 = vld [vmem:[%s1055_s27 + $0x80] ss:$28 sps:$4 sm:$0xff]   ;;  %v947_v39 = vld [vmem:[%s1055_s27 + $0x88] ss:$28 sps:$4 sm:$0xff]   ;;  %v402_v40 = vand.u32 %v826_v34, %v385_v15  ;;  %v405_v41 = vand.u32 %v948_v36, %v385_v15  ;;  %v399_v42 = vand.u32 %v825_v38, %v385_v15  ;;  %s206_s11 = scalar_lea.vmem %s1124_s3, %s797_s8 }
  0x21   : > { %412 = vmatpush1.bf16.msra.mxu0 %v926_v12  ;;  %465 = vmatpush1.bf16.msra.mxu1 %v927_v13 }
  0x22   : > { %413 = vmatprep.subr.bf16.mxu0 %v390_v21  ;;  %466 = vmatprep.subr.bf16.mxu1 %v396_v22 }
  0x25   : > { %414 = vmatpush1.bf16.msra.mxu0 %v387_v23  ;;  %467 = vmatpush1.bf16.msra.mxu1 %v393_v24 }
  0x26   : > { %513 = vmatprep.subr.bf16.mxu0 %v935_v25  ;;  %852 = vmatprep.subr.bf16.mxu1 %v939_v26 }
  0x28   : > { %828 = vmatmul.mubr.msk.bf16.vlgmr.msra.gmra.mrb[0].mxu0 %vm376_vm1, %v932_v27  ;;  %830 = vmatmul.mubr.msk.bf16.vlgmr.msra.gmra.mrb[0].mxu1 %vm376_vm1, %v932_v27 }
  0x29   : > { %514 = vmatpush1.bf16.msra.mxu0 %v933_v28  ;;  %449 = vmatprep.mubr.bf16.mxu0 %v989_v0 }
  0x2a   : > { %515 = vmatprep.subr.bf16.mxu0 %v938_v29  ;;  %502 = vmatprep.mubr.bf16.mxu1 %v989_v0 }
  0x2b   : > { %853 = vmatpush3.bf16.msra.mxu1 %v939_v26 }
  0x2c   : > { %854 = vmatprep.subr.bf16.mxu1 %v944_v31 }
  0x2d   : > { %516 = vmatpush1.bf16.msra.mxu0 %v936_v32 }
  0x2e   : > { %517 = vmatprep.subr.bf16.mxu0 %v943_v33 }
  0x2f   : > { %855 = vmatpush3.bf16.msra.mxu1 %v944_v31 }
  0x30   : > { %829 = vmatmul.mubr.msk.bf16.gmra.mrb[4].mxu0 %vm376_vm1, %v940_v35  ;;  %831 = vmatmul.mubr.msk.bf16.gmra.mrb[4].mxu1 %vm376_vm1, %v940_v35 }
  0x31   : > { %518 = vmatpush1.bf16.msra.mxu0 %v941_v37  ;;  %856 = vmatprep.subr.bf16.mxu1 %v947_v39 }
  0x32   : > { %519 = vmatprep.subr.bf16.mxu0 %v402_v40  ;;  %545 = vmatprep.mubr.bf16.mxu0 %v989_v0 }
  0x33   : > { %857 = vmatpush3.bf16.msra.mxu1 %v947_v39  ;;  %860 = vmatprep.mubr.msk.bf16.mxu1 %vm376_vm1, %v932_v27 }
  0x34   : > { %858 = vmatprep.subr.bf16.mxu1 %v405_v41 }
  0x35   : > { %520 = vmatpush1.bf16.msra.mxu0 %v399_v42 }
  0x37   : > { %859 = vmatpush3.bf16.msra.mxu1 %v405_v41 }
  0x38   : > { %832 = vmatmul.mubr.msk.bf16.vlgmr.msra.gmra.mrb[8].mxu0 %vm376_vm1, %v932_v27 }
  0x39   : > { %555 = vmatprep.mubr.bf16.mxu0 %v989_v0 }
  0x3a   : > { %861 = vmatmul.mubr.msk.bf16.vlgmr.msra.gmra.mrb[8].mxu1 %vm376_vm1, %v940_v35 }
  0x40   : > { %833 = vmatmul.mubr.msk.bf16.gmra.mrb[12].mxu0 %vm376_vm1, %v940_v35 }
  0x8b   : > { %v640_v3 = vpop.permute.xlu0 %639 }
  0xfb   : > { %v441_v43 = vpop.f32.mrb[0].mxu0  ;;  %v494_v44 = vpop.f32.mrb[0].mxu1 }
  0xfc   : > { %v443_v45 = vpop.f32.mrb[1].mxu0  ;;  %v496_v46 = vpop.f32.mrb[1].mxu1 }
  0xfd   : > { %v445_v47 = vpop.f32.mrb[2].mxu0  ;;  %v498_v48 = vpop.f32.mrb[2].mxu1 }
  0xfe   : > { %v615_v49 = vmax.f32 %v441_v43, %v445_v47  ;;  %v447_v50 = vpop.f32.mrb[3].mxu0  ;;  %v617_v51 = vmax.f32 %v494_v44, %v498_v48  ;;  %v500_v52 = vpop.f32.mrb[3].mxu1 }
  0xff   : > { %v616_v53 = vmax.f32 %v443_v45, %v447_v50  ;;  %v618_v54 = vmax.f32 %v496_v46, %v500_v52 }
 0x103   : > { %v451_v55 = vpop.f32.mrb[4].mxu0  ;;  %v504_v56 = vpop.f32.mrb[4].mxu1 }
 0x104   : > { %v453_v57 = vpop.f32.mrb[5].mxu0  ;;  %v506_v58 = vpop.f32.mrb[5].mxu1 }
 0x105   : > { %v455_v59 = vpop.f32.mrb[6].mxu0  ;;  %v508_v60 = vpop.f32.mrb[6].mxu1 }
 0x106   : > { %v622_v61 = vmax.f32 %v451_v55, %v455_v59  ;;  %v624_v62 = vmax.f32 %v504_v56, %v508_v60  ;;  %v457_v63 = vpop.f32.mrb[7].mxu0  ;;  %v510_v0 = vpop.f32.mrb[7].mxu1 }
 0x107   : > { %v623_v1 = vmax.f32 %v453_v57, %v457_v63  ;;  %v625_v2 = vmax.f32 %v506_v58, %v510_v0 }
 0x108   : > { %v629_v4 = vmax.f32 %v615_v49, %v622_v61  ;;  %v631_v5 = vmax.f32 %v617_v51, %v624_v62 }
 0x109   : > { %v630_v6 = vmax.f32 %v616_v53, %v623_v1  ;;  %v632_v7 = vmax.f32 %v618_v54, %v625_v2 }
 0x10a   : > { %v642_v8 = vadd.f32 %v640_v3, %v629_v4  ;;  %v644_v9 = vadd.f32 %v640_v3, %v631_v5 }
 0x10b   : > { %v643_v10 = vadd.f32 %v640_v3, %v630_v6  ;;  %v645_v11 = vadd.f32 %v640_v3, %v632_v7  ;;  %v547_v12 = vpop.f32.mrb[8].mxu0 }
 0x10c   : > { %v649_v13 = vmax.f32 %v642_v8, 0.0  ;;  %v651_v14 = vmax.f32 %v644_v9, 0.0  ;;  %v549_v15 = vpop.f32.mrb[9].mxu0 }
 0x10d   : > { %v650_v16 = vmax.f32 %v643_v10, 0.0  ;;  %v652_v17 = vmax.f32 %v645_v11, 0.0  ;;  %v551_v18 = vpop.f32.mrb[10].mxu0  ;;  %v862_v19 = vpop.f32.mrb[8].mxu1 }
 0x10e   : > { %v656_v20 = vmin.f32 %v649_v13, 6.0  ;;  %v658_v21 = vmin.f32 %v651_v14, 6.0  ;;  %v619_v22 = vmax.f32 %v547_v12, %v551_v18  ;;  %v553_v23 = vpop.f32.mrb[11].mxu0  ;;  %v600_v24 = vpop.f32.mrb[9].mxu1 }
 0x10f   : > { %v657_v25 = vmin.f32 %v650_v16, 6.0  ;;  %v659_v26 = vmin.f32 %v652_v17, 6.0  ;;  %v620_v27 = vmax.f32 %v549_v15, %v553_v23  ;;  %v863_v28 = vpop.f32.mrb[10].mxu1 }
 0x110   : > { %v628_v29 = vmax.f32 %v862_v19, %v863_v28  ;;  %v603_v30 = vpop.f32.mrb[11].mxu1 }
 0x111   : > { %v842_v31 = vpack.c.bf16 %v657_v25, %v656_v20  ;;  %v843_v32 = vpack.c.bf16 %v659_v26, %v658_v21  ;;  %v621_v33 = vmax.f32 %v600_v24, %v603_v30 }
 0x113   : > { %v557_v34 = vpop.f32.mrb[12].mxu0  ;;  %v635_v35 = vmax.f32 %v621_v33, %v628_v29  ;;  %692 = vst [vmem:[%s206_s11] sm:$0xff] %v842_v31  ;;  %693 = vst [vmem:[%s206_s11 + $0x8] sm:$0xff] %v843_v32 }
 0x114   : > { %v559_v36 = vpop.f32.mrb[13].mxu0 }
 0x115   : > { %v648_v37 = vadd.f32 %v640_v3, %v635_v35  ;;  %v561_v38 = vpop.f32.mrb[14].mxu0 }
 0x116   : > { %v626_v39 = vmax.f32 %v557_v34, %v561_v38  ;;  %v563_v40 = vpop.f32.mrb[15].mxu0 }
 0x117   : > { %v655_v41 = vmax.f32 %v648_v37, 0.0  ;;  %v627_v42 = vmax.f32 %v559_v36, %v563_v40 }
 0x118   : > { %v633_v43 = vmax.f32 %v619_v22, %v626_v39 }
 0x119   : > { %v662_v44 = vmin.f32 %v655_v41, 6.0  ;;  %v634_v45 = vmax.f32 %v620_v27, %v627_v42 }
 0x11a   : > { %v646_v46 = vadd.f32 %v640_v3, %v633_v43 }
 0x11b   : > { %v845_v47 = vpack.c.bf16 %v662_v44, %v662_v44  ;;  %v647_v48 = vadd.f32 %v640_v3, %v634_v45 }
 0x11c   : > { %v653_v49 = vmax.f32 %v646_v46, 0.0 }
 0x11d   : > { %695 = vst [vmem:[%s206_s11 + $0x18] sm:$0xf] %v845_v47  ;;  %v654_v50 = vmax.f32 %v647_v48, 0.0 }
 0x11e   : > { %v660_v51 = vmin.f32 %v653_v49, 6.0 }
 0x11f   : > { %v661_v52 = vmin.f32 %v654_v50, 6.0 }
 0x121   : > { %v844_v53 = vpack.c.bf16 %v661_v52, %v660_v51 }
 0x123   : > { %694 = vst [vmem:[%s206_s11 + $0x10] sm:$0xff] %v844_v53 }
 0x124 PF: > { %s13_s16 = sadd.s32 1, %s987_s16   ;;  %s1125_s12 = smov %s979_s14 }
 0x125   : > { %p10_p7 = scmp.ge.s32.totalorder %s13_s16, 10   ;;  %s1126_s13 = smov %s983_s15 }
 0x126   : > { %s1127_s14 = smov %s1130_s17  ;;  %s1128_s15 = smov %s1134_s18 }
 0x127   :  { %12 = sbr.rel (!%p10_p7) target bundleno = 3 (0x3), region = 62 }

// kernel: dronet_forward.4
= control target key start
LH: loop header
LB: loop body
LE: loop exit
PB: predicated region body
PF: predicated region fallthrough
CT: control target
= control target key end

     0   :  { %s2329_s30 = smov 0   ;;  %s3448_s0 = inlined_call_operand.vmem [shape: bf16[2,4,8,896], index: 0, kind: input, shape index: {}]   ;;  %s3449_s1 = inlined_call_operand.vmem [shape: bf16[8,72], index: 1, kind: input, shape index: {}]   ;;  %s3450_s2 = inlined_call_operand.vmem [shape: f32[8,1], index: 2, kind: input, shape index: {}]   ;;  %s3451_s3 = inlined_call_operand.vmem [shape: bf16[8,72], index: 3, kind: input, shape index: {}]   ;;  %s3452_s4 = inlined_call_operand.vmem [shape: f32[8,1], index: 4, kind: input, shape index: {}]   ;;  %s3453_s5 = inlined_call_operand.vmem [shape: bf16[8,8], index: 5, kind: input, shape index: {}]   ;;  %s3454_s6 = inlined_call_operand.vmem [shape: f32[8,1], index: 6, kind: input, shape index: {}]   ;;  %s3455_s7 = inlined_call_operand.vmem [shape: f32[9,1,896], index: 7, kind: input, shape index: {}]   ;;  %s3456_s8 = inlined_call_operand.vmem [shape: f32[9,1,896], index: 8, kind: input, shape index: {}]   ;;  %s3457_s9 = inlined_call_operand.vmem [shape: bf16[2,8,896], index: 9, kind: output, shape index: {}]  }
   0x1 LB: > { %s2032_s10 = sadd.s32 4294967295, %s2266_s30   ;;  %p2036_p0 = scmp.ge.s32.totalorder %s2266_s30, 1  ;;  %s2266_s30 = sphi %s2329_s30, %s19_s30  }
   0x2   : > { %p287_p1 = scmp.lt.s32.totalorder %s2266_s30, 3 }
   0x4   : > { %p288_p2 = pnand %p2036_p0, %p287_p1 }
   0x6   : > { %291 = sbr.rel (%p288_p2) target bundleno = 875 (0x36b), region = 56 }
   0xd   : > { %p323_p3 = scmp.lt.s32.totalorder %s2032_s10, 1  ;;  %s2268_s15 = smov 29   ;;  %v3461_v39 = vmov 0   ;;  %v379_v47 = vld [vmem:[%s3450_s2] sm:$0xff]  ;;  %v411_v48 = vlaneseq  ;;  %v2477_v59 = vld [vmem:[%s3455_s7 + $0xe] sm:$0xff]  ;;  %vm766_vm3 = vcmask 1043456  }
   0xe   : > { %s2269_s16 = smov 28   ;;  %s2270_s17 = smov 1   ;;  %861 = vmatprep.mubr.bf16.mxu1 %v3461_v39  ;;  %820 = vmatprep.mubr.bf16.mxu0 %v3461_v39  ;;  %v2453_v52 = vld [vmem:[%s3455_s7 + $0x7] sm:$0xff]  ;;  %v2482_v60 = vld [vmem:[%s3455_s7 + $0x15] sm:$0xff]  ;;  %vm762_vm4 = vcmask 588800   ;;  %vm2273_vm5 = vmmov 0  }
   0xf   : > { %s3545_s10 = smov (!%p323_p3, %s2032_s10), 1  ;;  %2235 = vset.pattern.permute.xlu0 %v3461_v39  ;;  %2236 = vset.pattern.permute.xlu1 %v3461_v39  ;;  %v2443_v49 = vshrl.u32 %v411_v48, 7  ;;  %v2445_v50 = vand.u32 127, %v411_v48  ;;  %v2464_v55 = vld [vmem:[%s3455_s7] sm:$0xff]  ;;  %s2274_s13 = smov 27   ;;  %vm1735_vm11 = vcmask 64512  }
  0x10   : > { %s2139_s11 = smul.u32 112, %s3545_s10  ;;  %s2275_s18 = smov 127  }
  0x11   : > { %v2448_v51 = vsub.s32 3, %v2443_v49  ;;  %v2456_v53 = vsub.s32 2, %v2443_v49  ;;  %v2459_v54 = vsub.s32 1, %v2443_v49  ;;  %vm478_vm0 = vcmp.lt.s32.totalorder %v2445_v50, 28  ;;  %s2276_s19 = smov 101   ;;  %s2277_s20 = smov 99  }
  0x12   : > { %s2343_s14 = scalar_lea.vmem %s3448_s0, %s2139_s11  ;;  %vm413_vm1 = vcmp.lt.s32.totalorder %v2445_v50, 29  ;;  %vm607_vm2 = vcmp.lt.s32.totalorder %v2445_v50, 1  ;;  %s2278_s21 = smov 100   ;;  %vm1107_vm6 = vcmp.lt.s32.totalorder %v2445_v50, 27  ;;  %vm1236_vm7 = vcmp.lt.s32.totalorder %v2445_v50, 127 }
  0x13   : > { %v2346_v0 = vld [vmem:[%s2343_s14 + $0x5c] sm:$0xff]  ;;  %v2349_v1 = vld [vmem:[%s2343_s14 + $0x54] sm:$0xff]  ;;  %v2365_v11 = vld [vmem:[%s2343_s14 + $0x24] sm:$0xff]  ;;  %v437_v58 = vrot.slane %v2464_v55, %v2448_v51  ;;  %vm1301_vm8 = vcmp.lt.s32.totalorder %v2445_v50, 101  ;;  %vm1431_vm9 = vcmp.lt.s32.totalorder %v2445_v50, 99  ;;  %vm1366_vm10 = vcmp.lt.s32.totalorder %v2445_v50, 100 }
  0x14   : > { %v2352_v2 = vld [vmem:[%s2343_s14 + $0x40] sm:$0xff]  ;;  %v373_v3 = vunpack.c.l.bf16 %v2346_v0  ;;  %v374_v4 = vunpack.c.h.bf16 %v2346_v0  ;;  %v371_v5 = vunpack.c.l.bf16 %v2349_v1  ;;  %v372_v6 = vunpack.c.h.bf16 %v2349_v1  ;;  %v2359_v7 = vld [vmem:[%s2343_s14 + $0x38] sm:$0xff]  ;;  %v2378_v18 = vld [vmem:[%s2343_s14 + $0x50] sm:$0xf]  ;;  %s2140_s24 = smul.u32 28, %s3545_s10 }
  0x15   : > { %v3469_v8 = vunpack.c.l.bf16 %v2352_v2  ;;  %v3470_v9 = vunpack.c.h.bf16 %v2352_v2  ;;  %v3468_v10 = vunpack.c.h.bf16 %v2359_v7  ;;  %v359_v16 = vunpack.c.l.bf16 %v2365_v11  ;;  %v2381_v19 = vld [vmem:[%s2343_s14 + $0x1c] sm:$0xff]  ;;  %v2390_v26 = vld [vmem:[%s2343_s14 + $0x6c] sm:$0xf]  ;;  %v2400_v30 = vld [vmem:[%s2343_s14 + $0x34] sm:$0xf] }
  0x16   : > { %v2160_v12 = vpack.i.bf16 %v374_v4, %v373_v3  ;;  %v2170_v13 = vpack.i.bf16 %v371_v5, %v372_v6  ;;  %v360_v17 = vunpack.c.h.bf16 %v2365_v11  ;;  %v2180_v20 = vpack.i.bf16 %v372_v6, %v374_v4  ;;  %v2408_v34 = vld [vmem:[%s2343_s14 + $0x64] sm:$0xff]  ;;  %v2418_v38 = vld [vmem:[%s2343_s14 + $0x2c] sm:$0xff]  ;;  %s332_s27 = scalar_lea.vmem %s3457_s9, %s2140_s24 }
  0x17   : > { %v2165_v14 = vpack.i.bf16 %v3470_v9, %v3469_v8  ;;  %v2175_v15 = vpack.i.bf16 %v373_v3, %v3468_v10  ;;  %v3467_v21 = vunpack.c.l.bf16 %v2359_v7  ;;  %v3460_v23 = vunpack.c.l.bf16 %v2378_v18  ;;  %v2411_v35 = vld [vmem:[%s2343_s14 + $0x48] sm:$0xff] }
  0x18   : > { %2161 = vrot.lane.b32.xlu0 %v2160_v12, %s2268_s15  ;;  %2171 = vrot.lane.b32.xlu1 %v2170_v13, %s2268_s15  ;;  %v2185_v22 = vpack.i.bf16 %v360_v17, %v359_v16  ;;  %v357_v24 = vunpack.c.l.bf16 %v2381_v19  ;;  %v358_v25 = vunpack.c.h.bf16 %v2381_v19  ;;  %v377_v29 = vunpack.c.l.bf16 %v2390_v26 }
  0x19   : > { %v2195_v27 = vpack.i.bf16 %v3460_v23, %v3467_v21  ;;  %v363_v32 = vunpack.c.l.bf16 %v2400_v30  ;;  %v376_v36 = vunpack.c.h.bf16 %v2408_v34  ;;  %v3459_v37 = vunpack.c.h.bf16 %v2411_v35 }
  0x1a   : > { %v2190_v28 = vpack.i.bf16 %v357_v24, %v358_v25  ;;  %v2200_v31 = vpack.i.bf16 %v377_v29, %v371_v5  ;;  %v362_v40 = vunpack.c.h.bf16 %v2418_v38  ;;  %v3458_v42 = vunpack.c.l.bf16 %v2411_v35 }
  0x1b   : > { %v2210_v33 = vpack.i.bf16 %v372_v6, %v363_v32  ;;  %v2220_v41 = vpack.i.bf16 %v376_v36, %v3459_v37  ;;  %v375_v43 = vunpack.c.l.bf16 %v2408_v34  ;;  %v361_v45 = vunpack.c.l.bf16 %v2418_v38 }
  0x1c   : > { %2166 = vrot.lane.b32.xlu0 %v2165_v14, %s2269_s16  ;;  %2176 = vrot.lane.b32.xlu1 %v2175_v15, %s2269_s16  ;;  %v502_v3 = vrot.slane %v2453_v52, %v2448_v51  ;;  %v433_v4 = vrot.slane %v2464_v55, %v2456_v53  ;;  %v498_v5 = vrot.slane %v2453_v52, %v2456_v53  ;;  %v2494_v6 = vsub.s32 0, %v2443_v49 }
  0x1d   : > { %v2225_v44 = vpack.i.bf16 %v375_v43, %v3458_v42  ;;  %v2230_v46 = vpack.i.bf16 %v376_v36, %v361_v45  ;;  %v566_v13 = vrot.slane %v2477_v59, %v2448_v51  ;;  %v631_v14 = vrot.slane %v2482_v60, %v2448_v51 }
  0x1e   : > { %v494_v15 = vrot.slane %v2453_v52, %v2459_v54  ;;  %v627_v24 = vrot.slane %v2482_v60, %v2456_v53  ;;  %v558_v25 = vrot.slane %v2477_v59, %v2459_v54  ;;  %v425_v32 = vrot.slane %v2464_v55, %v2494_v6 }
  0x20   : > { %2181 = vrot.lane.b32.xlu0 %v2180_v20, %s2269_s16  ;;  %2186 = vrot.lane.b32.xlu1 %v2185_v22, %s2270_s17  ;;  %v562_v22 = vrot.slane %v2477_v59, %v2456_v53 }
  0x24   : > { %2196 = vrot.lane.b32.xlu1 %v2195_v27, %s2269_s16  ;;  %2191 = vrot.lane.b32.xlu0 %v2190_v28, %s2270_s17 }
  0x28   : > { %2201 = vrot.lane.b32.xlu1 %v2200_v31, %s2269_s16  ;;  %409 = vrot.lane.b32.xlu0 %v377_v29, %s2268_s15 }
  0x2c   : > { %2211 = vrot.lane.b32.xlu1 %v2210_v33, %s2270_s17  ;;  %2206 = vrot.lane.b32.xlu0 %v2160_v12, %s2270_s17  ;;  %v429_v12 = vrot.slane %v2464_v55, %v2459_v54  ;;  %v490_v33 = vrot.slane %v2453_v52, %v2494_v6 }
  0x30   : > { %407 = vrot.lane.b32.xlu1 %v376_v36, %s2268_s15  ;;  %2216 = vrot.lane.b32.xlu0 %v2200_v31, %s2270_s17  ;;  %v623_v36 = vrot.slane %v2482_v60, %v2459_v54 }
  0x34   : > { %603 = vrot.lane.b32.xlu1 %v362_v40, %s2270_s17  ;;  %2221 = vrot.lane.b32.xlu0 %v2220_v41, %s2269_s16  ;;  %v554_v40 = vrot.slane %v2477_v59, %v2494_v6 }
  0x38   : > { %2226 = vrot.lane.b32.xlu1 %v2225_v44, %s2269_s16  ;;  %405 = vrot.lane.b32.xlu0 %v375_v43, %s2268_s15 }
  0x3c   : > { %666 = vrot.lane.b32.xlu1 %v375_v43, %s2270_s17  ;;  %2231 = vrot.lane.b32.xlu0 %v2230_v46, %s2270_s17  ;;  %v2537_v46 = vld [vmem:[%s2343_s14 + $0x8] sm:$0xff] }
  0x40   : > { %759 = vperm.xlu0 %2235, %v379_v47  }
  0x8a   : > { %v2466_v56 = vpop.permute.xlu0 %2161  ;;  %v2468_v57 = vpop.permute.xlu1 %2171 }
  0x8b   : > { %v3463_v61 = vunpack.i.h.bf16 %v2466_v56  ;;  %v2163_v62 = vunpack.i.l.bf16 %v2466_v56  ;;  %v2173_v63 = vunpack.i.l.bf16 %v2468_v57  ;;  %v2174_v41 = vunpack.i.h.bf16 %v2468_v57  ;;  %v2546_v57 = vld [vmem:[%s3455_s7 + $0x2a] sm:$0xff] }
  0x8d   : > { %v417_v20 = vsel %vm413_vm1, %v2163_v62, %v3463_v61  ;;  %v418_v31 = vsel %vm413_vm1, %v2173_v63, %v2163_v62 }
  0x8e   : > { %v2505_v16 = vpop.permute.xlu0 %2166  ;;  %v2177_v17 = vpop.permute.xlu1 %2176  ;;  %v460_v43 = vmul.f32 %v437_v58, %v417_v20  ;;  %v459_v37 = vmul.f32 %v433_v4, %v418_v31 }
  0x8f   : > { %v3464_v27 = vunpack.i.h.bf16 %v2505_v16  ;;  %v2168_v28 = vunpack.i.l.bf16 %v2505_v16  ;;  %v2178_v29 = vunpack.i.l.bf16 %v2177_v17  ;;  %v2179_v47 = vunpack.i.h.bf16 %v2177_v17 }
  0x91   : > { %v482_v44 = vsel %vm478_vm0, %v2168_v28, %v3464_v27  ;;  %v483_v45 = vsel %vm478_vm0, %v2178_v29, %v2168_v28  ;;  %v2553_v27 = vsub.s32 6, %v2443_v49 }
  0x92   : > { %v2539_v48 = vpop.permute.xlu0 %2181  ;;  %v2541_v62 = vpop.permute.xlu1 %2186  ;;  %v525_v42 = vmul.f32 %v502_v3, %v482_v44  ;;  %v524_v23 = vmul.f32 %v498_v5, %v483_v45  ;;  %v2042_v3 = vcombine.high %v2537_v46, %v2365_v11 }
  0x93   : > { %v2184_v58 = vunpack.i.h.bf16 %v2539_v48  ;;  %v3465_v20 = vunpack.i.l.bf16 %v2539_v48  ;;  %v3466_v28 = vunpack.i.h.bf16 %v2541_v62  ;;  %v2188_v17 = vunpack.i.l.bf16 %v2541_v62  ;;  %3493 = vst [vmem:[#allocation2_spill] sm:$0xff] %v2553_v27 }
  0x94   : > { %v725_v39 = vpack.c.bf16 %v525_v42, %v460_v43  ;;  %v724_v61 = vpack.c.bf16 %v524_v23, %v459_v37  ;;  %v619_v42 = vrot.slane %v2482_v60, %v2494_v6  ;;  %v695_v23 = vrot.slane %v2546_v57, %v2448_v51 }
  0x95   : > { %v546_v4 = vsel %vm478_vm0, %v2179_v47, %v3465_v20  ;;  %v611_v5 = vsel %vm607_vm2, %v2188_v17, %v3466_v28  ;;  %v547_v37 = vsel %vm478_vm0, %v2184_v58, %v2179_v47  ;;  %v419_v20 = vsel %vm413_vm1, %v2174_v41, %v2173_v63 }
  0x96   : > { %829 = vmatprep.subr.bf16.mxu1 %v725_v39  ;;  %v2571_v31 = vpop.permute.xlu1 %2196  ;;  %v2192_v43 = vpop.permute.xlu0 %2191  ;;  %v589_v44 = vmul.f32 %v566_v13, %v546_v4  ;;  %v654_v45 = vmul.f32 %v631_v14, %v611_v5  ;;  %v2041_v47 = vcombine.low %v2537_v46, %v2365_v11  ;;  %v691_v13 = vrot.slane %v2546_v57, %v2456_v53 }
  0x97   : > { %v3471_v28 = vunpack.i.h.bf16 %v2571_v31  ;;  %v2198_v21 = vunpack.i.l.bf16 %v2571_v31  ;;  %v2194_v10 = vunpack.i.h.bf16 %v2192_v43  ;;  %v2193_v8 = vunpack.i.l.bf16 %v2192_v43  ;;  %830 = vmatpush1.bf16.msra.mxu1 %v724_v61 }
  0x98   : > { %v732_v9 = vpack.c.bf16 %v654_v45, %v589_v44  ;;  %v458_v14 = vmul.f32 %v429_v12, %v419_v20  ;;  %v588_v46 = vmul.f32 %v562_v22, %v547_v37 }
  0x99   : > { %v612_v63 = vsel %vm607_vm2, %v2193_v8, %v2188_v17  ;;  %v484_v4 = vsel %vm478_vm0, %v2198_v21, %v2178_v29  ;;  %v485_v61 = vsel %vm478_vm0, %v3471_v28, %v2198_v21  ;;  %v613_v5 = vsel %vm607_vm2, %v2194_v10, %v2193_v8  ;;  %v2601_v29 = vld [vmem:[%s2343_s14] sm:$0xff] }
  0x9a   : > { %v2593_v43 = vpop.permute.xlu1 %2201  ;;  %831 = vmatprep.subr.bf16.mxu1 %v732_v9  ;;  %v2595_v11 = vpop.permute.xlu0 %409  ;;  %v523_v12 = vmul.f32 %v494_v15, %v484_v4  ;;  %v653_v20 = vmul.f32 %v627_v24, %v612_v63  ;;  %v687_v9 = vrot.slane %v2546_v57, %v2459_v54  ;;  %v522_v28 = vmul.f32 %v490_v33, %v485_v61 }
  0x9b   : > { %v2204_v17 = vunpack.i.h.bf16 %v2593_v43  ;;  %v2203_v21 = vunpack.i.l.bf16 %v2593_v43  ;;  %v420_v8 = vsel %vm413_vm1, %v2595_v11, %v2174_v41  ;;  %v652_v22 = vmul.f32 %v623_v36, %v613_v5  ;;  %v2724_v43 = vld [vmem:[%s3449_s1] sm:$0xf] }
  0x9c   : > { %v457_v44 = vmul.f32 %v425_v32, %v420_v8  ;;  %v723_v45 = vpack.c.bf16 %v523_v12, %v458_v14  ;;  %v731_v39 = vpack.c.bf16 %v653_v20, %v588_v46  ;;  %v643_v24 = vrot.slane %v2482_v60, %v2553_v27 }
  0x9d   : > { %v548_v15 = vsel %vm478_vm0, %v2203_v21, %v2184_v58  ;;  %v2040_v41 = vcombine.high %v2601_v29, %v2381_v19  ;;  %v549_v32 = vsel %vm478_vm0, %v2204_v17, %v2203_v21  ;;  %v514_v12 = vrot.slane %v2453_v52, %v2553_v27 }
  0x9e   : > { %v2623_v37 = vpop.permute.xlu1 %2211  ;;  %788 = vmatprep.subr.bf16.mxu0 %v723_v45  ;;  %v2625_v33 = vpop.permute.xlu0 %2206  ;;  %832 = vmatpush1.bf16.msra.mxu1 %v731_v39  ;;  %v722_v58 = vpack.c.bf16 %v522_v28, %v457_v44  ;;  %v587_v36 = vmul.f32 %v558_v25, %v548_v15  ;;  %v2048_v28 = vcombine.low %v2346_v0, %v2346_v0  ;;  %v2662_v15 = vsub.s32 4, %v2443_v49 }
  0x9f   : > { %v2214_v63 = vunpack.i.h.bf16 %v2623_v37  ;;  %v2213_v14 = vunpack.i.l.bf16 %v2623_v37  ;;  %v2209_v4 = vunpack.i.h.bf16 %v2625_v33  ;;  %v2208_v61 = vunpack.i.l.bf16 %v2625_v33  ;;  %833 = vmatprep.subr.bf16.mxu1 %v2042_v3 }
  0xa0   : > { %789 = vmatpush1.bf16.msra.mxu0 %v722_v58  ;;  %v730_v5 = vpack.c.bf16 %v652_v22, %v587_v36  ;;  %v683_v25 = vrot.slane %v2546_v57, %v2494_v6  ;;  %v586_v20 = vmul.f32 %v554_v40, %v549_v32  ;;  %v2049_v32 = vcombine.high %v2346_v0, %v2346_v0 }
  0xa1   : > { %v614_v39 = vsel %vm607_vm2, %v2213_v14, %v2194_v10  ;;  %v675_v3 = vsel %vm607_vm2, %v2208_v61, %v2209_v4  ;;  %v676_v46 = vsel %vm607_vm2, %v2214_v63, %v2208_v61  ;;  %v3494_v58 = vunpack.c.h.bf16 %v2352_v2 }
  0xa2   : > { %v408_v21 = vpop.permute.xlu1 %407  ;;  %v2653_v8 = vpop.permute.xlu0 %2216  ;;  %790 = vmatprep.subr.bf16.mxu0 %v730_v5  ;;  %834 = vmatpush1.bf16.msra.mxu1 %v2041_v47  ;;  %v651_v10 = vmul.f32 %v619_v42, %v614_v39  ;;  %v718_v44 = vmul.f32 %v695_v23, %v675_v3  ;;  %v717_v45 = vmul.f32 %v691_v13, %v676_v46  ;;  %v3495_v36 = vunpack.c.l.bf16 %v2352_v2 }
  0xa3   : > { %v2219_v22 = vunpack.i.h.bf16 %v2653_v8  ;;  %v2218_v40 = vunpack.i.l.bf16 %v2653_v8  ;;  %v2673_v23 = vsub.s32 5, %v2443_v49  ;;  %v578_v0 = vrot.slane %v2477_v59, %v2553_v27 }
  0xa4   : > { %v729_v47 = vpack.c.bf16 %v651_v10, %v586_v20  ;;  %v746_v42 = vpack.c.bf16 %v3494_v58, %v718_v44  ;;  %v745_v61 = vpack.c.bf16 %v3495_v36, %v717_v45  ;;  %v2039_v39 = vcombine.low %v2601_v29, %v2381_v19 }
  0xa5   : > { %v677_v13 = vsel %vm607_vm2, %v2218_v40, %v2214_v63  ;;  %v678_v5 = vsel %vm607_vm2, %v2219_v22, %v2218_v40  ;;  %v441_v49 = vrot.slane %v2464_v55, %v2662_v15  ;;  %v774_v46 = vsel %vm766_vm3, %v2048_v28, 0 }
  0xa6   : > { %v2685_v3 = vpop.permute.xlu1 %603  ;;  %v2222_v2 = vpop.permute.xlu0 %2221  ;;  %791 = vmatpush1.bf16.msra.mxu0 %v729_v47  ;;  %835 = vmatprep.subr.bf16.mxu1 %v746_v42  ;;  %v716_v63 = vmul.f32 %v687_v9, %v677_v13  ;;  %v715_v20 = vmul.f32 %v683_v25, %v678_v5  ;;  %v414_v10 = vsel %vm413_vm1, %v408_v21, %v2595_v11  ;;  %v3496_v9 = vunpack.c.h.bf16 %v2359_v7 }
  0xa7   : > { %v2224_v44 = vunpack.i.h.bf16 %v2222_v2  ;;  %v2223_v45 = vunpack.i.l.bf16 %v2222_v2  ;;  %836 = vmatpush1.bf16.msra.mxu1 %v745_v61  ;;  %792 = vmatprep.subr.bf16.mxu0 %v2040_v41  ;;  %v506_v19 = vrot.slane %v2453_v52, %v2662_v15  ;;  %v445_v29 = vrot.slane %v2464_v55, %v2673_v23 }
  0xa8   : > { %2055 = vmatprep.subr.msk.bf16.mxu1 %vm766_vm3, %v2049_v32  ;;  %v744_v28 = vpack.c.bf16 %v3496_v9, %v716_v63  ;;  %v3497_v25 = vunpack.i.h.bf16 %v2571_v31  ;;  %v2047_v41 = vcombine.high %v2349_v1, %v2349_v1  ;;  %v2046_v40 = vcombine.low %v2349_v1, %v2349_v1 }
  0xa9   : > { %v510_v47 = vrot.slane %v2453_v52, %v2673_v23  ;;  %v3498_v32 = vrot.slane %v2464_v55, %v2553_v27  ;;  %v543_v31 = vsel %vm478_vm0, %v2224_v44, %v2204_v17  ;;  %v3499_v13 = vunpack.c.l.bf16 %v2359_v7 }
  0xaa   : > { %v479_v11 = vsel %vm478_vm0, %v2223_v45, %v3497_v25  ;;  %v2227_v36 = vpop.permute.xlu1 %2226  ;;  %v406_v61 = vpop.permute.xlu0 %405  ;;  %793 = vmatpush1.bf16.msra.mxu0 %v2039_v39  ;;  %v574_v17 = vrot.slane %v2477_v59, %v2673_v23  ;;  %v608_v7 = vsel %vm607_vm2, %v2685_v3, %v2213_v14  ;;  %v3472_v39 = vmov 0.0  }
  0xab   : > { %v463_v58 = vmul.f32 %v3498_v32, %v414_v10  ;;  %v528_v42 = vmul.f32 %v514_v12, %v479_v11  ;;  %v743_v5 = vpack.c.bf16 %v3499_v13, %v715_v20  ;;  %v2229_v1 = vunpack.i.h.bf16 %v2227_v36  ;;  %794 = vmatprep.subr.bf16.mxu0 %v744_v28  ;;  %838 = vmatpush1.bf16.msra.mxu1 %v774_v46 }
  0xac   : > { %v2228_v2 = vunpack.i.l.bf16 %v2227_v36  ;;  %v415_v52 = vsel %vm413_vm1, %v406_v61, %v408_v21  ;;  %2105 = vmatprep.subr.bf16.mxu1 %v3472_v39  ;;  %v592_v63 = vmul.f32 %v578_v0, %v543_v31  ;;  %v3500_v20 = vunpack.i.h.bf16 %v2505_v16 }
  0xad   : > { %v462_v12 = vmul.f32 %v445_v29, %v415_v52  ;;  %v728_v21 = vpack.c.bf16 %v528_v42, %v463_v58  ;;  %v544_v37 = vsel %vm478_vm0, %v2229_v1, %v2224_v44  ;;  %v635_v14 = vrot.slane %v2482_v60, %v2662_v15 }
  0xae   : > { %v480_v46 = vsel %vm478_vm0, %v2228_v2, %v2223_v45  ;;  %v481_v10 = vsel %vm478_vm0, %v3500_v20, %v2228_v2  ;;  %v2232_v29 = vpop.permute.xlu0 %2231  ;;  %795 = vmatpush1.bf16.msra.mxu0 %v743_v5  ;;  %2056 = vmatmul.mubr.msk.bf16.vlgmr.msra.gmra.mrb[0].mxu1 %vm762_vm4, %v2724_v43  ;;  %v768_v0 = vsel %vm766_vm3, %v2046_v40, 0  ;;  %v639_v16 = vrot.slane %v2482_v60, %v2673_v23  ;;  %v667_v13 = vpop.permute.xlu1 %666  ;;  %v2793_v5 = vld [vmem:[%s2343_s14 + $0x10] sm:$0xff] }
  0xaf   : > { %v527_v45 = vmul.f32 %v510_v47, %v480_v46  ;;  %v657_v9 = vmul.f32 %v643_v24, %v608_v7  ;;  %v3501_v44 = vunpack.i.h.bf16 %v2466_v56  ;;  %v2234_v25 = vunpack.i.h.bf16 %v2232_v29  ;;  %2106 = vmatpush3.bf16.msra.mxu1 %v728_v21  ;;  %2053 = vmatprep.subr.msk.bf16.mxu0 %vm766_vm3, %v2047_v41  ;;  %v2759_v47 = vld [vmem:[%s2343_s14 + $0x18] sm:$0xf]  ;;  %3505 = vst [vmem:[#allocation4_spill] sm:$0xff] %v2793_v5 }
  0xb0   : > { %v2233_v11 = vunpack.i.l.bf16 %v2232_v29  ;;  %v526_v32 = vmul.f32 %v506_v19, %v481_v10  ;;  %2107 = vmatprep.subr.bf16.mxu1 %v3472_v39  ;;  %3502 = vst [vmem:[#allocation3_spill] sm:$0xff] %v2759_v47  ;;  %v591_v58 = vmul.f32 %v574_v17, %v544_v37  ;;  %2115 = vmatprep.mubr.msk.bf16.mxu1 %vm2273_vm5, %v3472_v39  ;;  %v3503_v24 = vunpack.i.h.bf16 %v2541_v62 }
  0xb1   : > { %v416_v28 = vsel %vm413_vm1, %v3501_v44, %v406_v61  ;;  %v727_v40 = vpack.c.bf16 %v527_v45, %v462_v12  ;;  %v707_v56 = vrot.slane %v2546_v57, %v2553_v27  ;;  %v735_v41 = vpack.c.bf16 %v657_v9, %v592_v63 }
  0xb2   : > { %v609_v60 = vsel %vm607_vm2, %v2233_v11, %v2685_v3  ;;  %v610_v19 = vsel %vm607_vm2, %v3503_v24, %v2233_v11  ;;  %v570_v31 = vrot.slane %v2477_v59, %v2662_v15  ;;  %v461_v42 = vmul.f32 %v441_v49, %v416_v28  ;;  %797 = vmatpush1.bf16.msra.mxu0 %v768_v0 }
  0xb3   : > { %v672_v36 = vsel %vm607_vm2, %v2234_v25, %v2219_v22  ;;  %v656_v3 = vmul.f32 %v639_v16, %v609_v60  ;;  %v3504_v62 = vunpack.i.l.bf16 %v2539_v48  ;;  %2108 = vmatpush3.bf16.msra.mxu1 %v735_v41  ;;  %870 = vmatprep.subr.bf16.mxu0 %v727_v40  ;;  %v2045_v55 = vcombine.low %v2759_v47, %v2400_v30 }
  0xb4   : > { %v703_v59 = vrot.slane %v2546_v57, %v2673_v23  ;;  %v726_v8 = vpack.c.bf16 %v526_v32, %v461_v42  ;;  %v673_v22 = vsel %vm607_vm2, %v667_v13, %v2234_v25  ;;  %v655_v49 = vmul.f32 %v635_v14, %v610_v19  ;;  %2109 = vmatprep.subr.bf16.mxu1 %v3472_v39 }
  0xb5   : > { %v545_v61 = vsel %vm478_vm0, %v3504_v62, %v2229_v1  ;;  %v734_v48 = vpack.c.bf16 %v656_v3, %v591_v58  ;;  %v721_v1 = vmul.f32 %v707_v56, %v672_v36  ;;  %2054 = vmatmul.mubr.msk.bf16.vlgmr.msra.gmra.mrb[0].mxu0 %vm762_vm4, %v2724_v43  ;;  %v3506_v30 = vmov 0  }
  0xb6   : > { %v590_v2 = vmul.f32 %v570_v31, %v545_v61  ;;  %871 = vmatpush1.bf16.msra.mxu0 %v726_v8  ;;  %902 = vmatprep.mubr.bf16.mxu0 %v3506_v30  ;;  %v2044_v52 = vcombine.high %v2793_v5, %v2418_v38  ;;  %v720_v17 = vmul.f32 %v703_v59, %v673_v22  ;;  %v3507_v46 = vunpack.c.l.bf16 %v2378_v18 }
  0xb7   : > { %2110 = vmatpush3.bf16.msra.mxu1 %v2045_v55  ;;  %872 = vmatprep.subr.bf16.mxu0 %v734_v48  ;;  %v699_v7 = vrot.slane %v2546_v57, %v2662_v15  ;;  %v2052_v21 = vcombine.low %v2390_v26, %v2390_v26  ;;  %v674_v63 = vsel %vm607_vm2, %v2209_v4, %v667_v13  ;;  %v3508_v57 = vunpack.c.h.bf16 %v2411_v35 }
  0xb8   : > { %v733_v12 = vpack.c.bf16 %v655_v49, %v590_v2  ;;  %2111 = vmatprep.subr.bf16.mxu1 %v3472_v39  ;;  %v749_v20 = vpack.c.bf16 %v3507_v46, %v721_v1  ;;  %v2043_v10 = vcombine.low %v2793_v5, %v2418_v38  ;;  %v2051_v18 = vcombine.high %v2408_v34, %v2408_v34 }
  0xb9   : > { %v748_v37 = vpack.c.bf16 %v3508_v57, %v720_v17  ;;  %v719_v14 = vmul.f32 %v699_v7, %v674_v63  ;;  %v786_v26 = vsel %vm766_vm3, %v2052_v21, 0  ;;  %v2050_v33 = vcombine.low %v2408_v34, %v2408_v34  ;;  %v381_v21 = vld [vmem:[%s3452_s4] sm:$0xff] }
  0xba   : > { %873 = vmatpush1.bf16.msra.mxu0 %v733_v12  ;;  %v3509_v38 = vunpack.c.l.bf16 %v2411_v35 }
  0xbb   : > { %2112 = vmatpush3.bf16.msra.mxu1 %v749_v20  ;;  %874 = vmatprep.subr.bf16.mxu0 %v2044_v52  ;;  %v780_v29 = vsel %vm766_vm3, %v2050_v33, 0 }
  0xbc   : > { %2113 = vmatprep.subr.bf16.mxu1 %v3472_v39  ;;  %v747_v4 = vpack.c.bf16 %v3509_v38, %v719_v14  ;;  %v383_v14 = vld [vmem:[%s3454_s6] sm:$0xff] }
  0xbe   : > { %875 = vmatpush1.bf16.msra.mxu0 %v2043_v10 }
  0xbf   : > { %2114 = vmatpush3.bf16.msra.mxu1 %v786_v26  ;;  %876 = vmatprep.subr.bf16.mxu0 %v748_v37  ;;  %v2831_v16 = vpop.permute.xlu0 %759 }
  0xc2   : > { %877 = vmatpush1.bf16.msra.mxu0 %v747_v4  ;;  %2116 = vmatmul.mubr.msk.bf16.vlgmr.msra.gmra.mrb[4].mxu1 %vm762_vm4, %v2724_v43 }
  0xc3   : > { %2057 = vmatprep.subr.msk.bf16.mxu0 %vm766_vm3, %v2051_v18  ;;  %1619 = vmatprep.mubr.bf16.mxu1 %v3506_v30 }
  0xc6   : > { %879 = vmatpush1.bf16.msra.mxu0 %v780_v29 }
  0xc9   : > { %2058 = vmatmul.mubr.msk.bf16.vlgmr.msra.gmra.mrb[4].mxu0 %vm762_vm4, %v2724_v43 }
  0xca   : > { %1578 = vmatprep.mubr.bf16.mxu0 %v3506_v30 }
 0x181   : > { %v863_v34 = vpop.f32.mrb[0].mxu1 }
 0x182   : > { %v865_v0 = vpop.f32.mrb[1].mxu1  ;;  %v864_v44 = vadd.f32 %v863_v34, %v2831_v16 }
 0x183   : > { %v867_v35 = vpop.f32.mrb[2].mxu1  ;;  %v866_v13 = vadd.f32 %v865_v0, %v2831_v16 }
 0x184   : > { %v868_v45 = vpop.f32.mrb[3].mxu1  ;;  %v953_v58 = vmax.f32 %v864_v44, 0.0  ;;  %v2995_v35 = vld [vmem:[%s3456_s8] sm:$0xff] }
 0x185   : > { %v954_v59 = vmax.f32 %v866_v13, 0.0  ;;  %v3000_v45 = vld [vmem:[%s3456_s8 + $0x7] sm:$0xff]  ;;  %v994_v44 = vrot.slane %v2995_v35, %v2459_v54 }
 0x186   : > { %v2841_v43 = vmin.f32 %v953_v58, 6.0 }
 0x187   : > { %v2879_v8 = vmin.f32 %v954_v59, 6.0 }
 0x188   : > { %v822_v9 = vpop.f32.mrb[0].mxu0 }
 0x189   : > { %v823_v28 = vadd.f32 %v822_v9, %v2831_v16  ;;  %v824_v25 = vpop.f32.mrb[1].mxu0 }
 0x18a   : > { %v826_v11 = vpop.f32.mrb[2].mxu0  ;;  %v825_v62 = vadd.f32 %v824_v25, %v2831_v16 }
 0x18b   : > { %v951_v32 = vmax.f32 %v823_v28, 0.0  ;;  %v827_v40 = vpop.f32.mrb[3].mxu0  ;;  %v1058_v28 = vrot.slane %v3000_v45, %v2459_v54 }
 0x18c   : > { %v952_v61 = vmax.f32 %v825_v62, 0.0  ;;  %v1062_v40 = vrot.slane %v3000_v45, %v2456_v53 }
 0x18d   : > { %v2835_v56 = vmin.f32 %v951_v32, 6.0 }
 0x18e   : > { %v2869_v55 = vmin.f32 %v952_v61, 6.0 }
 0x18f   : > { %1029 = vrot.lane.b32.xlu0 %v2835_v56, %s2269_s16  ;;  %965 = vrot.lane.b32.xlu1 %v2835_v56, %s2268_s15 }
 0x193   : > { %969 = vrot.lane.b32.xlu0 %v2841_v43, %s2268_s15  ;;  %1033 = vrot.lane.b32.xlu1 %v2841_v43, %s2269_s16 }
 0x195   : > { %v945_v60 = vpop.f32.mrb[4].mxu1 }
 0x196   : > { %v2117_v24 = vpop.f32.mrb[5].mxu1  ;;  %v946_v22 = vadd.f32 %v945_v60, %v2831_v16  ;;  %v1066_v60 = vrot.slane %v3000_v45, %v2448_v51 }
 0x197   : > { %1093 = vrot.lane.b32.xlu0 %v2835_v56, %s2274_s13  ;;  %1162 = vrot.lane.b32.xlu1 %v2841_v43, %s2270_s17  ;;  %v948_v19 = vpop.f32.mrb[6].mxu1 }
 0x198   : > { %v2118_v41 = vpop.f32.mrb[7].mxu1  ;;  %v957_v49 = vmax.f32 %v946_v22, 0.0 }
 0x19a   : > { %v2906_v48 = vmin.f32 %v957_v49, 6.0 }
 0x19b   : > { %1158 = vrot.lane.b32.xlu0 %v2835_v56, %s2270_s17  ;;  %1226 = vrot.lane.b32.xlu1 %v2841_v43, %s2275_s18 }
 0x19c   : > { %v904_v31 = vpop.f32.mrb[4].mxu0  ;;  %3510 = vst [vmem:[#allocation5_spill] sm:$0xff] %v2906_v48 }
 0x19d   : > { %v906_v42 = vpop.f32.mrb[5].mxu0  ;;  %v905_v1 = vadd.f32 %v904_v31, %v2831_v16  ;;  %v1002_v31 = vrot.slane %v2995_v35, %v2448_v51 }
 0x19e   : > { %v908_v36 = vpop.f32.mrb[6].mxu0  ;;  %v907_v17 = vadd.f32 %v906_v42, %v2831_v16  ;;  %v998_v42 = vrot.slane %v2995_v35, %v2456_v53 }
 0x19f   : > { %1097 = vrot.lane.b32.xlu0 %v2841_v43, %s2274_s13  ;;  %1287 = vrot.lane.b32.xlu1 %v2835_v56, %s2276_s19  ;;  %v909_v3 = vpop.f32.mrb[7].mxu0  ;;  %v955_v2 = vmax.f32 %v905_v1, 0.0 }
 0x1a0   : > { %v956_v7 = vmax.f32 %v907_v17, 0.0 }
 0x1a1   : > { %v2917_v52 = vmin.f32 %v955_v2, 6.0 }
 0x1a2   : > { %v2940_v12 = vmin.f32 %v956_v7, 6.0 }
 0x1a3   : > { %1222 = vrot.lane.b32.xlu0 %v2835_v56, %s2275_s18  ;;  %1417 = vrot.lane.b32.xlu1 %v2835_v56, %s2277_s20  ;;  %3511 = vst [vmem:[#allocation6_spill] sm:$0xff] %v2917_v52 }
 0x1a4   : > { %3512 = vst [vmem:[#allocation7_spill] sm:$0xff] %v2940_v12 }
 0x1a7   : > { %1291 = vrot.lane.b32.xlu0 %v2841_v43, %s2276_s19  ;;  %1421 = vrot.lane.b32.xlu1 %v2841_v43, %s2277_s20 }
 0x1ab   : > { %1356 = vrot.lane.b32.xlu0 %v2841_v43, %s2278_s21  ;;  %967 = vrot.lane.b32.xlu1 %v2869_v55, %s2268_s15 }
 0x1af   : > { %1352 = vrot.lane.b32.xlu0 %v2835_v56, %s2278_s21  ;;  %1031 = vrot.lane.b32.xlu1 %v2869_v55, %s2269_s16 }
 0x1b3   : > { %1035 = vrot.lane.b32.xlu0 %v2879_v8, %s2269_s16  ;;  %971 = vrot.lane.b32.xlu1 %v2879_v8, %s2268_s15 }
 0x1b7   : > { %1164 = vrot.lane.b32.xlu0 %v2879_v8, %s2270_s17  ;;  %1095 = vrot.lane.b32.xlu1 %v2869_v55, %s2274_s13 }
 0x1bb   : > { %1224 = vrot.lane.b32.xlu0 %v2869_v55, %s2275_s18  ;;  %1160 = vrot.lane.b32.xlu1 %v2869_v55, %s2270_s17 }
 0x1bf   : > { %1293 = vrot.lane.b32.xlu0 %v2879_v8, %s2276_s19  ;;  %1099 = vrot.lane.b32.xlu1 %v2879_v8, %s2274_s13 }
 0x1c3   : > { %1419 = vrot.lane.b32.xlu0 %v2869_v55, %s2277_s20  ;;  %1228 = vrot.lane.b32.xlu1 %v2879_v8, %s2275_s18 }
 0x1c7   : > { %1423 = vrot.lane.b32.xlu0 %v2879_v8, %s2277_s20  ;;  %1289 = vrot.lane.b32.xlu1 %v2869_v55, %s2276_s19 }
 0x1cb   : > { %977 = vrot.lane.b32.xlu0 %v2906_v48, %s2268_s15  ;;  %1354 = vrot.lane.b32.xlu1 %v2869_v55, %s2278_s21 }
 0x1cf   : > { %1105 = vrot.lane.b32.xlu0 %v2906_v48, %s2274_s13  ;;  %1358 = vrot.lane.b32.xlu1 %v2879_v8, %s2278_s21 }
 0x1d3   : > { %1230 = vrot.lane.b32.xlu0 %v2917_v52, %s2275_s18  ;;  %1041 = vrot.lane.b32.xlu1 %v2906_v48, %s2269_s16 }
 0x1d7   : > { %1360 = vrot.lane.b32.xlu0 %v2917_v52, %s2278_s21  ;;  %1170 = vrot.lane.b32.xlu1 %v2906_v48, %s2270_s17 }
 0x1db   : > { %973 = vrot.lane.b32.xlu0 %v2917_v52, %s2268_s15  ;;  %1295 = vrot.lane.b32.xlu1 %v2917_v52, %s2276_s19 }
 0x1df   : > { %1037 = vrot.lane.b32.xlu0 %v2917_v52, %s2269_s16  ;;  %1425 = vrot.lane.b32.xlu1 %v2917_v52, %s2277_s20 }
 0x1e3   : > { %1101 = vrot.lane.b32.xlu0 %v2917_v52, %s2274_s13  ;;  %1234 = vrot.lane.b32.xlu1 %v2906_v48, %s2275_s18 }
 0x1e7   : > { %1166 = vrot.lane.b32.xlu0 %v2917_v52, %s2270_s17  ;;  %975 = vrot.lane.b32.xlu1 %v2940_v12, %s2268_s15 }
 0x1eb   : > { %1232 = vrot.lane.b32.xlu0 %v2940_v12, %s2275_s18  ;;  %1039 = vrot.lane.b32.xlu1 %v2940_v12, %s2269_s16 }
 0x1ef   : > { %1297 = vrot.lane.b32.xlu0 %v2940_v12, %s2276_s19  ;;  %1103 = vrot.lane.b32.xlu1 %v2940_v12, %s2274_s13 }
 0x1f3   : > { %1362 = vrot.lane.b32.xlu0 %v2940_v12, %s2278_s21  ;;  %1168 = vrot.lane.b32.xlu1 %v2940_v12, %s2270_s17 }
 0x1f7   : > { %1427 = vrot.lane.b32.xlu0 %v2940_v12, %s2277_s20  ;;  %1299 = vrot.lane.b32.xlu1 %v2906_v48, %s2276_s19 }
 0x1fb   : > { %1519 = vperm.xlu0 %2235, %v381_v21   ;;  %1364 = vrot.lane.b32.xlu1 %v2906_v48, %s2278_s21 }
 0x1ff   : > { %1429 = vrot.lane.b32.xlu1 %v2906_v48, %s2277_s20 }
 0x201   : > { %v2969_v63 = vpop.permute.xlu0 %1029  ;;  %v2971_v46 = vpop.permute.xlu1 %965 }
 0x203   : > { %1732 = vperm.xlu1 %2236, %v383_v14  }
 0x205   : > { %v970_v20 = vpop.permute.xlu0 %969  ;;  %v1034_v10 = vpop.permute.xlu1 %1033 }
 0x209   : > { %v2973_v57 = vpop.permute.xlu0 %1093  ;;  %v1163_v37 = vpop.permute.xlu1 %1162 }
 0x20d   : > { %v2978_v26 = vpop.permute.xlu0 %1158  ;;  %v2980_v18 = vpop.permute.xlu1 %1226 }
 0x211   : > { %v1098_v33 = vpop.permute.xlu0 %1097  ;;  %v2982_v38 = vpop.permute.xlu1 %1287 }
 0x215   : > { %v2984_v4 = vpop.permute.xlu0 %1222  ;;  %v2986_v29 = vpop.permute.xlu1 %1417 }
 0x216   : > { %3513 = vst [vmem:[#allocation8_spill] sm:$0xff] %v2984_v4 }
 0x219   : > { %v2988_v34 = vpop.permute.xlu0 %1291  ;;  %v2990_v0 = vpop.permute.xlu1 %1421 }
 0x21d   : > { %v3002_v16 = vpop.permute.xlu0 %1356  ;;  %v968_v9 = vpop.permute.xlu1 %967 }
 0x21e   : > { %v984_v25 = vsel %vm413_vm1, %v2971_v46, %v968_v9  ;;  %v983_v36 = vsel %vm413_vm1, %v968_v9, %v970_v20  ;;  %v3045_v9 = vld [vmem:[%s3456_s8 + $0x15] sm:$0xff] }
 0x21f   : > { %v1023_v24 = vmul.f32 %v994_v44, %v984_v25  ;;  %v1024_v2 = vmul.f32 %v998_v42, %v983_v36  ;;  %v1195_v25 = vrot.slane %v3045_v9, %v2448_v51 }
 0x221   : > { %v3011_v11 = vpop.permute.xlu0 %1352  ;;  %v1032_v32 = vpop.permute.xlu1 %1031 }
 0x222   : > { %v1048_v58 = vsel %vm478_vm0, %v2969_v63, %v1032_v32  ;;  %v1047_v19 = vsel %vm478_vm0, %v1032_v32, %v1034_v10 }
 0x223   : > { %v1087_v41 = vmul.f32 %v1058_v28, %v1048_v58  ;;  %v1088_v13 = vmul.f32 %v1062_v40, %v1047_v19  ;;  %v1191_v28 = vrot.slane %v3045_v9, %v2456_v53 }
 0x225   : > { %v3028_v3 = vpop.permute.xlu0 %1035  ;;  %v3030_v62 = vpop.permute.xlu1 %971  ;;  %v1483_v61 = vpack.c.bf16 %v1087_v41, %v1023_v24  ;;  %v1484_v14 = vpack.c.bf16 %v1088_v13, %v1024_v2 }
 0x226   : > { %3514 = vst [vmem:[#allocation9_spill] sm:$0xff] %v3028_v3  ;;  %3515 = vst [vmem:[#allocation10_spill] sm:$0xff] %v3030_v62  ;;  %v1046_v59 = vsel %vm478_vm0, %v1034_v10, %v3028_v3  ;;  %v982_v22 = vsel %vm413_vm1, %v970_v20, %v3030_v62  ;;  %v3050_v20 = vld [vmem:[%s3456_s8 + $0xe] sm:$0xff] }
 0x227   : > { %v1089_v49 = vmul.f32 %v1066_v60, %v1046_v59  ;;  %v1025_v1 = vmul.f32 %v1002_v31, %v982_v22  ;;  %1546 = vmatprep.subr.bf16.mxu0 %v1483_v61  ;;  %3517 = vst [vmem:[#allocation12_spill] sm:$0xff] %v3050_v20  ;;  %v1131_v40 = vrot.slane %v3050_v20, %v2448_v51 }
 0x228   : > { %v1127_v60 = vrot.slane %v3050_v20, %v2456_v53 }
 0x229   : > { %v3038_v17 = vpop.permute.xlu0 %1164  ;;  %v3040_v7 = vpop.permute.xlu1 %1095  ;;  %v1485_v21 = vpack.c.bf16 %v1089_v49, %v1025_v1 }
 0x22a   : > { %3516 = vst [vmem:[#allocation11_spill] sm:$0xff] %v3038_v17  ;;  %v1175_v58 = vsel %vm607_vm2, %v1163_v37, %v3038_v17  ;;  %v1112_v24 = vsel %vm1107_vm6, %v3040_v7, %v1098_v33  ;;  %v1113_v48 = vsel %vm1107_vm6, %v2973_v57, %v3040_v7 }
 0x22b   : > { %1587 = vmatprep.subr.bf16.mxu1 %v1485_v21  ;;  %v1218_v36 = vmul.f32 %v1195_v25, %v1175_v58  ;;  %v1153_v13 = vmul.f32 %v1127_v60, %v1112_v24  ;;  %v3085_v21 = vld [vmem:[%s3456_s8 + $0x23] sm:$0xff]  ;;  %v3109_v58 = vld [vmem:[%s3456_s8 + $0x31] sm:$0xff]  ;;  %v1187_v24 = vrot.slane %v3045_v9, %v2459_v54 }
 0x22c   : > { %1588 = vmatpush1.bf16.msra.mxu1 %v1484_v14  ;;  %3519 = vst [vmem:[#allocation14_spill] sm:$0xff] %v3085_v21  ;;  %v3095_v14 = vld [vmem:[%s3456_s8 + $0x38] sm:$0xff]  ;;  %v1252_v60 = vrot.slane %v3085_v21, %v2459_v54  ;;  %v1260_v47 = vrot.slane %v3085_v21, %v2448_v51  ;;  %v1386_v52 = vrot.slane %v3109_v58, %v2456_v53 }
 0x22d   : > { %v1225_v10 = vpop.permute.xlu0 %1224  ;;  %v1161_v44 = vpop.permute.xlu1 %1160 }
 0x22e   : > { %v1176_v32 = vsel %vm607_vm2, %v1161_v44, %v1163_v37  ;;  %v1241_v12 = vsel %vm1236_vm7, %v1225_v10, %v2980_v18 }
 0x22f   : > { %v1217_v31 = vmul.f32 %v1191_v28, %v1176_v32  ;;  %v1123_v32 = vrot.slane %v3050_v20, %v2459_v54  ;;  %v1281_v27 = vmul.f32 %v1252_v60, %v1241_v12 }
 0x231   : > { %v3069_v19 = vpop.permute.xlu0 %1293  ;;  %v3071_v41 = vpop.permute.xlu1 %1099  ;;  %v1491_v49 = vpack.c.bf16 %v1217_v31, %v1153_v13  ;;  %v1382_v31 = vrot.slane %v3109_v58, %v2459_v54  ;;  %v1152_v3 = vmul.f32 %v1123_v32, %v1113_v48  ;;  %v1455_v48 = vrot.slane %v3095_v14, %v2448_v51 }
 0x232   : > { %3518 = vst [vmem:[#allocation13_spill] sm:$0xff] %v3071_v41  ;;  %v1111_v42 = vsel %vm1107_vm6, %v1098_v33, %v3071_v41  ;;  %v3090_v33 = vld [vmem:[%s3456_s8 + $0x2a] sm:$0xff] }
 0x233   : > { %v1154_v61 = vmul.f32 %v1131_v40, %v1111_v42  ;;  %v1248_v40 = vrot.slane %v3085_v21, %v2494_v6  ;;  %v1054_v42 = vrot.slane %v3000_v45, %v2494_v6 }
 0x235   : > { %v3076_v37 = vpop.permute.xlu0 %1419  ;;  %v1229_v59 = vpop.permute.xlu1 %1228  ;;  %v1492_v22 = vpack.c.bf16 %v1218_v36, %v1154_v61  ;;  %v1256_v61 = vrot.slane %v3085_v21, %v2456_v53  ;;  %v990_v36 = vrot.slane %v2995_v35, %v2494_v6  ;;  %v1390_v21 = vrot.slane %v3109_v58, %v2448_v51 }
 0x236   : > { %v1240_v13 = vsel %vm1236_vm7, %v2980_v18, %v1229_v59 }
 0x237   : > { %1589 = vmatprep.subr.bf16.mxu1 %v1492_v22  ;;  %v1177_v22 = vsel %vm607_vm2, %v2978_v26, %v1161_v44  ;;  %v1119_v44 = vrot.slane %v3050_v20, %v2494_v6  ;;  %v1282_v30 = vmul.f32 %v1256_v61, %v1240_v13 }
 0x238   : > { %1590 = vmatpush1.bf16.msra.mxu1 %v1491_v49  ;;  %v1216_v20 = vmul.f32 %v1187_v24, %v1177_v22 }
 0x239   : > { %v3078_v1 = vpop.permute.xlu0 %1423  ;;  %v3080_v2 = vpop.permute.xlu1 %1289  ;;  %v1498_v12 = vpack.c.bf16 %v1282_v30, %v2841_v43  ;;  %v1497_v43 = vpack.c.bf16 %v1281_v27, %v2869_v55 }
 0x23d   : > { %v3097_v28 = vpop.permute.xlu0 %977  ;;  %v3099_v25 = vpop.permute.xlu1 %1354 }
 0x23e   : > { %3520 = vst [vmem:[#allocation15_spill] sm:$0xff] %v3097_v28  ;;  %v985_v5 = vsel %vm413_vm1, %v3097_v28, %v2971_v46  ;;  %v1242_v46 = vsel %vm1236_vm7, %v2984_v4, %v1225_v10  ;;  %v1183_v28 = vrot.slane %v3045_v9, %v2494_v6  ;;  %v1372_v27 = vsel %vm1366_vm10, %v3011_v11, %v3099_v25 }
 0x23f   : > { %v1022_v62 = vmul.f32 %v990_v36, %v985_v5  ;;  %v1280_v61 = vmul.f32 %v1248_v40, %v1242_v46 }
 0x241   : > { %v3127_v49 = vpop.permute.xlu0 %1105  ;;  %v1359_v39 = vpop.permute.xlu1 %1358 }
 0x242   : > { %v1114_v24 = vsel %vm1107_vm6, %v3127_v49, %v2973_v57 }
 0x245   : > { %v3168_v41 = vpop.permute.xlu0 %1230  ;;  %v3170_v17 = vpop.permute.xlu1 %1041 }
 0x246   : > { %v1239_v7 = vsel %vm1236_vm7, %v1229_v59, %v3168_v41  ;;  %v1049_v18 = vsel %vm478_vm0, %v3170_v17, %v2969_v63  ;;  %v1325_v59 = vrot.slane %v3090_v33, %v2448_v51  ;;  %v1371_v63 = vsel %vm1366_vm10, %v3099_v25, %v3002_v16 }
 0x247   : > { %v1283_v10 = vmul.f32 %v1260_v47, %v1239_v7  ;;  %v1086_v4 = vmul.f32 %v1054_v42, %v1049_v18  ;;  %v1435_v51 = vsel %vm1431_vm9, %v2990_v0, %v3078_v1  ;;  %v1411_v55 = vmul.f32 %v1382_v31, %v1371_v63 }
 0x248   : > { %v3521_v42 = vrot.slane %v3095_v14, %v2456_v53  ;;  %v3523_v31 = vrot.slane %v3090_v33, %v2459_v54  ;;  %v3527_v63 = vrot.slane %v3090_v33, %v2494_v6 }
 0x249   : > { %v1482_v13 = vpack.c.bf16 %v1086_v4, %v1022_v62  ;;  %v3189_v22 = vpop.permute.xlu0 %1360  ;;  %v3191_v5 = vpop.permute.xlu1 %1170  ;;  %v1499_v47 = vpack.c.bf16 %v1283_v10, %v2879_v8  ;;  %v1490_v4 = vpack.c.bf16 %v1216_v20, %v1152_v3  ;;  %v1151_v62 = vmul.f32 %v1119_v44, %v1114_v24 }
 0x24a   : > { %v1178_v57 = vsel %vm607_vm2, %v3191_v5, %v2978_v26  ;;  %v1370_v8 = vsel %vm1366_vm10, %v3002_v16, %v1359_v39  ;;  %v1369_v30 = vsel %vm1366_vm10, %v1359_v39, %v3189_v22  ;;  %v1305_v26 = vsel %vm1301_vm8, %v2988_v34, %v3069_v19 }
 0x24b   : > { %v1215_v32 = vmul.f32 %v1183_v28, %v1178_v57  ;;  %1547 = vmatpush1.bf16.msra.mxu0 %v1482_v13  ;;  %1591 = vmatprep.subr.bf16.mxu1 %v1499_v47  ;;  %v1437_v16 = vsel %vm1431_vm9, %v2986_v29, %v3076_v37  ;;  %v1306_v3 = vsel %vm1301_vm8, %v3080_v2, %v2988_v34 }
 0x24c   : > { %1548 = vmatprep.subr.bf16.mxu0 %v1490_v4  ;;  %1592 = vmatpush1.bf16.msra.mxu1 %v1498_v12  ;;  %v1412_v40 = vmul.f32 %v1386_v52, %v1370_v8  ;;  %v1436_v34 = vsel %vm1431_vm9, %v3076_v37, %v2990_v0  ;;  %v1477_v36 = vmul.f32 %v3521_v42, %v1435_v51 }
 0x24d   : > { %v1489_v39 = vpack.c.bf16 %v1215_v32, %v1151_v62  ;;  %v974_v20 = vpop.permute.xlu0 %973  ;;  %v3228_v28 = vpop.permute.xlu1 %1295  ;;  %v1413_v44 = vmul.f32 %v1390_v21, %v1369_v30  ;;  %v3522_v52 = vrot.slane %v3090_v33, %v2456_v53  ;;  %v1346_v0 = vmul.f32 %v3523_v31, %v1306_v3 }
 0x24e   : > { %v1304_v60 = vsel %vm1301_vm8, %v3069_v19, %v3228_v28  ;;  %v1307_v19 = vsel %vm1301_vm8, %v2982_v38, %v3080_v2  ;;  %v1496_v37 = vpack.c.bf16 %v1280_v61, %v2835_v56  ;;  %v3524_v21 = vrot.slane %v3095_v14, %v2494_v6 }
 0x24f   : > { %v1348_v46 = vmul.f32 %v1325_v59, %v1304_v60  ;;  %1549 = vmatpush1.bf16.msra.mxu0 %v1489_v39  ;;  %v1347_v25 = vmul.f32 %v3522_v52, %v1305_v26  ;;  %v3525_v53 = vrot.slane %v3109_v58, %v2494_v6  ;;  %v3526_v2 = vrot.slane %v3095_v14, %v2459_v54  ;;  %v3280_v6 = vld [vmem:[%s3451_s3] sm:$0xf] }
 0x250   : > { %1550 = vmatprep.subr.bf16.mxu0 %v1497_v43  ;;  %v1475_v7 = vmul.f32 %v3524_v21, %v1437_v16  ;;  %v1504_v61 = vpack.c.bf16 %v1411_v55, %v1346_v0  ;;  %v1512_v12 = vpack.c.bf16 %v1477_v36, %v1477_v36  ;;  %v1345_v57 = vmul.f32 %v3527_v63, %v1307_v19  ;;  %v3529_v39 = vld [vmem:[#allocation2_spill] sm:$0xff] }
 0x251   : > { %v1410_v18 = vmul.f32 %v3525_v53, %v1372_v27  ;;  %v1038_v10 = vpop.permute.xlu0 %1037  ;;  %v3262_v24 = vpop.permute.xlu1 %1425  ;;  %v1506_v59 = vpack.c.bf16 %v1413_v44, %v1348_v46  ;;  %v1476_v13 = vmul.f32 %v3526_v2, %v1436_v34  ;;  %v1505_v47 = vpack.c.bf16 %v1412_v40, %v1347_v25  ;;  %v3530_v40 = vld [vmem:[#allocation9_spill] sm:$0xff]  ;;  %v3531_v44 = vld [vmem:[#allocation15_spill] sm:$0xff]  ;;  %v3532_v25 = vld [vmem:[#allocation10_spill] sm:$0xff] }
 0x252   : > { %v1434_v56 = vsel %vm1431_vm9, %v3078_v1, %v3262_v24  ;;  %v1510_v51 = vpack.c.bf16 %v1475_v7, %v1475_v7  ;;  %v1532_v1 = vsel %vm766_vm3, %v1512_v12, 0  ;;  %v3528_v26 = vmov 0.0   ;;  %v3534_v2 = vld [vmem:[#allocation12_spill] sm:$0xff] }
 0x253   : > { %v1478_v4 = vmul.f32 %v1455_v48, %v1434_v56  ;;  %1551 = vmatpush1.bf16.msra.mxu0 %v1496_v37  ;;  %1593 = vmatprep.subr.bf16.mxu1 %v1506_v59  ;;  %v1503_v62 = vpack.c.bf16 %v1410_v18, %v1345_v57  ;;  %v1511_v30 = vpack.c.bf16 %v1476_v13, %v1476_v13  ;;  %v3533_v59 = vmov 0  }
 0x254   : > { %1552 = vmatprep.subr.bf16.mxu0 %v1504_v61  ;;  %1594 = vmatpush1.bf16.msra.mxu1 %v1505_v47  ;;  %v1070_v16 = vrot.slane %v3000_v45, %v2662_v15  ;;  %v1010_v3 = vrot.slane %v2995_v35, %v2673_v23  ;;  %v1014_v27 = vrot.slane %v2995_v35, %v3529_v39  ;;  %v1526_v55 = vsel %vm766_vm3, %v1510_v51, 0  ;;  %v3535_v47 = vld [vmem:[#allocation14_spill] sm:$0xff] }
 0x255   : > { %v1513_v54 = vpack.c.bf16 %v1478_v4, %v1478_v4  ;;  %v1102_v8 = vpop.permute.xlu0 %1101  ;;  %v1235_v32 = vpop.permute.xlu1 %1234  ;;  %v1045_v60 = vsel %vm478_vm0, %v3530_v40, %v1038_v10  ;;  %v1074_v34 = vrot.slane %v3000_v45, %v2673_v23  ;;  %v1078_v42 = vrot.slane %v3000_v45, %v3529_v39  ;;  %v3537_v40 = vld [vmem:[#allocation13_spill] sm:$0xff] }
 0x256   : > { %v1006_v36 = vrot.slane %v2995_v35, %v2662_v15  ;;  %v981_v19 = vsel %vm413_vm1, %v3532_v25, %v974_v20  ;;  %v1090_v45 = vmul.f32 %v1070_v16, %v1045_v60  ;;  %v1135_v13 = vrot.slane %v3534_v2, %v2662_v15 }
 0x257   : > { %1553 = vmatpush1.bf16.msra.mxu0 %v1503_v62  ;;  %2062 = vmatprep.subr.msk.bf16.mxu1 %vm766_vm3, %v1513_v54  ;;  %v1272_v56 = vrot.slane %v3535_v47, %v3529_v39  ;;  %v3536_v62 = vld [vmem:[#allocation11_spill] sm:$0xff]  ;;  %v1139_v51 = vrot.slane %v3534_v2, %v2673_v23  ;;  %v1207_v16 = vrot.slane %v3045_v9, %v3529_v39 }
 0x258   : > { %2060 = vmatprep.subr.msk.bf16.mxu0 %vm766_vm3, %v1511_v30  ;;  %1596 = vmatpush1.bf16.msra.mxu1 %v1532_v1  ;;  %v1143_v30 = vrot.slane %v3534_v2, %v3529_v39  ;;  %v1110_v60 = vsel %vm1107_vm6, %v3537_v40, %v1102_v8  ;;  %v1337_v2 = vrot.slane %v3090_v33, %v3529_v39 }
 0x259   : > { %v1167_v48 = vpop.permute.xlu0 %1166  ;;  %v976_v43 = vpop.permute.xlu1 %975  ;;  %2119 = vmatprep.subr.bf16.mxu1 %v3528_v26 }
 0x25a   : > { %v979_v46 = vsel %vm413_vm1, %v976_v43, %v3531_v44  ;;  %v980_v52 = vsel %vm413_vm1, %v974_v20, %v976_v43  ;;  %v1026_v20 = vmul.f32 %v1006_v36, %v981_v19  ;;  %v1174_v54 = vsel %vm607_vm2, %v3536_v62, %v1167_v48 }
 0x25b   : > { %1555 = vmatpush1.bf16.msra.mxu0 %v1526_v55  ;;  %2063 = vmatmul.mubr.msk.bf16.vlgmr.msra.gmra.mrb[8].mxu1 %vm762_vm4, %v3280_v6  ;;  %v1027_v21 = vmul.f32 %v1010_v3, %v980_v52  ;;  %v1028_v7 = vmul.f32 %v1014_v27, %v979_v46  ;;  %v1203_v43 = vrot.slane %v3045_v9, %v2673_v23 }
 0x25c   : > { %2129 = vmatprep.mubr.msk.bf16.mxu1 %vm2273_vm5, %v3528_v26  ;;  %v1486_v4 = vpack.c.bf16 %v1090_v45, %v1026_v20  ;;  %v1264_v3 = vrot.slane %v3535_v47, %v2662_v15  ;;  %v1329_v36 = vrot.slane %v3090_v33, %v2662_v15 }
 0x25d   : > { %v1233_v31 = vpop.permute.xlu0 %1232  ;;  %v1040_v0 = vpop.permute.xlu1 %1039 }
 0x25e   : > { %v1043_v35 = vsel %vm478_vm0, %v1040_v0, %v3170_v17  ;;  %v1044_v37 = vsel %vm478_vm0, %v1038_v10, %v1040_v0  ;;  %2061 = vmatmul.mubr.msk.bf16.vlgmr.msra.gmra.mrb[8].mxu0 %vm762_vm4, %v3280_v6  ;;  %v1199_v17 = vrot.slane %v3045_v9, %v2662_v15  ;;  %v1268_v10 = vrot.slane %v3535_v47, %v2673_v23 }
 0x25f   : > { %v1091_v53 = vmul.f32 %v1074_v34, %v1044_v37  ;;  %v1092_v18 = vmul.f32 %v1078_v42, %v1043_v35  ;;  %1660 = vmatprep.mubr.bf16.mxu0 %v3533_v59  ;;  %v1237_v1 = vsel %vm1236_vm7, %v1233_v31, %v1235_v32  ;;  %v3538_v34 = vld [vmem:[#allocation8_spill] sm:$0xff]  ;;  %v1238_v46 = vsel %vm1236_vm7, %v3168_v41, %v1233_v31 }
 0x260   : > { %v1243_v9 = vsel %vm1236_vm7, %v1235_v32, %v3538_v34  ;;  %v1219_v42 = vmul.f32 %v1199_v17, %v1174_v54  ;;  %v1285_v52 = vmul.f32 %v1268_v10, %v1237_v1  ;;  %v1155_v35 = vmul.f32 %v1135_v13, %v1110_v60  ;;  %v3539_v17 = vld [vmem:[#allocation7_spill] sm:$0xff] }
 0x261   : > { %v1488_v61 = vpack.c.bf16 %v1092_v18, %v1028_v7  ;;  %v1298_v12 = vpop.permute.xlu0 %1297  ;;  %v1104_v63 = vpop.permute.xlu1 %1103  ;;  %v1487_v57 = vpack.c.bf16 %v1091_v53, %v1027_v21  ;;  %v1394_v37 = vrot.slane %v3109_v58, %v2662_v15  ;;  %v1459_v21 = vrot.slane %v3095_v14, %v2662_v15 }
 0x262   : > { %v1108_v27 = vsel %vm1107_vm6, %v1104_v63, %v3127_v49  ;;  %v1109_v55 = vsel %vm1107_vm6, %v1102_v8, %v1104_v63  ;;  %v1333_v41 = vrot.slane %v3090_v33, %v2673_v23  ;;  %v1286_v31 = vmul.f32 %v1272_v56, %v1243_v9  ;;  %v2258_v9 = vld [vmem:[%s2343_s14] sm:$0xff] }
 0x263   : > { %1628 = vmatprep.subr.bf16.mxu0 %v1487_v57  ;;  %2120 = vmatpush3.bf16.msra.mxu1 %v1488_v61  ;;  %v1156_v19 = vmul.f32 %v1139_v51, %v1109_v55  ;;  %v1157_v32 = vmul.f32 %v1143_v30, %v1108_v27  ;;  %v1284_v7 = vmul.f32 %v1264_v3, %v1238_v46  ;;  %v2259_v46 = vld [vmem:[%s2343_s14 + $0x8] sm:$0xff] }
 0x264   : > { %1629 = vmatpush1.bf16.msra.mxu0 %v1486_v4  ;;  %2121 = vmatprep.subr.bf16.mxu1 %v3528_v26  ;;  %v1493_v20 = vpack.c.bf16 %v1219_v42, %v1155_v35  ;;  %v1398_v13 = vrot.slane %v3109_v58, %v2673_v23  ;;  %v1402_v47 = vrot.slane %v3109_v58, %v3529_v39  ;;  %v3543_v35 = vld [vmem:[#allocation3_spill] sm:$0xff] }
 0x265   : > { %v1363_v44 = vpop.permute.xlu0 %1362  ;;  %v1169_v49 = vpop.permute.xlu1 %1168  ;;  %v1501_v10 = vpack.c.bf16 %v1285_v52, %v3539_v17  ;;  %v1463_v58 = vrot.slane %v3095_v14, %v2673_v23  ;;  %v1303_v4 = vsel %vm1301_vm8, %v3228_v28, %v1298_v12  ;;  %v1467_v54 = vrot.slane %v3095_v14, %v3529_v39 }
 0x266   : > { %v1172_v25 = vsel %vm607_vm2, %v1169_v49, %v3191_v5  ;;  %v1173_v8 = vsel %vm607_vm2, %v1167_v48, %v1169_v49  ;;  %v1368_v15 = vsel %vm1366_vm10, %v3189_v22, %v1363_v44  ;;  %v3540_v22 = vld [vmem:[#allocation5_spill] sm:$0xff]  ;;  %v1349_v28 = vmul.f32 %v1329_v36, %v1303_v4 }
 0x267   : > { %v1220_v0 = vmul.f32 %v1203_v43, %v1173_v8  ;;  %v1221_v45 = vmul.f32 %v1207_v16, %v1172_v25  ;;  %v1502_v63 = vpack.c.bf16 %v1286_v31, %v3540_v22  ;;  %v2068_v42 = vcombine.high %v2258_v9, %v2258_v9 }
 0x268   : > { %v2067_v36 = vcombine.low %v2258_v9, %v2258_v9  ;;  %v2070_v52 = vcombine.high %v2259_v46, %v2259_v46  ;;  %v2069_v25 = vcombine.low %v2259_v46, %v2259_v46 }
 0x269   : > { %v1495_v5 = vpack.c.bf16 %v1221_v45, %v1157_v32  ;;  %v1428_v53 = vpop.permute.xlu0 %1427  ;;  %v1300_v18 = vpop.permute.xlu1 %1299  ;;  %v1494_v48 = vpack.c.bf16 %v1220_v0, %v1156_v19  ;;  %v3542_v32 = vld [vmem:[#allocation4_spill] sm:$0xff] }
 0x26a   : > { %v1433_v56 = vsel %vm1431_vm9, %v3262_v24, %v1428_v53  ;;  %v1302_v33 = vsel %vm1301_vm8, %v1298_v12, %v1300_v18  ;;  %v1308_v61 = vsel %vm1301_vm8, %v1300_v18, %v2982_v38  ;;  %v3541_v24 = vld [vmem:[#allocation6_spill] sm:$0xff]  ;;  %v1414_v38 = vmul.f32 %v1394_v37, %v1368_v15 }
 0x26b   : > { %1630 = vmatprep.subr.bf16.mxu0 %v1494_v48  ;;  %2122 = vmatpush3.bf16.msra.mxu1 %v1495_v5  ;;  %v1500_v57 = vpack.c.bf16 %v1284_v7, %v3541_v24  ;;  %v1479_v51 = vmul.f32 %v1459_v21, %v1433_v56  ;;  %v1350_v1 = vmul.f32 %v1333_v41, %v1302_v33  ;;  %v1740_v8 = vsel %vm766_vm3, %v2067_v36, 0 }
 0x26c   : > { %1631 = vmatpush1.bf16.msra.mxu0 %v1493_v20  ;;  %2123 = vmatprep.subr.bf16.mxu1 %v3528_v26  ;;  %v1351_v43 = vmul.f32 %v1337_v2, %v1308_v61  ;;  %v1507_v27 = vpack.c.bf16 %v1414_v38, %v1349_v28  ;;  %v1746_v19 = vsel %vm766_vm3, %v2069_v25, 0  ;;  %v2072_v0 = vcombine.high %v3542_v32, %v3542_v32 }
 0x26d   : > { %1632 = vmatprep.subr.bf16.mxu0 %v1501_v10  ;;  %v1365_v62 = vpop.permute.xlu1 %1364  ;;  %v1514_v40 = vpack.c.bf16 %v1479_v51, %v1479_v51  ;;  %v2071_v45 = vcombine.low %v3542_v32, %v3542_v32  ;;  %v2073_v37 = vcombine.low %v3543_v35, %v3543_v35 }
 0x26e   : > { %v1367_v30 = vsel %vm1366_vm10, %v1363_v44, %v1365_v62  ;;  %v1373_v23 = vsel %vm1366_vm10, %v1365_v62, %v3011_v11 }
 0x26f   : > { %v1415_v16 = vmul.f32 %v1398_v13, %v1367_v30  ;;  %v1416_v3 = vmul.f32 %v1402_v47, %v1373_v23  ;;  %2124 = vmatpush3.bf16.msra.mxu1 %v1502_v63  ;;  %v1538_v50 = vsel %vm766_vm3, %v1514_v40, 0  ;;  %v1752_v21 = vsel %vm766_vm3, %v2071_v45, 0 }
 0x270   : > { %1633 = vmatpush1.bf16.msra.mxu0 %v1500_v57  ;;  %2125 = vmatprep.subr.bf16.mxu1 %v3528_v26  ;;  %v1758_v41 = vsel %vm766_vm3, %v2073_v37, 0 }
 0x271   : > { %v1509_v14 = vpack.c.bf16 %v1416_v3, %v1351_v43  ;;  %v1430_v39 = vpop.permute.xlu1 %1429  ;;  %v1508_v12 = vpack.c.bf16 %v1415_v16, %v1350_v1 }
 0x272   : > { %v1432_v55 = vsel %vm1431_vm9, %v1428_v53, %v1430_v39  ;;  %v1438_v11 = vsel %vm1431_vm9, %v1430_v39, %v2986_v29 }
 0x273   : > { %v1480_v60 = vmul.f32 %v1463_v58, %v1432_v55  ;;  %v1481_v34 = vmul.f32 %v1467_v54, %v1438_v11  ;;  %1634 = vmatprep.subr.bf16.mxu0 %v1508_v12  ;;  %2126 = vmatpush3.bf16.msra.mxu1 %v1509_v14 }
 0x274   : > { %1635 = vmatpush1.bf16.msra.mxu0 %v1507_v27  ;;  %2127 = vmatprep.subr.bf16.mxu1 %v3528_v26 }
 0x275   : > { %v1515_v44 = vpack.c.bf16 %v1480_v60, %v1480_v60  ;;  %v1516_v49 = vpack.c.bf16 %v1481_v34, %v1481_v34 }
 0x277   : > { %2064 = vmatprep.subr.msk.bf16.mxu0 %vm766_vm3, %v1515_v44  ;;  %v1544_v29 = vsel %vm766_vm3, %v1516_v49, 0 }
 0x278   : > { %1637 = vmatpush1.bf16.msra.mxu0 %v1538_v50  ;;  %2128 = vmatpush3.bf16.msra.mxu1 %v1544_v29 }
 0x279   : > { %2074 = vmatprep.subr.msk.bf16.mxu0 %vm766_vm3, %v2068_v42  ;;  %2076 = vmatprep.subr.msk.bf16.mxu1 %vm766_vm3, %v2070_v52 }
 0x27a   : > { %v1520_v13 = vpop.permute.xlu0 %1519 }
 0x27b   : > { %2065 = vmatmul.mubr.msk.bf16.vlgmr.msra.gmra.mrb[12].mxu0 %vm762_vm4, %v3280_v6  ;;  %2130 = vmatmul.mubr.msk.bf16.vlgmr.msra.gmra.mrb[12].mxu1 %vm762_vm4, %v3280_v6  ;;  %v382_v6 = vld [vmem:[%s3453_s5] sm:$0xf] }
 0x27c   : > { %1761 = vmatpush1.bf16.msra.mxu0 %v1740_v8  ;;  %1802 = vmatpush1.bf16.msra.mxu1 %v1746_v19 }
 0x27d   : > { %1792 = vmatprep.mubr.bf16.mxu0 %v3533_v59  ;;  %1833 = vmatprep.mubr.bf16.mxu1 %v3533_v59 }
 0x27e   : > { %2078 = vmatprep.subr.msk.bf16.mxu0 %vm766_vm3, %v2072_v0  ;;  %2133 = vmatprep.subr.bf16.mxu1 %v3528_v26 }
 0x282   : > { %v1733_v24 = vpop.permute.xlu1 %1732 }
 0x283   : > { %2075 = vmatmul.mubr.msk.bf16.vlgmr.msra.gmra.mrb[16].mxu0 %vm1735_vm11, %v382_v6  ;;  %2077 = vmatmul.mubr.msk.bf16.vlgmr.msra.gmra.mrb[16].mxu1 %vm1735_vm11, %v382_v6 }
 0x284   : > { %1843 = vmatpush1.bf16.msra.mxu0 %v1752_v21  ;;  %2134 = vmatpush3.bf16.msra.mxu1 %v1758_v41 }
 0x285   : > { %1874 = vmatprep.mubr.bf16.mxu0 %v3533_v59  ;;  %2135 = vmatprep.mubr.msk.bf16.mxu1 %vm2273_vm5, %v3528_v26 }
 0x28b   : > { %2079 = vmatmul.mubr.msk.bf16.vlgmr.msra.gmra.mrb[20].mxu0 %vm1735_vm11, %v382_v6  ;;  %2136 = vmatmul.mubr.msk.bf16.vlgmr.msra.gmra.mrb[20].mxu1 %vm1735_vm11, %v382_v6 }
 0x32e   : > { %v1621_v31 = vpop.f32.mrb[8].mxu1 }
 0x32f   : > { %v1623_v7 = vpop.f32.mrb[9].mxu1  ;;  %v1622_v33 = vadd.f32 %v1621_v31, %v1520_v13 }
 0x330   : > { %v1625_v5 = vpop.f32.mrb[10].mxu1  ;;  %v1624_v58 = vadd.f32 %v1623_v7, %v1520_v13 }
 0x331   : > { %v1580_v53 = vpop.f32.mrb[8].mxu0  ;;  %v1626_v18 = vpop.f32.mrb[11].mxu1  ;;  %v1711_v57 = vmax.f32 %v1622_v33, 0.0 }
 0x332   : > { %v1582_v48 = vpop.f32.mrb[9].mxu0  ;;  %v1581_v22 = vadd.f32 %v1580_v53, %v1520_v13  ;;  %v1712_v4 = vmax.f32 %v1624_v58, 0.0 }
 0x333   : > { %v1584_v20 = vpop.f32.mrb[10].mxu0  ;;  %v1583_v63 = vadd.f32 %v1582_v48, %v1520_v13  ;;  %v1718_v39 = vmin.f32 %v1711_v57, 6.0 }
 0x334   : > { %v1585_v2 = vpop.f32.mrb[11].mxu0  ;;  %v1709_v62 = vmax.f32 %v1581_v22, 0.0  ;;  %v1719_v40 = vmin.f32 %v1712_v4, 6.0 }
 0x335   : > { %v1710_v43 = vmax.f32 %v1583_v63, 0.0 }
 0x336   : > { %v1716_v60 = vmin.f32 %v1709_v62, 6.0 }
 0x337   : > { %v1717_v46 = vmin.f32 %v1710_v43, 6.0 }
 0x34e   : > { %v1662_v47 = vpop.f32.mrb[12].mxu0  ;;  %v1703_v15 = vpop.f32.mrb[12].mxu1 }
 0x34f   : > { %v1664_v56 = vpop.f32.mrb[13].mxu0  ;;  %v2131_v17 = vpop.f32.mrb[13].mxu1  ;;  %v1663_v42 = vadd.f32 %v1662_v47, %v1520_v13  ;;  %v1704_v36 = vadd.f32 %v1703_v15, %v1520_v13 }
 0x350   : > { %v1666_v10 = vpop.f32.mrb[14].mxu0  ;;  %v1706_v59 = vpop.f32.mrb[14].mxu1  ;;  %v1665_v52 = vadd.f32 %v1664_v56, %v1520_v13 }
 0x351   : > { %v1667_v61 = vpop.f32.mrb[15].mxu0  ;;  %v2132_v26 = vpop.f32.mrb[15].mxu1  ;;  %v1713_v35 = vmax.f32 %v1663_v42, 0.0  ;;  %v1715_v37 = vmax.f32 %v1704_v36, 0.0 }
 0x352   : > { %v1714_v7 = vmax.f32 %v1665_v52, 0.0 }
 0x353   : > { %v1720_v17 = vmin.f32 %v1713_v35, 6.0  ;;  %v1722_v10 = vmin.f32 %v1715_v37, 6.0 }
 0x354   : > { %v1721_v61 = vmin.f32 %v1714_v7, 6.0 }
 0x356   : > { %v1794_v54 = vpop.f32.mrb[16].mxu0  ;;  %v1835_v38 = vpop.f32.mrb[16].mxu1 }
 0x357   : > { %v1795_v51 = vadd.f32 %v1794_v54, %v1733_v24  ;;  %v1796_v30 = vpop.f32.mrb[17].mxu0  ;;  %v1836_v23 = vadd.f32 %v1835_v38, %v1733_v24  ;;  %v1837_v1 = vpop.f32.mrb[17].mxu1 }
 0x358   : > { %v1797_v16 = vadd.f32 %v1796_v30, %v1733_v24  ;;  %v1838_v3 = vadd.f32 %v1837_v1, %v1733_v24  ;;  %v1798_v28 = vpop.f32.mrb[18].mxu0  ;;  %v1839_v14 = vpop.f32.mrb[18].mxu1 }
 0x359   : > { %v1923_v12 = vmax.f32 %v1795_v51, 0.0  ;;  %v1925_v27 = vmax.f32 %v1836_v23, 0.0  ;;  %v1799_v55 = vpop.f32.mrb[19].mxu0  ;;  %v1840_v11 = vpop.f32.mrb[19].mxu1 }
 0x35a   : > { %v1924_v34 = vmax.f32 %v1797_v16, 0.0  ;;  %v1926_v9 = vmax.f32 %v1838_v3, 0.0 }
 0x35b   : > { %v1930_v44 = vmin.f32 %v1923_v12, 6.0  ;;  %v1932_v49 = vmin.f32 %v1925_v27, 6.0 }
 0x35c   : > { %v1931_v25 = vmin.f32 %v1924_v34, 6.0  ;;  %v1933_v50 = vmin.f32 %v1926_v9, 6.0 }
 0x35d   : > { %v1937_v29 = vadd.f32 %v1930_v44, %v1716_v60  ;;  %v1939_v8 = vadd.f32 %v1932_v49, %v1718_v39 }
 0x35e   : > { %v1938_v19 = vadd.f32 %v1931_v25, %v1717_v46  ;;  %v1940_v32 = vadd.f32 %v1933_v50, %v1719_v40  ;;  %v1876_v0 = vpop.f32.mrb[20].mxu0  ;;  %v1917_v45 = vpop.f32.mrb[20].mxu1 }
 0x35f   : > { %v1877_v6 = vadd.f32 %v1876_v0, %v1733_v24  ;;  %v1918_v21 = vadd.f32 %v1917_v45, %v1733_v24  ;;  %v1878_v41 = vpop.f32.mrb[21].mxu0  ;;  %v2137_v31 = vpop.f32.mrb[21].mxu1 }
 0x360   : > { %v2087_v5 = vpack.c.bf16 %v1938_v19, %v1937_v29  ;;  %v2088_v53 = vpack.c.bf16 %v1940_v32, %v1939_v8  ;;  %v1879_v18 = vadd.f32 %v1878_v41, %v1733_v24  ;;  %v1880_v48 = vpop.f32.mrb[22].mxu0  ;;  %v1920_v20 = vpop.f32.mrb[22].mxu1 }
 0x361   : > { %v1927_v2 = vmax.f32 %v1877_v6, 0.0  ;;  %v1929_v13 = vmax.f32 %v1918_v21, 0.0  ;;  %v1881_v47 = vpop.f32.mrb[23].mxu0  ;;  %v2138_v15 = vpop.f32.mrb[23].mxu1 }
 0x362   : > { %1973 = vst [vmem:[%s332_s27] sm:$0xff] %v2087_v5  ;;  %1974 = vst [vmem:[%s332_s27 + $0x8] sm:$0xff] %v2088_v53  ;;  %v1928_v56 = vmax.f32 %v1879_v18, 0.0 }
 0x363   : > { %v1934_v59 = vmin.f32 %v1927_v2, 6.0  ;;  %v1936_v33 = vmin.f32 %v1929_v13, 6.0 }
 0x364   : > { %v1935_v26 = vmin.f32 %v1928_v56, 6.0 }
 0x365   : > { %v1941_v58 = vadd.f32 %v1934_v59, %v1720_v17  ;;  %v1943_v22 = vadd.f32 %v1936_v33, %v1722_v10 }
 0x366   : > { %v1942_v63 = vadd.f32 %v1935_v26, %v1721_v61 }
 0x367   : > { %v2090_v57 = vpack.c.bf16 %v1943_v22, %v1943_v22 }
 0x368   : > { %v2089_v24 = vpack.c.bf16 %v1942_v63, %v1941_v58 }
 0x369   : > { %1976 = vst [vmem:[%s332_s27 + $0x18] sm:$0xf] %v2090_v57 }
 0x36a   : > { %1975 = vst [vmem:[%s332_s27 + $0x10] sm:$0xff] %v2089_v24 }
 0x36b PF: > { %s19_s30 = sadd.s32 1, %s2266_s30  }
 0x36c   : > { %p16_p4 = scmp.ge.s32.totalorder %s19_s30, 4  }
 0x36e   :  { %18 = sbr.rel (!%p16_p4) target bundleno = 1 (0x1), region = 86 }

// kernel: dronet_forward.5
= control target key start
LH: loop header
LB: loop body
LE: loop exit
PB: predicated region body
PF: predicated region fallthrough
CT: control target
= control target key end

     0   :  { %s4084_s0 = inlined_call_operand.vmem [shape: bf16[2,4,8,256], index: 0, kind: input, shape index: {}]   ;;  %s4085_s1 = inlined_call_operand.vmem [shape: bf16[16,72], index: 1, kind: input, shape index: {}]   ;;  %s4086_s2 = inlined_call_operand.vmem [shape: f32[16,1], index: 2, kind: input, shape index: {}]   ;;  %s4087_s3 = inlined_call_operand.vmem [shape: bf16[16,144], index: 3, kind: input, shape index: {}]   ;;  %s4088_s4 = inlined_call_operand.vmem [shape: f32[16,1], index: 4, kind: input, shape index: {}]   ;;  %s4089_s5 = inlined_call_operand.vmem [shape: bf16[16,8], index: 5, kind: input, shape index: {}]   ;;  %s4090_s6 = inlined_call_operand.vmem [shape: f32[16,1], index: 6, kind: input, shape index: {}]   ;;  %s4091_s7 = inlined_call_operand.vmem [shape: f32[9,1,256], index: 7, kind: input, shape index: {}]   ;;  %s4092_s8 = inlined_call_operand.vmem [shape: f32[9,1,256], index: 8, kind: input, shape index: {}]   ;;  %s4093_s9 = inlined_call_operand.vmem [shape: bf16[4,256,128], index: 9, kind: input, shape index: {}]   ;;  %s4094_s10 = inlined_call_operand.vmem [shape: bf16[32,144], index: 10, kind: input, shape index: {}]   ;;  %s4095_s11 = inlined_call_operand.vmem [shape: f32[32,1], index: 11, kind: input, shape index: {}]   ;;  %s4096_s12 = inlined_call_operand.vmem [shape: bf16[32,288], index: 12, kind: input, shape index: {}]   ;;  %s4097_s13 = inlined_call_operand.vmem [shape: f32[32,1], index: 13, kind: input, shape index: {}]   ;;  %s4098_s14 = inlined_call_operand.vmem [shape: bf16[32,16], index: 14, kind: input, shape index: {}]   ;;  %s4099_s15 = inlined_call_operand.vmem [shape: f32[32,1], index: 15, kind: input, shape index: {}]   ;;  %s4100_s16 = inlined_call_operand.vmem [shape: f32[9,1,128], index: 16, kind: input, shape index: {}]   ;;  %s4101_s17 = inlined_call_operand.vmem [shape: f32[9,1,128], index: 17, kind: input, shape index: {}]   ;;  %s4102_s18 = inlined_call_operand.vmem [shape: f32[2,32,128], index: 18, kind: input, shape index: {}]   ;;  %s4103_s19 = inlined_call_operand.vmem [shape: f32[2,1,2], index: 19, kind: output, shape index: {}]  }
   0x1   :  { %4108 = sst [smem:[#allocation2_spill]] %s4084_s0  ;;  %s3263_s0 = smov 0  }
   0x2   :  { %4109 = sst [smem:[#allocation3_spill]] %s4085_s1 }
   0x3   :  { %4110 = sst [smem:[#allocation4_spill]] %s4086_s2 }
   0x4   :  { %4111 = sst [smem:[#allocation5_spill]] %s4087_s3 }
   0x5 LB: > { %s2633_s30 = sadd.s32 4294967295, %s3146_s0   ;;  %p2637_p0 = scmp.ge.s32.totalorder %s3146_s0, 1  ;;  %s3146_s0 = sphi %s3263_s0, %s29_s0  }
   0x6   : > { %p537_p1 = scmp.lt.s32.totalorder %s3146_s0, 3 }
   0x8   : > { %p538_p2 = pnand %p2637_p0, %p537_p1 }
   0x9   : > { %p591_p3 = scmp.lt.s32.totalorder (!%p538_p2), %s2633_s30, 1  ;;  %s4112_s22 = sld [smem:[#allocation2_spill]] (!%p538_p2)  ;;  %v3151_v15 = vmov (!%p538_p2), 0   ;;  %v641_v18 = vlaneseq (!%p538_p2)  ;;  %v624_v23 = vld [vmem:[%s4091_s7] sm:$0x3] (!%p538_p2)  ;;  %vm766_vm3 = vcmask (!%p538_p2), 1043456  }
   0xa   : > { %541 = sbr.rel (%p538_p2) target bundleno = 2081 (0x821), region = 96  ;;  %s3148_s23 = smov (!%p538_p2), 14   ;;  %805 = vmatprep.mubr.bf16.mxu0 (!%p538_p2), %v3151_v15  ;;  %3043 = vset.pattern.permute.xlu1 (!%p538_p2), %v3151_v15  ;;  %v625_v26 = vld [vmem:[%s4091_s7 + $0x2] sm:$0x3] (!%p538_p2)  ;;  %v626_v27 = vld [vmem:[%s4091_s7 + $0x4] sm:$0x3] (!%p538_p2) }
   0xb   : > { %s3149_s24 = smov (!%p538_p2), 15   ;;  %s3150_s25 = smov (!%p538_p2), 1   ;;  %3044 = vset.pattern.permute.xlu0 (!%p538_p2), %v3151_v15  ;;  %v648_v19 = vshrl.u32 (!%p538_p2), %v641_v18, 7  ;;  %v3313_v20 = vand.u32 (!%p538_p2), 127, %v641_v18  ;;  %v627_v32 = vld [vmem:[%s4091_s7 + $0x6] sm:$0x3] (!%p538_p2) }
   0xc   : > { %s4113_s27 = sld [smem:[#allocation4_spill]] (!%p538_p2)  ;;  %v628_v57 = vld [vmem:[%s4091_s7 + $0xc] sm:$0x3] (!%p538_p2)  ;;  %vm762_vm4 = vcmask (!%p538_p2), 588800   ;;  %vm1154_vm5 = vcmask (!%p538_p2), 64512   ;;  %s3152_s26 = smov (!%p538_p2), 13  }
   0xd   : > { %v3315_v21 = vsub.s32 (!%p538_p2), 0, %v648_v19  ;;  %v3317_v22 = vsub.s32 (!%p538_p2), 1, %v648_v19  ;;  %vm643_vm0 = vcmp.lt.s32.totalorder (!%p538_p2), %v3313_v20, 15  ;;  %vm663_vm1 = vcmp.lt.s32.totalorder (!%p538_p2), %v3313_v20, 14  ;;  %s4106_s28 = smov (!%p538_p2), 127   ;;  %s3154_s29 = smov (!%p538_p2), 115  }
   0xe   : > { %vm702_vm2 = vcmp.lt.s32.totalorder (!%p538_p2), %v3313_v20, 1  ;;  %s3156_s21 = smov (!%p538_p2), 113   ;;  %vm1082_vm6 = vcmask (!%p538_p2), 130048   ;;  %vm886_vm7 = vcmp.lt.s32.totalorder (!%p538_p2), %v3313_v20, 13  ;;  %vm941_vm8 = vcmp.lt.s32.totalorder (!%p538_p2), %v3313_v20, 127  ;;  %s4116_s1 = smov (!%p538_p2), 127  }
   0xf   : > { %v654_v33 = vrot.slane (!%p538_p2), %v624_v23, %v3317_v22  ;;  %v650_v34 = vrot.slane (!%p538_p2), %v624_v23, %v3315_v21  ;;  %v674_v36 = vrot.slane (!%p538_p2), %v625_v26, %v3317_v22  ;;  %v693_v38 = vrot.slane (!%p538_p2), %v626_v27, %v3317_v22  ;;  %s3160_s3 = smov (!%p538_p2), 6  }
  0x10   : > { %v670_v41 = vrot.slane (!%p538_p2), %v625_v26, %v3315_v21  ;;  %v713_v43 = vrot.slane (!%p538_p2), %v627_v32, %v3317_v22  ;;  %v689_v44 = vrot.slane (!%p538_p2), %v626_v27, %v3315_v21  ;;  %v709_v52 = vrot.slane (!%p538_p2), %v627_v32, %v3315_v21 }
  0x11   : > { %s4118_s30 = smov (!%p591_p3, %s2633_s30), 1  ;;  %vm969_vm9 = vcmp.lt.s32.totalorder %v3313_v20, 115  ;;  %vm997_vm10 = vcmp.lt.s32.totalorder %v3313_v20, 114  ;;  %vm1025_vm11 = vcmp.lt.s32.totalorder %v3313_v20, 113  ;;  %vm2323_vm12 = vcmask 261120  }
  0x12   : > { %s2853_s20 = sshll.u32 %s4118_s30, 5  ;;  %v614_v16 = vld [vmem:[%s4113_s27] sm:$0xff]  ;;  %v615_v17 = vld [vmem:[%s4113_s27 + $0x8] sm:$0xff]  ;;  %vm2575_vm13 = vcmp.eq.s32.totalorder %v3313_v20, 0  ;;  %vm2584_vm14 = vcmask 8192  }
  0x13   : > { %s595_s2 = scalar_lea.vmem %s4112_s22, %s2853_s20  ;;  %s4114_s22 = sld [smem:[#allocation3_spill]] }
  0x14   : > { %v3277_v0 = vld [vmem:[%s595_s2 + $0x18] sm:$0xff]  ;;  %v3279_v1 = vld [vmem:[%s595_s2 + $0x10] sm:$0xff]  ;;  %v3281_v2 = vld [vmem:[%s595_s2 + $0x8] sm:$0xff]  ;;  %s3155_s20 = smov 114  }
  0x15   : > { %v610_v3 = vunpack.c.l.bf16 %v3277_v0  ;;  %v611_v4 = vunpack.c.h.bf16 %v3277_v0  ;;  %v608_v5 = vunpack.c.l.bf16 %v3279_v1  ;;  %v609_v6 = vunpack.c.h.bf16 %v3279_v1  ;;  %v3295_v12 = vld [vmem:[%s595_s2] sm:$0xff]  ;;  %s4115_s2 = sld [smem:[#allocation5_spill]] }
  0x16   : > { %v606_v7 = vunpack.c.l.bf16 %v3281_v2  ;;  %v607_v8 = vunpack.c.h.bf16 %v3281_v2  ;;  %v2641_v13 = vcombine.high %v3295_v12, %v3281_v2  ;;  %v2640_v14 = vcombine.low %v3295_v12, %v3281_v2 }
  0x17   : > { %v3028_v9 = vpack.i.bf16 %v611_v4, %v610_v3  ;;  %v3023_v10 = vpack.i.bf16 %v609_v6, %v608_v5  ;;  %v2643_v27 = vcombine.high %v3277_v0, %v3277_v0  ;;  %v2650_v2 = vcombine.low %v3295_v12, %v3295_v12 }
  0x18   : > { %v3033_v11 = vpack.i.bf16 %v607_v8, %v606_v7  ;;  %v732_v8 = vrot.slane %v628_v57, %v3317_v22 }
  0x19   : > { %3029 = vrot.lane.b32.xlu1 %v3028_v9, %s3148_s23  ;;  %3019 = vrot.lane.b32.xlu0 %v3028_v9, %s3149_s24  ;;  %v3049_v1 = vld [vmem:[%s4114_s22] sm:$0xff]   ;;  %s3159_s22 = smov 122  }
  0x1d   : > { %3024 = vrot.lane.b32.xlu0 %v3023_v10, %s3148_s23  ;;  %3034 = vrot.lane.b32.xlu1 %v3033_v11, %s3150_s25 }
  0x21   : > { %3039 = vrot.lane.b32.xlu0 %v3028_v9, %s3150_s25  ;;  %749 = vperm.xlu1 %3043, %v614_v16  }
  0x25   : > { %754 = vperm.xlu0 %3044, %v615_v17   ;;  %v728_v17 = vrot.slane %v628_v57, %v3315_v21  ;;  %v3058_v57 = vld [vmem:[%s4093_s9] sm:$0xff]  }
  0x8b   : > { %v3030_v24 = vpop.permute.xlu1 %3029  ;;  %v3020_v25 = vpop.permute.xlu0 %3019 }
  0x8c   : > { %v3032_v28 = vunpack.i.h.bf16 %v3030_v24  ;;  %v3031_v29 = vunpack.i.l.bf16 %v3030_v24  ;;  %v3022_v30 = vunpack.i.h.bf16 %v3020_v25  ;;  %v3021_v31 = vunpack.i.l.bf16 %v3020_v25 }
  0x8e   : > { %v644_v35 = vsel %vm643_vm0, %v3021_v31, %v3022_v30  ;;  %v645_v37 = vsel %vm643_vm0, %v3022_v30, %v3021_v31  ;;  %v683_v42 = vsel %vm663_vm1, %v3031_v29, %v3032_v28  ;;  %v684_v51 = vsel %vm663_vm1, %v3032_v28, %v3031_v29 }
  0x8f   : > { %v3025_v39 = vpop.permute.xlu0 %3024  ;;  %v3035_v40 = vpop.permute.xlu1 %3034  ;;  %v658_v49 = vmul.f32 %v654_v33, %v644_v35  ;;  %v657_v50 = vmul.f32 %v650_v34, %v645_v37  ;;  %v697_v56 = vmul.f32 %v693_v38, %v683_v42  ;;  %v696_v10 = vmul.f32 %v689_v44, %v684_v51 }
  0x90   : > { %v3027_v45 = vunpack.i.h.bf16 %v3025_v39  ;;  %v3026_v46 = vunpack.i.l.bf16 %v3025_v39  ;;  %v3037_v47 = vunpack.i.h.bf16 %v3035_v40  ;;  %v3036_v48 = vunpack.i.l.bf16 %v3035_v40 }
  0x91   : > { %v2642_v28 = vcombine.low %v3277_v0, %v3277_v0  ;;  %v3052_v0 = vld [vmem:[%s4089_s5] sm:$0xff]  }
  0x92   : > { %v703_v53 = vsel %vm702_vm2, %v3036_v48, %v3037_v47  ;;  %v664_v54 = vsel %vm663_vm1, %v3026_v46, %v3027_v45  ;;  %v665_v55 = vsel %vm663_vm1, %v3027_v45, %v3026_v46  ;;  %v704_v58 = vsel %vm702_vm2, %v3037_v47, %v3036_v48  ;;  %v618_v47 = vld [vmem:[%s4088_s4] sm:$0xff] }
  0x93   : > { %v678_v59 = vmul.f32 %v674_v36, %v664_v54  ;;  %v677_v60 = vmul.f32 %v670_v41, %v665_v55  ;;  %v717_v61 = vmul.f32 %v713_v43, %v703_v53  ;;  %v3040_v62 = vpop.permute.xlu0 %3039  ;;  %v716_v11 = vmul.f32 %v709_v52, %v704_v58  ;;  %v3055_v48 = vld [vmem:[%s4115_s2 + $0x4] ss:$8 sps:$4 sm:$0xff]  }
  0x94   : > { %v3042_v63 = vunpack.i.h.bf16 %v3040_v62  ;;  %v3041_v3 = vunpack.i.l.bf16 %v3040_v62  ;;  %2649 = vmatprep.mubr.msk.bf16.mxu1 %vm1082_vm6, %v3055_v48  ;;  %v619_v52 = vld [vmem:[%s4088_s4 + $0x8] sm:$0xff]  ;;  %v3068_v62 = vld [vmem:[%s4093_s9 + $0x58] sm:$0xff]  }
  0x95   : > { %v738_v4 = vpack.c.bf16 %v678_v59, %v658_v49  ;;  %v737_v7 = vpack.c.bf16 %v677_v60, %v657_v50  ;;  %v740_v16 = vpack.c.bf16 %v717_v61, %v697_v56  ;;  %v739_v23 = vpack.c.bf16 %v716_v11, %v696_v10  ;;  %v622_v50 = vld [vmem:[%s4090_s6] sm:$0xff]  ;;  %v623_v54 = vld [vmem:[%s4090_s6 + $0x8] sm:$0xff]  ;;  %v3064_v60 = vld [vmem:[%s4093_s9 + $0x50] sm:$0xff]  }
  0x96   : > { %v722_v9 = vsel %vm702_vm2, %v3041_v3, %v3042_v63  ;;  %v723_v18 = vsel %vm702_vm2, %v3042_v63, %v3041_v3  ;;  %v3056_v56 = vld [vmem:[%s4093_s9 + $0x40] sm:$0xff]   ;;  %v3060_v58 = vld [vmem:[%s4093_s9 + $0x48] sm:$0xff]   ;;  %v3066_v61 = vld [vmem:[%s4093_s9 + $0x10] sm:$0xff]  }
  0x97   : > { %773 = vmatprep.subr.bf16.mxu0 %v738_v4  ;;  %v736_v19 = vmul.f32 %v732_v8, %v722_v9  ;;  %v735_v24 = vmul.f32 %v728_v17, %v723_v18  ;;  %v3062_v59 = vld [vmem:[%s4093_s9 + $0x8] sm:$0xff]   ;;  %v3070_v63 = vld [vmem:[%s4093_s9 + $0x18] sm:$0xff]   ;;  %v3072_v3 = vld [vmem:[%s4093_s9 + $0x60] sm:$0xff]  }
  0x98   : > { %774 = vmatpush1.bf16.msra.mxu0 %v737_v7  ;;  %v3074_v4 = vld [vmem:[%s4093_s9 + $0x20] sm:$0xff]  }
  0x99   : > { %775 = vmatprep.subr.bf16.mxu0 %v740_v16  ;;  %v744_v25 = vpack.c.bf16 %v609_v6, %v736_v19  ;;  %v743_v26 = vpack.c.bf16 %v608_v5, %v735_v24  ;;  %v2651_v6 = vcombine.high %v3295_v12, %v3295_v12  ;;  %v1159_v5 = vsel %vm766_vm3, %v2650_v2, 0 }
  0x9c   : > { %776 = vmatpush1.bf16.msra.mxu0 %v739_v23 }
  0x9d   : > { %777 = vmatprep.subr.bf16.mxu0 %v2641_v13  ;;  %v768_v13 = vsel %vm766_vm3, %v2642_v28, 0  ;;  %v629_v28 = vld [vmem:[%s4092_s8] sm:$0x3] }
  0x9e   : > { %v840_v2 = vrot.slane %v629_v28, %v3315_v21 }
  0xa0   : > { %778 = vmatpush1.bf16.msra.mxu0 %v2640_v14  ;;  %v750_v14 = vpop.permute.xlu1 %749 }
  0xa1   : > { %779 = vmatprep.subr.bf16.mxu0 %v744_v25 }
  0xa4   : > { %780 = vmatpush1.bf16.msra.mxu0 %v743_v26  ;;  %v755_v29 = vpop.permute.xlu0 %754 }
  0xa5   : > { %2645 = vmatprep.subr.msk.bf16.mxu0 %vm766_vm3, %v2643_v27 }
  0xa8   : > { %782 = vmatpush1.bf16.msra.mxu0 %v768_v13 }
  0xa9   : > { %2653 = vmatprep.subr.msk.bf16.mxu0 %vm766_vm3, %v2651_v6 }
  0xab   : > { %2646 = vmatmul.mubr.msk.bf16.vlgmr.msra.gmra.mrb[0].mxu0 %vm762_vm4, %v3049_v1  ;;  %v630_v1 = vld [vmem:[%s4092_s8 + $0x2] sm:$0x3] }
  0xac   : > { %1165 = vmatpush1.bf16.msra.mxu0 %v1159_v5  ;;  %1196 = vmatprep.mubr.bf16.mxu0 %v3151_v15  ;;  %v844_v5 = vrot.slane %v629_v28, %v3317_v22 }
  0xad   : > { %2854 = vmatprep.subr.bf16.mxu0 %v3056_v56 }
  0xb3   : > { %2654 = vmatmul.mubr.msk.bf16.vlgmr.msra.gmra.mrb[4].mxu0 %vm1154_vm5, %v3052_v0 }
  0xb4   : > { %2855 = vmatpush3.bf16.msra.mxu0 %v3058_v57 }
  0xb5   : > { %2856 = vmatprep.subr.bf16.mxu0 %v3060_v58 }
  0xb8   : > { %2857 = vmatpush3.bf16.msra.mxu0 %v3062_v59 }
  0xb9   : > { %2858 = vmatprep.subr.bf16.mxu0 %v3064_v60 }
  0xbc   : > { %2859 = vmatpush3.bf16.msra.mxu0 %v3066_v61  ;;  %v632_v61 = vld [vmem:[%s4092_s8 + $0x6] sm:$0x3] }
  0xbd   : > { %2860 = vmatprep.subr.bf16.mxu0 %v3068_v62  ;;  %v926_v28 = vrot.slane %v632_v61, %v3317_v22 }
  0xc0   : > { %2861 = vmatpush3.bf16.msra.mxu0 %v3070_v63 }
  0xc1   : > { %2862 = vmatprep.subr.bf16.mxu0 %v3072_v3 }
  0xc4   : > { %2863 = vmatpush3.bf16.msra.mxu0 %v3074_v4 }
 0x17e   : > { %v807_v12 = vpop.f32.mrb[0].mxu0 }
 0x17f   : > { %v808_v30 = vadd.f32 %v807_v12, %v750_v14  ;;  %v809_v31 = vpop.f32.mrb[1].mxu0 }
 0x180   : > { %v810_v32 = vadd.f32 %v809_v31, %v750_v14  ;;  %v811_v33 = vpop.f32.mrb[2].mxu0  ;;  %v871_v31 = vrot.slane %v630_v1, %v3317_v22 }
 0x181   : > { %v816_v34 = vmax.f32 %v808_v30, 0.0  ;;  %v812_v35 = vadd.f32 %v811_v33, %v755_v29  ;;  %v813_v36 = vpop.f32.mrb[3].mxu0  ;;  %v867_v30 = vrot.slane %v630_v1, %v3315_v21 }
 0x182   : > { %v817_v37 = vmax.f32 %v810_v32, 0.0  ;;  %v814_v38 = vadd.f32 %v813_v36, %v755_v29 }
 0x183   : > { %v3392_v39 = vmin.f32 %v816_v34, 6.0  ;;  %v818_v40 = vmax.f32 %v812_v35, 0.0  ;;  %v631_v35 = vld [vmem:[%s4092_s8 + $0x4] sm:$0x3] }
 0x184   : > { %v819_v41 = vmax.f32 %v814_v38, 0.0  ;;  %v3400_v43 = vmin.f32 %v817_v37, 6.0  ;;  %v899_v56 = vrot.slane %v631_v35, %v3317_v22 }
 0x185   : > { %v3394_v42 = vmin.f32 %v818_v40, 6.0  ;;  %851 = vrot.lane.b32.xlu0 %v3392_v39, %s3148_s23  ;;  %824 = vrot.lane.b32.xlu1 %v3392_v39, %s3149_s24 }
 0x186   : > { %v3402_v44 = vmin.f32 %v819_v41, 6.0  ;;  %v3458_v49 = vpop.f32.mrb[4].mxu0 }
 0x187   : > { %v1053_v45 = vpack.c.bf16 %v3394_v42, %v3392_v39  ;;  %v3463_v51 = vpop.f32.mrb[5].mxu0 }
 0x188   : > { %v1054_v46 = vpack.c.bf16 %v3402_v44, %v3400_v43  ;;  %v3469_v53 = vpop.f32.mrb[6].mxu0 }
 0x189   : > { %878 = vrot.lane.b32.xlu0 %v3392_v39, %s3152_s26  ;;  %826 = vrot.lane.b32.xlu1 %v3394_v42, %s3149_s24  ;;  %v3474_v55 = vpop.f32.mrb[7].mxu0 }
 0x18d   : > { %906 = vrot.lane.b32.xlu0 %v3392_v39, %s3150_s25  ;;  %853 = vrot.lane.b32.xlu1 %v3394_v42, %s3148_s23 }
 0x191   : > { %933 = vrot.lane.b32.xlu0 %v3392_v39, %s4106_s28  ;;  %880 = vrot.lane.b32.xlu1 %v3394_v42, %s3152_s26 }
 0x195   : > { %961 = vrot.lane.b32.xlu0 %v3392_v39, %s3154_s29  ;;  %908 = vrot.lane.b32.xlu1 %v3394_v42, %s3150_s25 }
 0x199   : > { %989 = vrot.lane.b32.xlu0 %v3392_v39, %s3155_s20  ;;  %935 = vrot.lane.b32.xlu1 %v3394_v42, %s4106_s28 }
 0x19d   : > { %828 = vrot.lane.b32.xlu0 %v3400_v43, %s3149_s24  ;;  %963 = vrot.lane.b32.xlu1 %v3394_v42, %s3154_s29 }
 0x1a1   : > { %855 = vrot.lane.b32.xlu0 %v3400_v43, %s3148_s23  ;;  %991 = vrot.lane.b32.xlu1 %v3394_v42, %s3155_s20 }
 0x1a5   : > { %882 = vrot.lane.b32.xlu0 %v3400_v43, %s3152_s26  ;;  %830 = vrot.lane.b32.xlu1 %v3402_v44, %s3149_s24  ;;  %s3158_s24 = smov 7  }
 0x1a9   : > { %910 = vrot.lane.b32.xlu0 %v3400_v43, %s3150_s25  ;;  %857 = vrot.lane.b32.xlu1 %v3402_v44, %s3148_s23  ;;  %s3157_s23 = smov 8  }
 0x1ad   : > { %1017 = vrot.lane.b32.xlu0 %v3392_v39, %s3156_s21  ;;  %884 = vrot.lane.b32.xlu1 %v3402_v44, %s3152_s26 }
 0x1b1   : > { %937 = vrot.lane.b32.xlu0 %v3400_v43, %s4106_s28  ;;  %912 = vrot.lane.b32.xlu1 %v3402_v44, %s3150_s25 }
 0x1b5   : > { %965 = vrot.lane.b32.xlu0 %v3400_v43, %s3154_s29  ;;  %1019 = vrot.lane.b32.xlu1 %v3394_v42, %s3156_s21  ;;  %v636_v42 = vld [vmem:[%s4092_s8 + $0x10] sm:$0x3] }
 0x1b9   : > { %993 = vrot.lane.b32.xlu0 %v3400_v43, %s3155_s20  ;;  %939 = vrot.lane.b32.xlu1 %v3402_v44, %s4106_s28  ;;  %s3162_s28 = smov 120  }
 0x1bd   : > { %1021 = vrot.lane.b32.xlu0 %v3400_v43, %s3156_s21  ;;  %967 = vrot.lane.b32.xlu1 %v3402_v44, %s3154_s29  ;;  %v635_v43 = vld [vmem:[%s4092_s8 + $0xe] sm:$0x3]  ;;  %s598_s29 = scalar_lea.vmem %s4103_s19, %s4118_s30 }
 0x1c1   : > { %1065 = vperm.xlu0 %3044, %v618_v47   ;;  %995 = vrot.lane.b32.xlu1 %v3402_v44, %s3155_s20 }
 0x1c5   : > { %1141 = vperm.xlu0 %3044, %v622_v50   ;;  %1023 = vrot.lane.b32.xlu1 %v3402_v44, %s3156_s21  ;;  %s3161_s21 = smov 121  }
 0x1c9   : > { %1070 = vperm.xlu1 %3043, %v619_v52  }
 0x1cd   : > { %1146 = vperm.xlu1 %3043, %v623_v54   ;;  %v895_v54 = vrot.slane %v631_v35, %v3315_v21 }
 0x1f7   : > { %v852_v7 = vpop.permute.xlu0 %851  ;;  %v825_v8 = vpop.permute.xlu1 %824 }
 0x1fb   : > { %v879_v9 = vpop.permute.xlu0 %878  ;;  %v827_v10 = vpop.permute.xlu1 %826 }
 0x1ff   : > { %v3506_v11 = vpop.permute.xlu0 %906  ;;  %v854_v16 = vpop.permute.xlu1 %853 }
 0x203   : > { %v3508_v17 = vpop.permute.xlu0 %933  ;;  %v881_v18 = vpop.permute.xlu1 %880 }
 0x207   : > { %v3510_v19 = vpop.permute.xlu0 %961  ;;  %v3512_v23 = vpop.permute.xlu1 %908 }
 0x20b   : > { %v3514_v24 = vpop.permute.xlu0 %989  ;;  %v3516_v25 = vpop.permute.xlu1 %935 }
 0x20f   : > { %v829_v26 = vpop.permute.xlu0 %828  ;;  %v3518_v27 = vpop.permute.xlu1 %963 }
 0x210   : > { %v832_v0 = vsel %vm643_vm0, %v825_v8, %v829_v26  ;;  %v834_v14 = vsel %vm643_vm0, %v829_v26, %v825_v8  ;;  %v922_v26 = vrot.slane %v632_v61, %v3315_v21 }
 0x211   : > { %v847_v34 = vmul.f32 %v840_v2, %v834_v14  ;;  %v848_v37 = vmul.f32 %v844_v5, %v832_v0 }
 0x213   : > { %v856_v13 = vpop.permute.xlu0 %855  ;;  %v3523_v6 = vpop.permute.xlu1 %991 }
 0x214   : > { %v859_v40 = vsel %vm663_vm1, %v852_v7, %v856_v13  ;;  %v861_v41 = vsel %vm663_vm1, %v856_v13, %v852_v7 }
 0x215   : > { %v874_v59 = vmul.f32 %v867_v30, %v861_v41  ;;  %v875_v60 = vmul.f32 %v871_v31, %v859_v40 }
 0x217   : > { %v883_v12 = vpop.permute.xlu0 %882  ;;  %v831_v29 = vpop.permute.xlu1 %830 }
 0x218   : > { %v833_v32 = vsel %vm643_vm0, %v827_v10, %v831_v29  ;;  %v835_v33 = vsel %vm643_vm0, %v831_v29, %v827_v10  ;;  %v887_v3 = vsel %vm886_vm7, %v879_v9, %v883_v12  ;;  %v889_v4 = vsel %vm886_vm7, %v883_v12, %v879_v9 }
 0x219   : > { %v849_v36 = vmul.f32 %v840_v2, %v835_v33  ;;  %v850_v38 = vmul.f32 %v844_v5, %v833_v32  ;;  %v902_v1 = vmul.f32 %v895_v54, %v889_v4  ;;  %v903_v5 = vmul.f32 %v899_v56, %v887_v3 }
 0x21b   : > { %v911_v47 = vpop.permute.xlu0 %910  ;;  %v858_v48 = vpop.permute.xlu1 %857  ;;  %v1046_v50 = vpack.c.bf16 %v850_v38, %v848_v37  ;;  %v1045_v52 = vpack.c.bf16 %v849_v36, %v847_v34 }
 0x21c   : > { %v860_v57 = vsel %vm663_vm1, %v854_v16, %v858_v48  ;;  %v862_v58 = vsel %vm663_vm1, %v858_v48, %v854_v16  ;;  %v914_v14 = vsel %vm702_vm2, %v3506_v11, %v911_v47  ;;  %v916_v12 = vsel %vm702_vm2, %v911_v47, %v3506_v11  ;;  %v633_v11 = vld [vmem:[%s4092_s8 + $0xa] sm:$0x3] }
 0x21d   : > { %v876_v62 = vmul.f32 %v867_v30, %v862_v58  ;;  %v877_v63 = vmul.f32 %v871_v31, %v860_v57  ;;  %1086 = vmatprep.subr.bf16.mxu1 %v1046_v50  ;;  %v929_v34 = vmul.f32 %v922_v26, %v916_v12  ;;  %v930_v35 = vmul.f32 %v926_v28, %v914_v14  ;;  %v634_v50 = vld [vmem:[%s4092_s8 + $0xc] sm:$0x3] }
 0x21e   : > { %1087 = vmatpush1.bf16.msra.mxu1 %v1045_v52  ;;  %v950_v48 = vrot.slane %v633_v11, %v3315_v21  ;;  %v978_v57 = vrot.slane %v634_v50, %v3315_v21  ;;  %v982_v58 = vrot.slane %v634_v50, %v3317_v22  ;;  %v1034_v14 = vrot.slane %v636_v42, %v3315_v21  ;;  %v3061_v50 = vld [vmem:[%s4093_s9 + $0xc8] sm:$0xff]  }
 0x21f   : > { %v3561_v7 = vpop.permute.xlu0 %1017  ;;  %v885_v8 = vpop.permute.xlu1 %884  ;;  %v1048_v10 = vpack.c.bf16 %v877_v63, %v875_v60  ;;  %v1047_v16 = vpack.c.bf16 %v876_v62, %v874_v59  ;;  %v1038_v12 = vrot.slane %v636_v42, %v3317_v22 }
 0x220   : > { %v888_v13 = vsel %vm886_vm7, %v881_v18, %v885_v8  ;;  %v890_v2 = vsel %vm886_vm7, %v885_v8, %v881_v18 }
 0x221   : > { %v904_v0 = vmul.f32 %v895_v54, %v890_v2  ;;  %v905_v9 = vmul.f32 %v899_v56, %v888_v13  ;;  %1088 = vmatprep.subr.bf16.mxu1 %v1048_v10  ;;  %v1006_v10 = vrot.slane %v635_v43, %v3315_v21 }
 0x222   : > { %1089 = vmatpush1.bf16.msra.mxu1 %v1047_v16  ;;  %v1010_v16 = vrot.slane %v635_v43, %v3317_v22  ;;  %v3078_v43 = vld [vmem:[%s4093_s9 + $0x28] sm:$0xff]  }
 0x223   : > { %v938_v29 = vpop.permute.xlu0 %937  ;;  %v913_v30 = vpop.permute.xlu1 %912  ;;  %v1050_v31 = vpack.c.bf16 %v905_v9, %v903_v5  ;;  %v1049_v32 = vpack.c.bf16 %v904_v0, %v902_v1 }
 0x224   : > { %v915_v18 = vsel %vm702_vm2, %v3512_v23, %v913_v30  ;;  %v917_v33 = vsel %vm702_vm2, %v913_v30, %v3512_v23  ;;  %v954_v23 = vrot.slane %v633_v11, %v3317_v22  ;;  %v942_v52 = vsel %vm941_vm8, %v3508_v17, %v938_v29 }
 0x225   : > { %v931_v36 = vmul.f32 %v922_v26, %v917_v33  ;;  %v932_v37 = vmul.f32 %v926_v28, %v915_v18  ;;  %1090 = vmatprep.subr.bf16.mxu1 %v1050_v31  ;;  %v944_v54 = vsel %vm941_vm8, %v938_v29, %v3508_v17  ;;  %v957_v60 = vmul.f32 %v950_v48, %v942_v52  ;;  %v3063_v52 = vld [vmem:[%s4093_s9 + $0x88] sm:$0xff]  }
 0x226   : > { %1091 = vmatpush1.bf16.msra.mxu1 %v1049_v32  ;;  %v958_v61 = vmul.f32 %v954_v23, %v944_v54  ;;  %v3065_v54 = vld [vmem:[%s4093_s9 + $0xd0] sm:$0xff]  }
 0x227   : > { %v966_v38 = vpop.permute.xlu0 %965  ;;  %v3585_v40 = vpop.permute.xlu1 %1019  ;;  %v1052_v41 = vpack.c.bf16 %v932_v37, %v930_v35  ;;  %v1051_v47 = vpack.c.bf16 %v931_v36, %v929_v34 }
 0x228   : > { %v970_v63 = vsel %vm969_vm9, %v3510_v19, %v966_v38  ;;  %v972_v3 = vsel %vm969_vm9, %v966_v38, %v3510_v19 }
 0x229   : > { %1092 = vmatprep.subr.bf16.mxu1 %v1052_v41  ;;  %v985_v28 = vmul.f32 %v978_v57, %v970_v63  ;;  %v986_v39 = vmul.f32 %v982_v58, %v972_v3  ;;  %v3082_v63 = vld [vmem:[%s4093_s9 + $0x30] sm:$0xff]  }
 0x22a   : > { %1093 = vmatpush1.bf16.msra.mxu1 %v1051_v47  ;;  %v3083_v3 = vld [vmem:[%s4093_s9 + $0xb0] sm:$0xff]  }
 0x22b   : > { %1094 = vmatprep.subr.bf16.mxu1 %v1054_v46  ;;  %v940_v56 = vpop.permute.xlu1 %939  ;;  %v994_v44 = vpop.permute.xlu0 %993 }
 0x22c   : > { %v943_v59 = vsel %vm941_vm8, %v3516_v25, %v940_v56  ;;  %v945_v17 = vsel %vm941_vm8, %v940_v56, %v3516_v25  ;;  %v998_v2 = vsel %vm997_vm10, %v3514_v24, %v994_v44  ;;  %v1000_v1 = vsel %vm997_vm10, %v994_v44, %v3514_v24  ;;  %v3067_v56 = vld [vmem:[%s4093_s9 + $0x90] sm:$0xff]   ;;  %v3079_v44 = vld [vmem:[%s4093_s9 + $0xa8] sm:$0xff]  }
 0x22d   : > { %v959_v46 = vmul.f32 %v950_v48, %v943_v59  ;;  %v960_v62 = vmul.f32 %v954_v23, %v945_v17  ;;  %v1013_v24 = vmul.f32 %v1006_v10, %v998_v2  ;;  %v1014_v31 = vmul.f32 %v1010_v16, %v1000_v1  ;;  %v3057_v48 = vld [vmem:[%s4093_s9 + $0xc0] sm:$0xff]  }
 0x22e   : > { %1095 = vmatpush1.bf16.msra.mxu1 %v1053_v45  ;;  %v3053_v23 = vld [vmem:[%s4115_s2] ss:$8 sps:$4 sm:$0xff]  }
 0x22f   : > { %v968_v25 = vpop.permute.xlu1 %967  ;;  %v1056_v4 = vpack.c.bf16 %v960_v62, %v958_v61  ;;  %v1055_v8 = vpack.c.bf16 %v959_v46, %v957_v60  ;;  %v3073_v59 = vld [vmem:[%s4093_s9 + $0xe0] sm:$0xff]   ;;  %v3076_v60 = vld [vmem:[%s4093_s9 + $0x68] sm:$0xff]   ;;  %v3080_v46 = vld [vmem:[%s4093_s9 + $0x70] sm:$0xff]  }
 0x230   : > { %v971_v26 = vsel %vm969_vm9, %v3518_v27, %v968_v25  ;;  %v973_v19 = vsel %vm969_vm9, %v968_v25, %v3518_v27  ;;  %v1022_v27 = vpop.permute.xlu0 %1021  ;;  %v3075_v17 = vld [vmem:[%s4093_s9 + $0xa0] sm:$0xff]   ;;  %v3077_v61 = vld [vmem:[%s4093_s9 + $0xe8] sm:$0xff]   ;;  %2864 = vmatprep.subr.bf16.mxu0 %v3076_v60  ;;  %v3081_v62 = vld [vmem:[%s4093_s9 + $0xf0] sm:$0xff]  }
 0x231   : > { %v987_v45 = vmul.f32 %v978_v57, %v971_v26  ;;  %v988_v13 = vmul.f32 %v982_v58, %v973_v19  ;;  %1096 = vmatprep.subr.bf16.mxu1 %v1056_v4  ;;  %v1026_v33 = vsel %vm1025_vm11, %v3561_v7, %v1022_v27  ;;  %v1028_v21 = vsel %vm1025_vm11, %v1022_v27, %v3561_v7  ;;  %v3069_v57 = vld [vmem:[%s4093_s9 + $0xd8] sm:$0xff]   ;;  %v3089_v26 = vld [vmem:[%s4093_s9 + $0x1c0] sm:$0xff]  }
 0x232   : > { %1097 = vmatpush1.bf16.msra.mxu1 %v1055_v8  ;;  %v1041_v37 = vmul.f32 %v1034_v14, %v1026_v33  ;;  %v1042_v11 = vmul.f32 %v1038_v12, %v1028_v21  ;;  %v3071_v58 = vld [vmem:[%s4093_s9 + $0x98] sm:$0xff]   ;;  %2865 = vmatpush3.bf16.msra.mxu0 %v3078_v43 }
 0x233   : > { %v996_v5 = vpop.permute.xlu1 %995  ;;  %v1058_v0 = vpack.c.bf16 %v988_v13, %v986_v39  ;;  %v1057_v9 = vpack.c.bf16 %v987_v45, %v985_v28  ;;  %2866 = vmatprep.subr.bf16.mxu0 %v3080_v46  ;;  %v3084_v25 = vld [vmem:[%s4093_s9 + $0x78] sm:$0xff]   ;;  %v3104_v46 = vld [vmem:[%s4093_s9 + $0x160] sm:$0xff]  }
 0x234   : > { %v999_v29 = vsel %vm997_vm10, %v3523_v6, %v996_v5  ;;  %v1001_v30 = vsel %vm997_vm10, %v996_v5, %v3523_v6  ;;  %v3085_v4 = vld [vmem:[%s4093_s9 + $0xf8] sm:$0xff]  }
 0x235   : > { %v1015_v32 = vmul.f32 %v1006_v10, %v999_v29  ;;  %v1016_v18 = vmul.f32 %v1010_v16, %v1001_v30  ;;  %1098 = vmatprep.subr.bf16.mxu1 %v1058_v0  ;;  %v3086_v8 = vld [vmem:[%s4093_s9 + $0x38] sm:$0xff]   ;;  %v3088_v16 = vld [vmem:[%s4093_s9 + $0x140] sm:$0xff]  }
 0x236   : > { %1099 = vmatpush1.bf16.msra.mxu1 %v1057_v9  ;;  %2867 = vmatpush3.bf16.msra.mxu0 %v3082_v63  ;;  %v3087_v10 = vld [vmem:[%s4093_s9 + $0xb8] sm:$0xff]   ;;  %v3106_v63 = vld [vmem:[%s4093_s9 + $0x120] sm:$0xff]  }
 0x237   : > { %v1024_v22 = vpop.permute.xlu1 %1023  ;;  %v1060_v34 = vpack.c.bf16 %v1016_v18, %v1014_v31  ;;  %v1059_v35 = vpack.c.bf16 %v1015_v32, %v1013_v24  ;;  %2868 = vmatprep.subr.bf16.mxu0 %v3084_v25  ;;  %v3100_v60 = vld [vmem:[%s4093_s9 + $0x158] sm:$0xff]   ;;  %v3108_v25 = vld [vmem:[%s4093_s9 + $0x168] sm:$0xff]  }
 0x238   : > { %v1027_v6 = vsel %vm1025_vm11, %v3585_v40, %v1024_v22  ;;  %v1029_v36 = vsel %vm1025_vm11, %v1024_v22, %v3585_v40  ;;  %v3059_v40 = vld [vmem:[%s4093_s9 + $0x80] sm:$0xff]   ;;  %v3102_v43 = vld [vmem:[%s4093_s9 + $0x118] sm:$0xff]  }
 0x239   : > { %v1043_v38 = vmul.f32 %v1034_v14, %v1027_v6  ;;  %v1044_v41 = vmul.f32 %v1038_v12, %v1029_v36  ;;  %1100 = vmatprep.subr.bf16.mxu1 %v1060_v34 }
 0x23a   : > { %1101 = vmatpush1.bf16.msra.mxu1 %v1059_v35  ;;  %2869 = vmatpush3.bf16.msra.mxu0 %v3086_v8  ;;  %v3110_v8 = vld [vmem:[%s4093_s9 + $0x128] sm:$0xff]  }
 0x23b   : > { %v1062_v47 = vpack.c.bf16 %v1044_v41, %v1042_v11  ;;  %v1061_v7 = vpack.c.bf16 %v1043_v38, %v1041_v37  ;;  %2898 = vmatprep.subr.bf16.mxu0 %v3088_v16  ;;  %v3112_v16 = vld [vmem:[%s4093_s9 + $0x170] sm:$0xff]  }
 0x23d   : > { %1102 = vmatprep.subr.bf16.mxu1 %v1062_v47 }
 0x23e   : > { %1103 = vmatpush1.bf16.msra.mxu1 %v1061_v7 }
 0x23f   : > { %2876 = vmatprep.subr.bf16.mxu1 %v3057_v48 }
 0x240   : > { %v1066_v19 = vpop.permute.xlu0 %1065 }
 0x241   : > { %1119 = vmatmul.mubr.bf16.vlgmr.msra.gmra.mrb[0].mxu1 %v3053_v23  ;;  %v3090_v23 = vld [vmem:[%s4093_s9 + $0x100] sm:$0xff]  }
 0x242   : > { %2877 = vmatpush3.bf16.msra.mxu1 %v3059_v40  ;;  %v3091_v40 = vld [vmem:[%s4093_s9 + $0x180] sm:$0xff]  }
 0x243   : > { %2878 = vmatprep.subr.bf16.mxu1 %v3061_v50  ;;  %v3092_v50 = vld [vmem:[%s4093_s9 + $0x148] sm:$0xff]  }
 0x244   : > { %v1142_v39 = vpop.permute.xlu0 %1141 }
 0x245   : > { %v1199_v45 = vadd.f32 %v3458_v49, %v1142_v39  ;;  %v1201_v13 = vadd.f32 %v3463_v51, %v1142_v39  ;;  %v3116_v39 = vld [vmem:[%s4093_s9 + $0x178] sm:$0xff]  }
 0x246   : > { %2879 = vmatpush3.bf16.msra.mxu1 %v3063_v52  ;;  %v3093_v52 = vld [vmem:[%s4093_s9 + $0x1c8] sm:$0xff]  }
 0x247   : > { %2880 = vmatprep.subr.bf16.mxu1 %v3065_v54  ;;  %v1207_v5 = vmax.f32 %v1199_v45, 0.0  ;;  %v1208_v14 = vmax.f32 %v1201_v13, 0.0  ;;  %v3094_v54 = vld [vmem:[%s4093_s9 + $0x108] sm:$0xff]   ;;  %v3118_v45 = vld [vmem:[%s4093_s9 + $0x138] sm:$0xff]  }
 0x248   : > { %v1071_v28 = vpop.permute.xlu1 %1070  ;;  %v3119_v13 = vld [vmem:[%s4093_s9 + $0x1b8] sm:$0xff]  }
 0x249   : > { %v1211_v21 = vmin.f32 %v1207_v5, 6.0 }
 0x24a   : > { %2881 = vmatpush3.bf16.msra.mxu1 %v3067_v56  ;;  %v3095_v56 = vld [vmem:[%s4093_s9 + $0x188] sm:$0xff]  }
 0x24b   : > { %2882 = vmatprep.subr.bf16.mxu1 %v3069_v57  ;;  %v3096_v57 = vld [vmem:[%s4093_s9 + $0x150] sm:$0xff]  }
 0x24c   : > { %v1147_v42 = vpop.permute.xlu1 %1146 }
 0x24d   : > { %v1203_v2 = vadd.f32 %v3469_v53, %v1147_v42  ;;  %v1205_v1 = vadd.f32 %v3474_v55, %v1147_v42  ;;  %v1212_v53 = vmin.f32 %v1208_v14, 6.0  ;;  %v3117_v42 = vld [vmem:[%s4093_s9 + $0x1f8] sm:$0xff]  }
 0x24e   : > { %2883 = vmatpush3.bf16.msra.mxu1 %v3071_v58  ;;  %v3097_v58 = vld [vmem:[%s4093_s9 + $0x1d0] sm:$0xff]  }
 0x24f   : > { %2884 = vmatprep.subr.bf16.mxu1 %v3073_v59  ;;  %v1209_v30 = vmax.f32 %v1203_v2, 0.0  ;;  %v1210_v18 = vmax.f32 %v1205_v1, 0.0  ;;  %v3098_v59 = vld [vmem:[%s4093_s9 + $0x110] sm:$0xff]  }
 0x251   : > { %v1213_v35 = vmin.f32 %v1209_v30, 6.0  ;;  %v1214_v37 = vmin.f32 %v1210_v18, 6.0 }
 0x252   : > { %2885 = vmatpush3.bf16.msra.mxu1 %v3075_v17  ;;  %v3099_v17 = vld [vmem:[%s4093_s9 + $0x190] sm:$0xff]  }
 0x253   : > { %2886 = vmatprep.subr.bf16.mxu1 %v3077_v61  ;;  %v3101_v61 = vld [vmem:[%s4093_s9 + $0x1d8] sm:$0xff]  }
 0x256   : > { %2887 = vmatpush3.bf16.msra.mxu1 %v3079_v44  ;;  %v3103_v44 = vld [vmem:[%s4093_s9 + $0x198] sm:$0xff]  }
 0x257   : > { %2888 = vmatprep.subr.bf16.mxu1 %v3081_v62  ;;  %v3105_v62 = vld [vmem:[%s4093_s9 + $0x1e0] sm:$0xff]  }
 0x25a   : > { %2889 = vmatpush3.bf16.msra.mxu1 %v3083_v3  ;;  %v3107_v3 = vld [vmem:[%s4093_s9 + $0x1a0] sm:$0xff]  }
 0x25b   : > { %2890 = vmatprep.subr.bf16.mxu1 %v3085_v4  ;;  %v3109_v4 = vld [vmem:[%s4093_s9 + $0x1e8] sm:$0xff]  }
 0x25e   : > { %2891 = vmatpush3.bf16.msra.mxu1 %v3087_v10  ;;  %v3111_v10 = vld [vmem:[%s4093_s9 + $0x1a8] sm:$0xff]  }
 0x25f   : > { %2920 = vmatprep.subr.bf16.mxu1 %v3089_v26  ;;  %v3113_v26 = vld [vmem:[%s4093_s9 + $0x1f0] sm:$0xff]  }
 0x314   : > { %v1120_v27 = vpop.f32.mrb[0].mxu1 }
 0x315   : > { %v1121_v0 = vadd.f32 %v1120_v27, %v1066_v19  ;;  %v1122_v9 = vpop.f32.mrb[1].mxu1 }
 0x316   : > { %v1123_v12 = vadd.f32 %v1122_v9, %v1066_v19  ;;  %v1124_v29 = vpop.f32.mrb[2].mxu1  ;;  %v3114_v19 = vld [vmem:[%s4093_s9 + $0x130] sm:$0xff]  }
 0x317   : > { %v1129_v24 = vmax.f32 %v1121_v0, 0.0  ;;  %v1125_v31 = vadd.f32 %v1124_v29, %v1071_v28  ;;  %v1126_v32 = vpop.f32.mrb[3].mxu1 }
 0x318   : > { %v1130_v33 = vmax.f32 %v1123_v12, 0.0  ;;  %v1127_v49 = vadd.f32 %v1126_v32, %v1071_v28  ;;  %v3115_v28 = vld [vmem:[%s4093_s9 + $0x1b0] sm:$0xff]  }
 0x319   : > { %v1133_v51 = vmin.f32 %v1129_v24, 6.0  ;;  %v1131_v22 = vmax.f32 %v1125_v31, 0.0 }
 0x31a   : > { %v1134_v34 = vmin.f32 %v1130_v33, 6.0  ;;  %v1132_v55 = vmax.f32 %v1127_v49, 0.0 }
 0x31b   : > { %v1215_v6 = vadd.f32 %v1211_v21, %v1133_v51  ;;  %v1135_v36 = vmin.f32 %v1131_v22, 6.0 }
 0x31c   : > { %v1216_v11 = vadd.f32 %v1212_v53, %v1134_v34  ;;  %v1136_v38 = vmin.f32 %v1132_v55, 6.0 }
 0x31d   : > { %v1217_v41 = vadd.f32 %v1213_v35, %v1135_v36 }
 0x31e   : > { %v1218_v47 = vadd.f32 %v1214_v37, %v1136_v38 }
 0x31f   : > { %v3740_v7 = vpack.c.bf16 %v1217_v41, %v1215_v6  ;;  %v1904_v41 = vld [vmem:[%s4095_s11] sm:$0xff] }
 0x320   : > { %v1220_v48 = vpack.c.bf16 %v1218_v47, %v1216_v11  ;;  %v1905_v47 = vld [vmem:[%s4095_s11 + $0x8] sm:$0xff] }
 0x322   : > { %1381 = vmatprep.mubr.bf16.mxu0 %v1220_v48  ;;  %1551 = vmatprep.mubr.bf16.mxu1 %v1220_v48 }
 0x323   : > { %1382 = vmatmul.mubr.bf16.vlgmr.msra.gmra.mrb[8].mxu0 %v3740_v7  ;;  %1552 = vmatmul.mubr.bf16.vlgmr.msra.gmra.mrb[4].mxu1 %v3740_v7 }
 0x324   : > { %2899 = vmatpush3.bf16.msra.mxu0 %v3090_v23  ;;  %2921 = vmatpush3.bf16.msra.mxu1 %v3091_v40  ;;  %v3120_v23 = vld [vmem:[%s4094_s10 + $0x4] ss:$8 sps:$4 sm:$0xff]   ;;  %v2815_v40 = vld [vmem:[%s4100_s16] ss:$0 sm:$0xff] }
 0x325   : > { %1721 = vmatprep.mubr.bf16.mxu0 %v1220_v48  ;;  %1891 = vmatprep.mubr.bf16.mxu1 %v1220_v48  ;;  %v1907_v48 = vld [vmem:[%s4095_s11 + $0x18] sm:$0xff] }
 0x326   : > { %2900 = vmatprep.subr.bf16.mxu0 %v3092_v50  ;;  %2922 = vmatprep.subr.bf16.mxu1 %v3093_v52 }
 0x328   : > { %2901 = vmatpush3.bf16.msra.mxu0 %v3094_v54  ;;  %2923 = vmatpush3.bf16.msra.mxu1 %v3095_v56 }
 0x329   : > { %2902 = vmatprep.subr.bf16.mxu0 %v3096_v57  ;;  %2924 = vmatprep.subr.bf16.mxu1 %v3097_v58  ;;  %v2816_v57 = vld [vmem:[%s4100_s16 + $0x1] ss:$0 sm:$0xff] }
 0x32c   : > { %2903 = vmatpush3.bf16.msra.mxu0 %v3098_v59  ;;  %2925 = vmatpush3.bf16.msra.mxu1 %v3099_v17 }
 0x32d   : > { %2904 = vmatprep.subr.bf16.mxu0 %v3100_v60  ;;  %2926 = vmatprep.subr.bf16.mxu1 %v3101_v61 }
 0x330   : > { %2905 = vmatpush3.bf16.msra.mxu0 %v3102_v43  ;;  %2927 = vmatpush3.bf16.msra.mxu1 %v3103_v44  ;;  %v2817_v43 = vld [vmem:[%s4100_s16 + $0x2] ss:$0 sm:$0xff] }
 0x331   : > { %2906 = vmatprep.subr.bf16.mxu0 %v3104_v46  ;;  %2928 = vmatprep.subr.bf16.mxu1 %v3105_v62 }
 0x334   : > { %2907 = vmatpush3.bf16.msra.mxu0 %v3106_v63  ;;  %2929 = vmatpush3.bf16.msra.mxu1 %v3107_v3 }
 0x335   : > { %2908 = vmatprep.subr.bf16.mxu0 %v3108_v25  ;;  %2930 = vmatprep.subr.bf16.mxu1 %v3109_v4  ;;  %v2818_v25 = vld [vmem:[%s4100_s16 + $0x3] ss:$0 sm:$0xff] }
 0x338   : > { %2909 = vmatpush3.bf16.msra.mxu0 %v3110_v8  ;;  %2931 = vmatpush3.bf16.msra.mxu1 %v3111_v10 }
 0x339   : > { %2910 = vmatprep.subr.bf16.mxu0 %v3112_v16  ;;  %2932 = vmatprep.subr.bf16.mxu1 %v3113_v26 }
 0x33c   : > { %2911 = vmatpush3.bf16.msra.mxu0 %v3114_v19  ;;  %2933 = vmatpush3.bf16.msra.mxu1 %v3115_v28 }
 0x33d   : > { %2912 = vmatprep.subr.bf16.mxu0 %v3116_v39  ;;  %2934 = vmatprep.subr.bf16.mxu1 %v3117_v42  ;;  %v2819_v39 = vld [vmem:[%s4100_s16 + $0x6] ss:$0 sm:$0xff] }
 0x340   : > { %2913 = vmatpush3.bf16.msra.mxu0 %v3118_v45  ;;  %2935 = vmatpush3.bf16.msra.mxu1 %v3119_v13 }
 0x341   : > { %2054 = vmatprep.subr.bf16.mxu0 %v3151_v15 }
 0x343   : > { %1722 = vmatmul.mubr.bf16.vlgmr.msra.gmra.mrb[12].mxu0 %v3740_v7  ;;  %1892 = vmatmul.mubr.bf16.vlgmr.msra.gmra.mrb[8].mxu1 %v3740_v7  ;;  %v1906_v7 = vld [vmem:[%s4095_s11 + $0x10] sm:$0xff] }
 0x344   : > { %2824 = vmatprep.mubr.msk.bf16.mxu0 %vm1082_vm6, %v3120_v23  ;;  %v1916_v23 = vld [vmem:[%s4097_s13] sm:$0xff] }
 0x3f6   : > { %v2870_v2 = vpop.f32.mrb[8].mxu0  ;;  %v2892_v1 = vpop.f32.mrb[4].mxu1 }
 0x3f7   : > { %v2871_v27 = vpop.f32.mrb[9].mxu0  ;;  %v2893_v5 = vpop.f32.mrb[5].mxu1 }
 0x3f8   : > { %v2872_v0 = vadd.f32 %v2871_v27, %v2870_v2  ;;  %v3837_v9 = vadd.f32 %v2893_v5, %v2892_v1  ;;  %v2873_v14 = vpop.f32.mrb[10].mxu0  ;;  %v2895_v12 = vpop.f32.mrb[6].mxu1  ;;  %v3122_v1 = vld [vmem:[%s4094_s10] ss:$8 sps:$4 sm:$0xff]   ;;  %v3123_v27 = vld [vmem:[%s4094_s10 + $0x14] ss:$8 sps:$4 sm:$0xff]  }
 0x3f9   : > { %v2874_v29 = vpop.f32.mrb[11].mxu0  ;;  %v2896_v30 = vpop.f32.mrb[7].mxu1  ;;  %v3125_v5 = vld [vmem:[%s4094_s10 + $0x10] ss:$8 sps:$4 sm:$0xff]  }
 0x3fa   : > { %v2875_v24 = vadd.f32 %v2874_v29, %v2873_v14  ;;  %v3839_v31 = vadd.f32 %v2896_v30, %v2895_v12 }
 0x3fc   : > { %v3841_v32 = vpack.c.bf16 %v2875_v24, %v2872_v0  ;;  %v2006_v18 = vpack.c.bf16 %v3839_v31, %v3837_v9 }
 0x416   : > { %v2914_v33 = vpop.f32.mrb[12].mxu0  ;;  %v2936_v49 = vpop.f32.mrb[8].mxu1 }
 0x417   : > { %v2915_v21 = vpop.f32.mrb[13].mxu0  ;;  %v2937_v51 = vpop.f32.mrb[9].mxu1 }
 0x418   : > { %v3845_v22 = vadd.f32 %v2915_v21, %v2914_v33  ;;  %v3847_v53 = vadd.f32 %v2937_v51, %v2936_v49  ;;  %v2917_v34 = vpop.f32.mrb[14].mxu0  ;;  %v2939_v55 = vpop.f32.mrb[10].mxu1 }
 0x419   : > { %v2918_v35 = vpop.f32.mrb[15].mxu0  ;;  %v2940_v6 = vpop.f32.mrb[11].mxu1 }
 0x41a   : > { %v3849_v36 = vadd.f32 %v2918_v35, %v2917_v34  ;;  %v3851_v37 = vadd.f32 %v2940_v6, %v2939_v55  ;;  %1941 = vrot.lane.b32.xlu0 %v3847_v53, %s3157_s23 }
 0x41c   : > { %v2008_v11 = vpack.c.bf16 %v3849_v36, %v3845_v22  ;;  %1943 = vrot.lane.b32.xlu1 %v3851_v37, %s3157_s23  ;;  %v2009_v38 = vpack.c.bf16 %v3851_v37, %v3847_v53 }
 0x41e   : > { %1953 = vrot.lane.b32.xlu0 %v3845_v22, %s3158_s24 }
 0x420   : > { %1955 = vrot.lane.b32.xlu1 %v3849_v36, %s3158_s24 }
 0x422   : > { %1965 = vrot.lane.b32.xlu0 %v3847_v53, %s3158_s24 }
 0x424   : > { %1967 = vrot.lane.b32.xlu1 %v3851_v37, %s3158_s24 }
 0x426   : > { %1977 = vrot.lane.b32.xlu0 %v3837_v9, %s3150_s25 }
 0x428   : > { %1979 = vrot.lane.b32.xlu1 %v3839_v31, %s3150_s25 }
 0x42a   : > { %1989 = vrot.lane.b32.xlu0 %v3847_v53, %s3150_s25 }
 0x42c   : > { %1991 = vrot.lane.b32.xlu1 %v3851_v37, %s3150_s25 }
 0x42e   : > { %2012 = vperm.xlu0 %3044, %v1904_v41  }
 0x430   : > { %2017 = vperm.xlu1 %3043, %v1905_v47  }
 0x432   : > { %2022 = vperm.xlu0 %3044, %v1906_v7   ;;  %v3128_v7 = vld [vmem:[%s4096_s12 + $0x4] ss:$12 sps:$4 sm:$0xff]  }
 0x433   : > { %2362 = vmatprep.mubr.bf16.mxu1 %v3128_v7 }
 0x434   : > { %2027 = vperm.xlu1 %3043, %v1907_v48   ;;  %v3132_v48 = vld [vmem:[%s4096_s12 + $0x8] ss:$12 sps:$4 sm:$0xff]  }
 0x48c   : > { %v1942_v50 = vpop.permute.xlu0 %1941 }
 0x48d   : > { %v1951_v54 = vmul.f32 %v2815_v40, %v1942_v50  ;;  %v1918_v50 = vld [vmem:[%s4097_s13 + $0x10] sm:$0xff] }
 0x48e   : > { %v1944_v52 = vpop.permute.xlu1 %1943 }
 0x48f   : > { %v1952_v56 = vmul.f32 %v2815_v40, %v1944_v52  ;;  %v1917_v40 = vld [vmem:[%s4097_s13 + $0x8] sm:$0xff]  ;;  %v1924_v52 = vld [vmem:[%s4099_s15] sm:$0xff] }
 0x490   : > { %v1954_v58 = vpop.permute.xlu0 %1953 }
 0x491   : > { %v2001_v59 = vpack.c.bf16 %v1952_v56, %v1951_v54  ;;  %v1963_v60 = vmul.f32 %v2816_v57, %v1954_v58  ;;  %v1925_v54 = vld [vmem:[%s4099_s15 + $0x8] sm:$0xff]  ;;  %v1919_v56 = vld [vmem:[%s4097_s13 + $0x18] sm:$0xff] }
 0x492   : > { %v1956_v17 = vpop.permute.xlu1 %1955  ;;  %v1927_v58 = vld [vmem:[%s4099_s15 + $0x18] sm:$0xff] }
 0x493   : > { %v1964_v61 = vmul.f32 %v2816_v57, %v1956_v17  ;;  %2055 = vmatpush1.bf16.msra.mxu0 %v2001_v59  ;;  %v1926_v57 = vld [vmem:[%s4099_s15 + $0x10] sm:$0xff]  ;;  %v2826_v59 = vld [vmem:[%s4101_s17] ss:$0 sm:$0xff] }
 0x494   : > { %v1966_v44 = vpop.permute.xlu0 %1965  ;;  %2056 = vmatprep.subr.bf16.mxu0 %v3151_v15 }
 0x495   : > { %v2002_v46 = vpack.c.bf16 %v1964_v61, %v1963_v60  ;;  %v1975_v63 = vmul.f32 %v2817_v43, %v1966_v44 }
 0x496   : > { %v1968_v62 = vpop.permute.xlu1 %1967 }
 0x497   : > { %v1976_v3 = vmul.f32 %v2817_v43, %v1968_v62  ;;  %2057 = vmatpush1.bf16.msra.mxu0 %v2002_v46 }
 0x498   : > { %v1978_v4 = vpop.permute.xlu0 %1977  ;;  %2058 = vmatprep.subr.bf16.mxu0 %v3151_v15 }
 0x499   : > { %v2003_v8 = vpack.c.bf16 %v1976_v3, %v1975_v63  ;;  %v1987_v16 = vmul.f32 %v2818_v25, %v1978_v4 }
 0x49a   : > { %v1980_v10 = vpop.permute.xlu1 %1979 }
 0x49b   : > { %v1988_v26 = vmul.f32 %v2818_v25, %v1980_v10  ;;  %2059 = vmatpush1.bf16.msra.mxu0 %v2003_v8 }
 0x49c   : > { %2060 = vmatprep.subr.bf16.mxu0 %v3151_v15  ;;  %v1990_v42 = vpop.permute.xlu0 %1989 }
 0x49d   : > { %v2004_v19 = vpack.c.bf16 %v1988_v26, %v1987_v16  ;;  %v1999_v13 = vmul.f32 %v2819_v39, %v1990_v42  ;;  %v2830_v42 = vld [vmem:[%s4101_s17 + $0x5] ss:$0 sm:$0xff] }
 0x49e   : > { %v1992_v28 = vpop.permute.xlu1 %1991 }
 0x49f   : > { %2061 = vmatpush1.bf16.msra.mxu0 %v2004_v19  ;;  %v2000_v45 = vmul.f32 %v2819_v39, %v1992_v28 }
 0x4a0   : > { %2062 = vmatprep.subr.bf16.mxu0 %v3151_v15 }
 0x4a1   : > { %v2007_v2 = vpack.c.bf16 %v2000_v45, %v1999_v13 }
 0x4a3   : > { %2063 = vmatpush1.bf16.msra.mxu0 %v3841_v32 }
 0x4a4   : > { %2064 = vmatprep.subr.bf16.mxu0 %v3151_v15 }
 0x4a7   : > { %2065 = vmatpush1.bf16.msra.mxu0 %v2006_v18 }
 0x4a8   : > { %2066 = vmatprep.subr.bf16.mxu0 %v3151_v15 }
 0x4ab   : > { %2067 = vmatpush1.bf16.msra.mxu0 %v2007_v2 }
 0x4ac   : > { %2068 = vmatprep.subr.bf16.mxu0 %v3151_v15 }
 0x4af   : > { %2069 = vmatpush1.bf16.msra.mxu0 %v2008_v11  ;;  %v2018_v12 = vpop.permute.xlu1 %2017 }
 0x4b0   : > { %2070 = vmatprep.subr.bf16.mxu0 %v3151_v15  ;;  %v2013_v15 = vpop.permute.xlu0 %2012 }
 0x4b3   : > { %2071 = vmatpush1.bf16.msra.mxu0 %v2009_v38  ;;  %v2028_v55 = vpop.permute.xlu1 %2027 }
 0x4b4   : > { %v2023_v21 = vpop.permute.xlu0 %2022 }
 0x4b6   : > { %2087 = vmatmul.mubr.bf16.vlgmr.msra.gmra.mrb[16].mxu0 %v3122_v1 }
 0x4b7   : > { %2825 = vmatprep.mubr.msk.bf16.mxu0 %vm1082_vm6, %v3123_v27 }
 0x4be   : > { %2095 = vmatmul.mubr.bf16.gmra.mrb[20].mxu0 %v3125_v5  ;;  %v2827_v5 = vld [vmem:[%s4101_s17 + $0x1] ss:$0 sm:$0xff] }
 0x4bf   : > { %2981 = vmatprep.mubr.msk.bf16.mxu0 %vm2323_vm12, %v3132_v48 }
 0x589   : > { %v2088_v0 = vpop.f32.mrb[16].mxu0 }
 0x58a   : > { %v2089_v9 = vadd.f32 %v2088_v0, %v2013_v15  ;;  %v2090_v14 = vpop.f32.mrb[17].mxu0 }
 0x58b   : > { %v2091_v29 = vpop.f32.mrb[18].mxu0 }
 0x58c   : > { %v2103_v30 = vmax.f32 %v2089_v9, 0.0  ;;  %v2092_v24 = vadd.f32 %v2091_v29, %v2018_v12  ;;  %v2093_v31 = vpop.f32.mrb[19].mxu0 }
 0x58e   : > { %v2107_v18 = vmin.f32 %v2103_v30, 6.0  ;;  %v2104_v33 = vmax.f32 %v2092_v24, 0.0 }
 0x590   : > { %v2108_v49 = vmin.f32 %v2104_v33, 6.0  ;;  %2111 = vrot.lane.b32.xlu0 %v2107_v18, %s3157_s23  ;;  %v2831_v33 = vld [vmem:[%s4101_s17 + $0x6] ss:$0 sm:$0xff] }
 0x591   : > { %v2096_v51 = vpop.f32.mrb[20].mxu0 }
 0x592   : > { %v2097_v22 = vadd.f32 %v2096_v51, %v2023_v21  ;;  %v2098_v53 = vpop.f32.mrb[21].mxu0  ;;  %2113 = vrot.lane.b32.xlu1 %v2108_v49, %s3157_s23  ;;  %v2263_v34 = vpack.c.bf16 %v2108_v49, %v2107_v18 }
 0x593   : > { %v2099_v35 = vpop.f32.mrb[22].mxu0 }
 0x594   : > { %v2105_v6 = vmax.f32 %v2097_v22, 0.0  ;;  %v2100_v36 = vadd.f32 %v2099_v35, %v2028_v55  ;;  %2183 = vrot.lane.b32.xlu0 %v2107_v18, %s4116_s1  ;;  %2942 = vmatprep.subr.bf16.mxu1 %v2263_v34  ;;  %v2101_v37 = vpop.f32.mrb[23].mxu0  ;;  %v2828_v55 = vld [vmem:[%s4101_s17 + $0x2] ss:$0 sm:$0xff] }
 0x596   : > { %v2106_v11 = vmax.f32 %v2100_v36, 0.0  ;;  %2185 = vrot.lane.b32.xlu1 %v2108_v49, %s4116_s1  ;;  %v3940_v38 = vmin.f32 %v2105_v6, 6.0 }
 0x598   : > { %v3942_v41 = vmin.f32 %v2106_v11, 6.0  ;;  %2129 = vrot.lane.b32.xlu0 %v2107_v18, %s3158_s24 }
 0x59a   : > { %2131 = vrot.lane.b32.xlu1 %v2108_v49, %s3158_s24  ;;  %v2264_v47 = vpack.c.bf16 %v3942_v41, %v3940_v38 }
 0x59c   : > { %2201 = vrot.lane.b32.xlu0 %v2107_v18, %s3159_s22 }
 0x59e   : > { %2203 = vrot.lane.b32.xlu1 %v2108_v49, %s3159_s22 }
 0x5a0   : > { %2147 = vrot.lane.b32.xlu0 %v2107_v18, %s3160_s3 }
 0x5a2   : > { %2149 = vrot.lane.b32.xlu1 %v2108_v49, %s3160_s3 }
 0x5a4   : > { %2219 = vrot.lane.b32.xlu0 %v2107_v18, %s3161_s21 }
 0x5a6   : > { %2221 = vrot.lane.b32.xlu1 %v2108_v49, %s3161_s21 }
 0x5a8   : > { %2165 = vrot.lane.b32.xlu0 %v2107_v18, %s3150_s25 }
 0x5aa   : > { %2167 = vrot.lane.b32.xlu1 %v2108_v49, %s3150_s25 }
 0x5ac   : > { %2115 = vrot.lane.b32.xlu0 %v3940_v38, %s3157_s23 }
 0x5ae   : > { %2117 = vrot.lane.b32.xlu1 %v3942_v41, %s3157_s23 }
 0x5b0   : > { %2187 = vrot.lane.b32.xlu0 %v3940_v38, %s4116_s1 }
 0x5b2   : > { %2189 = vrot.lane.b32.xlu1 %v3942_v41, %s4116_s1 }
 0x5b4   : > { %2133 = vrot.lane.b32.xlu0 %v3940_v38, %s3158_s24 }
 0x5b6   : > { %2135 = vrot.lane.b32.xlu1 %v3942_v41, %s3158_s24 }
 0x5b8   : > { %2205 = vrot.lane.b32.xlu0 %v3940_v38, %s3159_s22 }
 0x5ba   : > { %2207 = vrot.lane.b32.xlu1 %v3942_v41, %s3159_s22 }
 0x5bc   : > { %2151 = vrot.lane.b32.xlu0 %v3940_v38, %s3160_s3 }
 0x5be   : > { %2153 = vrot.lane.b32.xlu1 %v3942_v41, %s3160_s3 }
 0x5c0   : > { %2223 = vrot.lane.b32.xlu0 %v3940_v38, %s3161_s21 }
 0x5c2   : > { %2225 = vrot.lane.b32.xlu1 %v3942_v41, %s3161_s21 }
 0x5c4   : > { %2169 = vrot.lane.b32.xlu0 %v3940_v38, %s3150_s25 }
 0x5c6   : > { %2171 = vrot.lane.b32.xlu1 %v3942_v41, %s3150_s25 }
 0x5c8   : > { %2237 = vrot.lane.b32.xlu0 %v2107_v18, %s3162_s28 }
 0x5ca   : > { %2239 = vrot.lane.b32.xlu1 %v2108_v49, %s3162_s28 }
 0x5cc   : > { %2241 = vrot.lane.b32.xlu0 %v3940_v38, %s3162_s28 }
 0x5ce   : > { %2243 = vrot.lane.b32.xlu1 %v3942_v41, %s3162_s28 }
 0x5d0   : > { %2275 = vperm.xlu0 %3044, %v1916_v23   ;;  %v2832_v23 = vld [vmem:[%s4101_s17 + $0x7] ss:$0 sm:$0xff] }
 0x5d2   : > { %2280 = vperm.xlu1 %3043, %v1917_v40  }
 0x5d4   : > { %2285 = vperm.xlu0 %3044, %v1918_v50  }
 0x5d6   : > { %2438 = vperm.xlu1 %3043, %v1924_v52  }
 0x5d8   : > { %2443 = vperm.xlu0 %3044, %v1925_v54  }
 0x5da   : > { %2290 = vperm.xlu1 %3043, %v1919_v56  }
 0x5dc   : > { %2448 = vperm.xlu0 %3044, %v1926_v57  }
 0x5de   : > { %2453 = vperm.xlu1 %3043, %v1927_v58   ;;  %v2829_v58 = vld [vmem:[%s4101_s17 + $0x3] ss:$0 sm:$0xff] }
 0x602   : > { %v2112_v17 = vpop.permute.xlu0 %2111 }
 0x603   : > { %v2125_v61 = vmul.f32 %v2826_v59, %v2112_v17 }
 0x604   : > { %v2114_v60 = vpop.permute.xlu1 %2113 }
 0x605   : > { %v2126_v43 = vmul.f32 %v2826_v59, %v2114_v60 }
 0x606   : > { %v2184_v44 = vpop.permute.xlu0 %2183 }
 0x607   : > { %v2255_v46 = vpack.c.bf16 %v2126_v43, %v2125_v61  ;;  %v2197_v27 = vmul.f32 %v2830_v42, %v2184_v44 }
 0x608   : > { %v2186_v62 = vpop.permute.xlu1 %2185 }
 0x609   : > { %2943 = vmatpush3.bf16.msra.mxu1 %v2255_v46  ;;  %v2198_v45 = vmul.f32 %v2830_v42, %v2186_v62 }
 0x60a   : > { %v2130_v63 = vpop.permute.xlu0 %2129  ;;  %2944 = vmatprep.subr.bf16.mxu1 %v2264_v47 }
 0x60b   : > { %v2265_v14 = vpack.c.bf16 %v2198_v45, %v2197_v27  ;;  %v2143_v29 = vmul.f32 %v2827_v5, %v2130_v63 }
 0x60c   : > { %v2132_v3 = vpop.permute.xlu1 %2131 }
 0x60d   : > { %v2144_v0 = vmul.f32 %v2827_v5, %v2132_v3 }
 0x60e   : > { %v2202_v25 = vpop.permute.xlu0 %2201 }
 0x60f   : > { %v2257_v18 = vpack.c.bf16 %v2144_v0, %v2143_v29  ;;  %v2215_v34 = vmul.f32 %v2831_v33, %v2202_v25 }
 0x610   : > { %v2204_v4 = vpop.permute.xlu1 %2203 }
 0x611   : > { %v2216_v21 = vmul.f32 %v2831_v33, %v2204_v4 }
 0x612   : > { %v2148_v8 = vpop.permute.xlu0 %2147 }
 0x613   : > { %v2267_v37 = vpack.c.bf16 %v2216_v21, %v2215_v34  ;;  %v2161_v38 = vmul.f32 %v2828_v55, %v2148_v8 }
 0x614   : > { %v2150_v10 = vpop.permute.xlu1 %2149 }
 0x615   : > { %v2162_v6 = vmul.f32 %v2828_v55, %v2150_v10 }
 0x616   : > { %v2220_v16 = vpop.permute.xlu0 %2219 }
 0x617   : > { %v2259_v48 = vpack.c.bf16 %v2162_v6, %v2161_v38  ;;  %v2233_v57 = vmul.f32 %v2832_v23, %v2220_v16  ;;  %v2833_v16 = vld [vmem:[%s4101_s17 + $0x8] ss:$0 sm:$0xff] }
 0x618   : > { %v2222_v26 = vpop.permute.xlu1 %2221 }
 0x619   : > { %v2234_v50 = vmul.f32 %v2832_v23, %v2222_v26 }
 0x61a   : > { %v2166_v19 = vpop.permute.xlu0 %2165 }
 0x61b   : > { %v2269_v61 = vpack.c.bf16 %v2234_v50, %v2233_v57  ;;  %v2179_v44 = vmul.f32 %v2829_v58, %v2166_v19  ;;  %v3126_v19 = vld [vmem:[%s4096_s12] ss:$12 sps:$4 sm:$0xff]  }
 0x61c   : > { %v2168_v28 = vpop.permute.xlu1 %2167 }
 0x61d   : > { %v2180_v17 = vmul.f32 %v2829_v58, %v2168_v28 }
 0x61e   : > { %v2116_v39 = vpop.permute.xlu0 %2115 }
 0x61f   : > { %v2127_v2 = vmul.f32 %v2826_v59, %v2116_v39  ;;  %v2261_v3 = vpack.c.bf16 %v2180_v17, %v2179_v44 }
 0x620   : > { %v2118_v13 = vpop.permute.xlu1 %2117 }
 0x621   : > { %v2128_v1 = vmul.f32 %v2826_v59, %v2118_v13 }
 0x622   : > { %v2188_v15 = vpop.permute.xlu0 %2187 }
 0x623   : > { %v2256_v9 = vpack.c.bf16 %v2128_v1, %v2127_v2  ;;  %v2199_v30 = vmul.f32 %v2830_v42, %v2188_v15  ;;  %v3129_v2 = vld [vmem:[%s4096_s12 + $0x1c] ss:$12 sps:$4 sm:$0xff]  }
 0x624   : > { %v2190_v12 = vpop.permute.xlu1 %2189 }
 0x625   : > { %v2200_v24 = vmul.f32 %v2830_v42, %v2190_v12  ;;  %2945 = vmatpush3.bf16.msra.mxu1 %v2256_v9  ;;  %v3131_v9 = vld [vmem:[%s4096_s12 + $0x18] ss:$12 sps:$4 sm:$0xff]  }
 0x626   : > { %v2134_v31 = vpop.permute.xlu0 %2133  ;;  %2946 = vmatprep.subr.bf16.mxu1 %v2265_v14  ;;  %v3133_v14 = vld [vmem:[%s4096_s12 + $0x20] ss:$12 sps:$4 sm:$0xff]  }
 0x627   : > { %v2266_v49 = vpack.c.bf16 %v2200_v24, %v2199_v30  ;;  %v2145_v22 = vmul.f32 %v2827_v5, %v2134_v31  ;;  %v3134_v12 = vld [vmem:[%s4098_s14] sm:$0xff]  }
 0x628   : > { %v2136_v51 = vpop.permute.xlu1 %2135 }
 0x629   : > { %v2146_v53 = vmul.f32 %v2827_v5, %v2136_v51  ;;  %2947 = vmatpush3.bf16.msra.mxu1 %v2257_v18 }
 0x62a   : > { %v2206_v35 = vpop.permute.xlu0 %2205  ;;  %2948 = vmatprep.subr.bf16.mxu1 %v2266_v49 }
 0x62b   : > { %v2258_v36 = vpack.c.bf16 %v2146_v53, %v2145_v22  ;;  %v2217_v41 = vmul.f32 %v2831_v33, %v2206_v35 }
 0x62c   : > { %v2208_v11 = vpop.permute.xlu1 %2207 }
 0x62d   : > { %v2218_v47 = vmul.f32 %v2831_v33, %v2208_v11  ;;  %2949 = vmatpush3.bf16.msra.mxu1 %v2258_v36 }
 0x62e   : > { %v2152_v7 = vpop.permute.xlu0 %2151  ;;  %2950 = vmatprep.subr.bf16.mxu1 %v2267_v37 }
 0x62f   : > { %v2268_v40 = vpack.c.bf16 %v2218_v47, %v2217_v41  ;;  %v2163_v54 = vmul.f32 %v2828_v55, %v2152_v7 }
 0x630   : > { %v2154_v52 = vpop.permute.xlu1 %2153 }
 0x631   : > { %v2164_v56 = vmul.f32 %v2828_v55, %v2154_v52  ;;  %2951 = vmatpush3.bf16.msra.mxu1 %v2259_v48 }
 0x632   : > { %v2224_v59 = vpop.permute.xlu0 %2223  ;;  %2952 = vmatprep.subr.bf16.mxu1 %v2268_v40 }
 0x633   : > { %v2260_v60 = vpack.c.bf16 %v2164_v56, %v2163_v54  ;;  %v2235_v46 = vmul.f32 %v2832_v23, %v2224_v59 }
 0x634   : > { %v2226_v43 = vpop.permute.xlu1 %2225 }
 0x635   : > { %v2236_v62 = vmul.f32 %v2832_v23, %v2226_v43  ;;  %2953 = vmatpush3.bf16.msra.mxu1 %v2260_v60 }
 0x636   : > { %v2170_v63 = vpop.permute.xlu0 %2169  ;;  %2954 = vmatprep.subr.bf16.mxu1 %v2269_v61 }
 0x637   : > { %v2270_v25 = vpack.c.bf16 %v2236_v62, %v2235_v46  ;;  %v2181_v8 = vmul.f32 %v2829_v58, %v2170_v63 }
 0x638   : > { %v2172_v4 = vpop.permute.xlu1 %2171 }
 0x639   : > { %v2182_v10 = vmul.f32 %v2829_v58, %v2172_v4  ;;  %2955 = vmatpush3.bf16.msra.mxu1 %v2261_v3 }
 0x63a   : > { %v2238_v26 = vpop.permute.xlu0 %2237  ;;  %2956 = vmatprep.subr.bf16.mxu1 %v2270_v25 }
 0x63b   : > { %v2262_v28 = vpack.c.bf16 %v2182_v10, %v2181_v8  ;;  %v2251_v42 = vmul.f32 %v2833_v16, %v2238_v26 }
 0x63c   : > { %v2240_v39 = vpop.permute.xlu1 %2239 }
 0x63d   : > { %v2252_v45 = vmul.f32 %v2833_v16, %v2240_v39  ;;  %2957 = vmatpush3.bf16.msra.mxu1 %v2262_v28 }
 0x63e   : > { %v2242_v13 = vpop.permute.xlu0 %2241  ;;  %2985 = vmatprep.subr.bf16.mxu1 %v3841_v32 }
 0x63f   : > { %v2271_v1 = vpack.c.bf16 %v2252_v45, %v2251_v42  ;;  %v2253_v5 = vmul.f32 %v2833_v16, %v2242_v13 }
 0x640   : > { %v2244_v27 = vpop.permute.xlu1 %2243  ;;  %2363 = vmatmul.mubr.bf16.vlgmr.msra.gmra.mrb[12].mxu1 %v3126_v19 }
 0x641   : > { %v2254_v15 = vmul.f32 %v2833_v16, %v2244_v27  ;;  %2977 = vmatprep.subr.bf16.mxu0 %v2271_v1  ;;  %2986 = vmatpush3.bf16.msra.mxu1 %v3841_v32  ;;  %v3135_v32 = vld [vmem:[%s4098_s14 + $0x8] sm:$0xff]  }
 0x642   : > { %2978 = vmatpush3.bf16.msra.mxu0 %v2271_v1  ;;  %2370 = vmatprep.mubr.bf16.mxu1 %v3129_v2 }
 0x643   : > { %v2272_v0 = vpack.c.bf16 %v2254_v15, %v2253_v5  ;;  %v2533_v15 = vld [vmem:[%s4102_s18] sm:$0xff] }
 0x645   : > { %2979 = vmatprep.subr.bf16.mxu0 %v2272_v0 }
 0x646   : > { %2980 = vmatpush3.bf16.msra.mxu0 %v2272_v0 }
 0x648   : > { %2371 = vmatmul.mubr.bf16.gmra.mrb[16].mxu1 %v3131_v9  ;;  %v2846_v9 = vld [vmem:[%s4102_s18 + $0x20] sm:$0xff] }
 0x649   : > { %2982 = vmatmul.mubr.msk.bf16.vlgmr.msra.gmra.mrb[24].mxu0 %vm2323_vm12, %v3133_v14  ;;  %2987 = vmatprep.mubr.msk.bf16.mxu1 %vm1082_vm6, %v3134_v12  ;;  %v2534_v12 = vld [vmem:[%s4102_s18 + $0x8] sm:$0xff] }
 0x64f   : > { %v2276_v29 = vpop.permute.xlu0 %2275 }
 0x650   : > { %2988 = vmatmul.mubr.msk.bf16.vlgmr.msra.gmra.mrb[20].mxu1 %vm1082_vm6, %v3135_v32  ;;  %v2847_v32 = vld [vmem:[%s4102_s18 + $0x28] sm:$0xff] }
 0x651   : > { %v2281_v30 = vpop.permute.xlu1 %2280 }
 0x653   : > { %v2286_v18 = vpop.permute.xlu0 %2285 }
 0x655   : > { %v2439_v22 = vpop.permute.xlu1 %2438 }
 0x657   : > { %v2444_v53 = vpop.permute.xlu0 %2443 }
 0x659   : > { %v2291_v48 = vpop.permute.xlu1 %2290 }
 0x65b   : > { %v2449_v57 = vpop.permute.xlu0 %2448 }
 0x65d   : > { %v2454_v43 = vpop.permute.xlu1 %2453 }
 0x713   : > { %v2958_v24 = vpop.f32.mrb[12].mxu1 }
 0x714   : > { %v2959_v31 = vpop.f32.mrb[13].mxu1 }
 0x715   : > { %v2960_v33 = vadd.f32 %v2959_v31, %v2958_v24  ;;  %v2961_v49 = vpop.f32.mrb[14].mxu1  ;;  %v2535_v24 = vld [vmem:[%s4102_s18 + $0x10] sm:$0xff] }
 0x716   : > { %v2962_v21 = vpop.f32.mrb[15].mxu1 }
 0x717   : > { %v2963_v51 = vadd.f32 %v2962_v21, %v2961_v49  ;;  %v2365_v6 = vadd.f32 %v2960_v33, %v2276_v29  ;;  %v2849_v21 = vld [vmem:[%s4102_s18 + $0x38] sm:$0xff] }
 0x719   : > { %v2368_v7 = vadd.f32 %v2963_v51, %v2281_v30  ;;  %v2848_v30 = vld [vmem:[%s4102_s18 + $0x30] sm:$0xff]  ;;  %v2536_v51 = vld [vmem:[%s4102_s18 + $0x18] sm:$0xff] }
 0x71b   : > { %v2964_v34 = vpop.f32.mrb[16].mxu1 }
 0x71c   : > { %v2965_v55 = vpop.f32.mrb[17].mxu1  ;;  %v2983_v35 = vpop.f32.mrb[24].mxu0 }
 0x71d   : > { %v2966_v36 = vadd.f32 %v2965_v55, %v2964_v34  ;;  %v2967_v37 = vpop.f32.mrb[18].mxu1  ;;  %v2413_v11 = vpop.f32.mrb[25].mxu0 }
 0x71e   : > { %v2414_v38 = vadd.f32 %v2413_v11, %v2365_v6  ;;  %v2968_v41 = vpop.f32.mrb[19].mxu1  ;;  %v2984_v47 = vpop.f32.mrb[26].mxu0 }
 0x71f   : > { %v2373_v23 = vadd.f32 %v2966_v36, %v2286_v18  ;;  %v2969_v40 = vadd.f32 %v2968_v41, %v2967_v37  ;;  %v2416_v50 = vpop.f32.mrb[27].mxu0 }
 0x720   : > { %v2417_v52 = vadd.f32 %v2416_v50, %v2368_v7  ;;  %v2428_v44 = vmax.f32 %v2414_v38, 0.0 }
 0x721   : > { %v2422_v54 = vadd.f32 %v2983_v35, %v2373_v23  ;;  %v2376_v56 = vadd.f32 %v2969_v40, %v2291_v48 }
 0x722   : > { %v2429_v8 = vmax.f32 %v2417_v52, 0.0  ;;  %v2432_v19 = vmin.f32 %v2428_v44, 6.0 }
 0x723   : > { %v2425_v58 = vadd.f32 %v2984_v47, %v2376_v56  ;;  %v2989_v59 = vpop.f32.mrb[20].mxu1  ;;  %v2430_v17 = vmax.f32 %v2422_v54, 0.0 }
 0x724   : > { %v2515_v60 = vadd.f32 %v2989_v59, %v2449_v57  ;;  %v2506_v61 = vpop.f32.mrb[21].mxu1  ;;  %v2433_v27 = vmin.f32 %v2429_v8, 6.0 }
 0x725   : > { %v2507_v46 = vadd.f32 %v2506_v61, %v2439_v22  ;;  %v2990_v62 = vpop.f32.mrb[22].mxu1  ;;  %v2431_v63 = vmax.f32 %v2425_v58, 0.0  ;;  %v2434_v26 = vmin.f32 %v2430_v17, 6.0 }
 0x726   : > { %v2523_v3 = vmax.f32 %v2515_v60, 0.0  ;;  %v2518_v25 = vadd.f32 %v2990_v62, %v2454_v43  ;;  %v2509_v4 = vpop.f32.mrb[23].mxu1 }
 0x727   : > { %v2521_v10 = vmax.f32 %v2507_v46, 0.0  ;;  %v2510_v16 = vadd.f32 %v2509_v4, %v2444_v53  ;;  %v2435_v13 = vmin.f32 %v2431_v63, 6.0 }
 0x728   : > { %v2527_v28 = vmin.f32 %v2523_v3, 6.0  ;;  %v2524_v39 = vmax.f32 %v2518_v25, 0.0 }
 0x729   : > { %v2525_v42 = vmin.f32 %v2521_v10, 6.0  ;;  %v2522_v45 = vmax.f32 %v2510_v16, 0.0 }
 0x72a   : > { %v2531_v2 = vadd.f32 %v2527_v28, %v2434_v26  ;;  %v2528_v1 = vmin.f32 %v2524_v39, 6.0 }
 0x72b   : > { %v2529_v5 = vadd.f32 %v2525_v42, %v2432_v19  ;;  %v2526_v0 = vmin.f32 %v2522_v45, 6.0 }
 0x72c   : > { %v2532_v14 = vadd.f32 %v2528_v1, %v2435_v13  ;;  %v2560_v22 = vmul.f32 %v2848_v30, %v2531_v2  ;;  %v2539_v34 = vmul.f32 %v2535_v24, %v2531_v2 }
 0x72d   : > { %v2530_v29 = vadd.f32 %v2526_v0, %v2433_v27  ;;  %v2537_v31 = vmul.f32 %v2533_v15, %v2529_v5  ;;  %v2558_v18 = vmul.f32 %v2846_v9, %v2529_v5 }
 0x72e   : > { %v2561_v35 = vmul.f32 %v2849_v21, %v2532_v14  ;;  %v2540_v36 = vmul.f32 %v2536_v51, %v2532_v14 }
 0x72f   : > { %v2538_v33 = vmul.f32 %v2534_v12, %v2530_v29  ;;  %v2559_v49 = vmul.f32 %v2847_v32, %v2530_v29 }
 0x731   : > { %v2562_v53 = vadd.f32 %v2559_v49, %v2558_v18  ;;  %v2541_v55 = vadd.f32 %v2538_v33, %v2537_v31 }
 0x733   : > { %v2563_v6 = vadd.f32 %v2562_v53, %v2560_v22  ;;  %v2542_v37 = vadd.f32 %v2541_v55, %v2539_v34 }
 0x735   : > { %v2564_v11 = vadd.f32 %v2563_v6, %v2561_v35  ;;  %v2543_v38 = vadd.f32 %v2542_v37, %v2540_v36 }
 0x737   : > { %2565 = vadd.xlane.f32.xlu1 %v2564_v11  ;;  %2544 = vadd.xlane.f32.xlu0 %v2543_v38 }
 0x7c4   : > { %v2566_v41 = vpop.xlane.xlu1 %2565  ;;  %v2545_v47 = vpop.xlane.xlu0 %2544 }
 0x7c5   : > { %v2567_v7 = vrot.slane %v2566_v41, 4  ;;  %v2546_v48 = vrot.slane %v2545_v47, 4 }
 0x7c7   : > { %v2568_v23 = vadd.f32 %v2567_v7, %v2566_v41  ;;  %v2547_v40 = vadd.f32 %v2546_v48, %v2545_v47 }
 0x7c9   : > { %v2569_v50 = vrot.slane %v2568_v23, 2  ;;  %v2548_v52 = vrot.slane %v2547_v40, 2 }
 0x7cb   : > { %v2570_v54 = vadd.f32 %v2569_v50, %v2568_v23  ;;  %v2549_v56 = vadd.f32 %v2548_v52, %v2547_v40 }
 0x7cd   : > { %v2550_v57 = vrot.slane %v2549_v56, 1  ;;  %v2571_v58 = vrot.slane %v2570_v54, 1 }
 0x7cf   : > { %v2551_v59 = vadd.f32 %v2550_v57, %v2549_v56  ;;  %v2572_v17 = vadd.f32 %v2571_v58, %v2570_v54 }
 0x7d1   : > { %2991 = vpush %v2551_v59 }
 0x7d2   : > { %2993 = vpush %v2572_v17 }
 0x802   : > { %s2992_s21 = spop %2991 }
 0x803   : > { %s2994_s26 = spop %2993  ;;  %v2582_v62 = vstv %s2992_s21 }
 0x804   : > { %v2574_v60 = vstv %s2994_s26 }
 0x805   : > { %v2850_v61 = vmul.f32 -1.442695, %v2574_v60 }
 0x807   : > { %3136 = vpow2.f32 %v2850_v61 }
 0x811   : > { %v3137_v43 = vpop.eup %3136 }
 0x812   : > { %v2579_v44 = vadd.f32 1.0, %v3137_v43 }
 0x814   : > { %3138 = vrcp.f32 %v2579_v44 }
 0x81e   : > { %v3139_v46 = vpop.eup %3138 }
 0x81f   : > { %v2583_v63 = vsel %vm2575_vm13, %v2582_v62, %v3139_v46 }
 0x820   : > { %2585 = vst.msk [vmem:[%s598_s29] sm:$0x1] %vm2584_vm14, %v2583_v63 }
 0x821 PF: > { %s29_s0 = sadd.s32 1, %s3146_s0  }
 0x822   : > { %p26_p4 = scmp.ge.s32.totalorder %s29_s0, 4  }
 0x824   :  { %28 = sbr.rel (!%p26_p4) target bundleno = 5 (0x5), region = 130 }

</bundles_post_ra>
